<compile_context>
chip_gen: v5e
topology: v5e:2x2
jax: 0.10.0
libtpu: 0.0.40
codegen_flags: <defaults>
</compile_context>

<pallas_src>
import functools

import numpy as np

import jax
import jax.numpy as jnp
from jax.experimental import pallas as pl
from jax.experimental.pallas import tpu as pltpu


# ------------------------------ fused kernel -------------------------------

def _net_kernel(x_ref, c1w_ref, c1b_ref, c2w_ref, c2b_ref,
                fc1w_ref, fc1b_ref, fc2w_ref, fc2b_ref, o_ref, *, tb):
    f32 = jnp.float32
    bf16 = jnp.bfloat16

    # ---- conv1: five banded MXU matmuls (bf16 operands, f32 accumulate) -----
    # x layout: (in_row h, sample n, in_col w); flatten rows once, slice per band.
    xflat = x_ref[...].reshape(28 * tb, 28).astype(bf16)
    acc1 = jnp.dot(xflat[:24 * tb], c1w_ref[0], preferred_element_type=f32)
    for kh in range(1, 5):
        acc1 = acc1 + jnp.dot(xflat[kh * tb:(kh + 24) * tb], c1w_ref[kh],
                              preferred_element_type=f32)
    # acc1: (24*tb, 256); lanes = [even out-cols | odd out-cols], 120 valid + 8 pad each.

    # ---- pool1 (2x2) -> +bias -> relu (bias commutes with max-pool) ---------
    v1 = acc1.reshape(12, 2, tb, 256)
    m1 = jnp.maximum(v1[:, 0], v1[:, 1])                      # row-pair max
    p1 = jnp.maximum(m1[..., :128], m1[..., 128:])            # col-pair max, lane-aligned
    a1 = jnp.maximum(p1.reshape(12 * tb, 128) + c1b_ref[...], 0.0).astype(bf16)

    # ---- conv2: five banded MXU matmuls --------------------------------------
    # TODO(synk): nn.Dropout2d is eval-mode identity here (inference semantics).
    acc2 = jnp.dot(a1[:8 * tb], c2w_ref[0], preferred_element_type=f32)
    for kh in range(1, 5):
        acc2 = acc2 + jnp.dot(a1[kh * tb:(kh + 8) * tb], c2w_ref[kh],
                              preferred_element_type=f32)
    # acc2: (8*tb, 256); lanes = [even out-cols | odd out-cols], 80 valid + 48 pad each.

    # ---- pool2 (2x2) -> +bias -> relu ----------------------------------------
    v2 = acc2.reshape(4, 2, tb, 256)
    m2 = jnp.maximum(v2[:, 0], v2[:, 1])
    p2 = jnp.maximum(m2[..., :128], m2[..., 128:])
    a2 = jnp.maximum(p2.reshape(4 * tb, 128) + c2b_ref[...], 0.0).astype(bf16)

    # ---- fc1 + relu: 4 accumulated K-chunks (NCHW flatten folded into weights)
    h = jnp.dot(a2[:tb], fc1w_ref[0], preferred_element_type=f32)
    for i in range(1, 4):
        h = h + jnp.dot(a2[i * tb:(i + 1) * tb], fc1w_ref[i],
                        preferred_element_type=f32)
    h = jnp.maximum(h + fc1b_ref[...], 0.0)
    # TODO(synk): F.dropout is eval-mode identity here.

    # ---- fc2: lane-dense (TB, 128) padded output store ------------------------
    out = jnp.dot(h.astype(bf16), fc2w_ref[...], preferred_element_type=f32) + fc2b_ref[...]
    o_ref[...] = out.astype(o_ref.dtype)


# ------------------------------ host wrapper --------------------------------

def _pick_batch_tile(n):
    """Multiple of 16 (bf16 sublane tile), capped for VMEM, >=2 grid steps when possible."""
    cap = 256                      # keeps per-step VMEM well under v7x's 64 MiB
    if n < 32:
        return 16
    half = (n // 2) // 16 * 16     # largest multiple of 16 <= n/2 -> at least 2 steps
    return max(16, min(cap, half))


def net_forward(prep, x):
    """x: (N, 1, 28, 28) NCHW float32 -> logits (N, 10). Single fused Pallas call."""
    n = x.shape[0]
    assert x.shape[1:] == (1, 28, 28), "Net requires 1x28x28 inputs (view(-1, 320))"
    tb = _pick_batch_tile(n)
    n_pad = -(-n // tb) * tb

    # (N,1,28,28) -> (H=28, N, W=28): batch in sublanes, width in lanes.
    xs = x.reshape(n, 28, 28).transpose(1, 0, 2)
    if n_pad != n:
        xs = jnp.pad(xs, ((0, 0), (0, n_pad - n), (0, 0)))

    out = pl.pallas_call(
        functools.partial(_net_kernel, tb=tb),
        out_shape=jax.ShapeDtypeStruct((n_pad, 128), jnp.float32),
        grid=(n_pad // tb,),
        in_specs=[
            pl.BlockSpec((28, tb, 28), lambda b: (0, b, 0)),    # input batch tile
            pl.BlockSpec((5, 28, 256), lambda b: (0, 0, 0)),    # conv1 banded weights (bf16)
            pl.BlockSpec((1, 128), lambda b: (0, 0)),           # conv1 bias (pooled layout)
            pl.BlockSpec((5, 128, 256), lambda b: (0, 0, 0)),   # conv2 banded weights (bf16)
            pl.BlockSpec((1, 128), lambda b: (0, 0)),           # conv2 bias (pooled layout)
            pl.BlockSpec((4, 128, 50), lambda b: (0, 0, 0)),    # fc1 weight, K-chunked/permuted
            pl.BlockSpec((1, 50), lambda b: (0, 0)),            # fc1 bias
            pl.BlockSpec((50, 128), lambda b: (0, 0)),          # fc2 weight (N padded to 128)
            pl.BlockSpec((1, 128), lambda b: (0, 0)),           # fc2 bias (padded)
        ],
        out_specs=pl.BlockSpec((tb, 128), lambda b: (b, 0)),
        compiler_params=pltpu.CompilerParams(
            dimension_semantics=("parallel",),
            vmem_limit_bytes=64 * 1024 * 1024,
        ),
    )(xs, prep["conv1_band"], prep["conv1_bias"], prep["conv2_band"],
      prep["conv2_bias"], prep["fc1_w"], prep["fc1_b"],
      prep["fc2_w"], prep["fc2_b"])
    return out[:n, :10]


# --------------------------- parameter preparation --------------------------

def init_params(key):
    """Deterministic PyTorch-style uniform(-1/sqrt(fan_in), 1/sqrt(fan_in)) init."""
    ks = jax.random.split(key, 8)

    def u(k, shape, fan_in):
        bound = 1.0 / float(fan_in) ** 0.5
        return jax.random.uniform(k, shape, jnp.float32, -bound, bound)

    return {
        "conv1_w": u(ks[0], (10, 1, 5, 5), 1 * 25),
        "conv1_b": u(ks[1], (10,), 1 * 25),
        "conv2_w": u(ks[2], (20, 10, 5, 5), 10 * 25),
        "conv2_b": u(ks[3], (20,), 10 * 25),
        "fc1_w": u(ks[4], (50, 320), 320),
        "fc1_b": u(ks[5], (50,), 320),
        "fc2_w": u(ks[6], (10, 50), 50),
        "fc2_b": u(ks[7], (10,), 50),
    }


def prepare_params(params):
    """One-time host-side repack of PyTorch-layout weights into the MXU-friendly
    banded / even-odd-lane-split / permuted forms consumed by the fused kernel."""
    w1 = np.asarray(params["conv1_w"], np.float32)    # (10, 1, 5, 5)
    b1 = np.asarray(params["conv1_b"], np.float32)    # (10,)
    w2 = np.asarray(params["conv2_w"], np.float32)    # (20, 10, 5, 5)
    b2 = np.asarray(params["conv2_b"], np.float32)    # (20,)
    fc1w = np.asarray(params["fc1_w"], np.float32)    # (50, 320)
    fc1b = np.asarray(params["fc1_b"], np.float32)
    fc2w = np.asarray(params["fc2_w"], np.float32)    # (10, 50)
    fc2b = np.asarray(params["fc2_b"], np.float32)

    # conv1 banded matrices, output columns split even/odd into 128-lane halves:
    #   lane(j, oc) = (j%2)*128 + (j//2)*10 + oc ,  j in 0..23, oc in 0..9
    B1 = np.zeros((5, 28, 256), np.float32)
    for kh in range(5):
        for j in range(24):
            base = (j % 2) * 128 + (j // 2) * 10
            for kw in range(5):
                B1[kh, j + kw, base:base + 10] = w1[:, 0, kh, kw]

    # conv2 banded matrices. Input lanes (K): pooled conv1 layout jp*10 + c
    # (jp in 0..11, c in 0..9; rows 120..127 stay zero for the pad lanes).
    # Output lanes (N): lane(jq, oc) = (jq%2)*128 + (jq//2)*20 + oc.
    B2 = np.zeros((5, 128, 256), np.float32)
    for kh in range(5):
        for jq in range(8):
            obase = (jq % 2) * 128 + (jq // 2) * 20
            for kw in range(5):
                jp = jq + kw
                B2[kh, jp * 10:(jp + 1) * 10, obase:obase + 20] = w2[:, :, kh, kw].T

    # conv biases in the *pooled* lane layouts (added after pooling in-kernel).
    c1b = np.zeros((1, 128), np.float32)
    c1b[0, :120] = np.tile(b1, 12)                    # lane = jp*10 + oc
    c2b = np.zeros((1, 128), np.float32)
    c2b[0, :80] = np.tile(b2, 4)                      # lane = jqq*20 + oc

    # fc1 as 4 K-chunks (one per pooled row i). Kernel activation lane = jqq*20+oc;
    # torch flatten index = oc*16 + i*4 + jqq. Pad rows 80..127 are zero.
    fc1k = np.zeros((4, 128, 50), np.float32)
    for i in range(4):
        for jqq in range(4):
            for oc in range(20):
                fc1k[i, jqq * 20 + oc, :] = fc1w[:, oc * 16 + i * 4 + jqq]

    # fc2 with output lanes padded to 128 for a lane-dense store.
    fc2p = np.zeros((50, 128), np.float32)
    fc2p[:, :10] = fc2w.T
    fc2bp = np.zeros((1, 128), np.float32)
    fc2bp[0, :10] = fc2b

    return {
        "conv1_band": jnp.asarray(B1, jnp.bfloat16),
        "conv1_bias": jnp.asarray(c1b),
        "conv2_band": jnp.asarray(B2, jnp.bfloat16),
        "conv2_bias": jnp.asarray(c2b),
        "fc1_w": jnp.asarray(fc1k, jnp.bfloat16),
        "fc1_b": jnp.asarray(fc1b.reshape(1, 50)),
        "fc2_w": jnp.asarray(fc2p, jnp.bfloat16),
        "fc2_b": jnp.asarray(fc2bp),
    }


if __name__ == "__main__":
    key = jax.random.PRNGKey(0)
    kx, kp = jax.random.split(key)
    # MNIST-shaped input (28x28 is required by the hard-coded view(-1, 320)).
    x = jax.random.normal(kx, (2, 1, 28, 28), dtype=jnp.float32)
    params = init_params(kp)
    prep = prepare_params(params)

    logits = jax.jit(net_forward)(prep, x)
    logits = jax.block_until_ready(logits)
    assert logits.shape == (2, 10) and logits.dtype == jnp.float32
    print("KERNEL_OK")
</pallas_src>

<mosaic_0001>
module attributes {stable_mosaic.version = 11 : i64} {
  func.func @_net_kernel(%arg0: i32, %arg1: memref<28x16x28xf32, #tpu.memory_space<vmem>>, %arg2: memref<5x28x256xbf16, #tpu.memory_space<vmem>>, %arg3: memref<1x128xf32, #tpu.memory_space<vmem>>, %arg4: memref<5x128x256xbf16, #tpu.memory_space<vmem>>, %arg5: memref<1x128xf32, #tpu.memory_space<vmem>>, %arg6: memref<4x128x50xbf16, #tpu.memory_space<vmem>>, %arg7: memref<1x50xf32, #tpu.memory_space<vmem>>, %arg8: memref<50x128xbf16, #tpu.memory_space<vmem>>, %arg9: memref<1x128xf32, #tpu.memory_space<vmem>>, %arg10: memref<16x128xf32, #tpu.memory_space<vmem>>) attributes {dimension_semantics = [#tpu.dimension_semantics<parallel>], iteration_bounds = array<i64: 1>, scalar_prefetch = 0 : i64, scratch_operands = 0 : i64, tpu.core_type = #tpu.core_type<tc>, window_params = [{transform_indices = @transform_0, window_bounds = array<i64: 28, 16, 28>}, {pipeline_mode = #tpu.pipeline_mode<synchronous>, transform_indices = @transform_1, window_bounds = array<i64: 5, 28, 256>}, {pipeline_mode = #tpu.pipeline_mode<synchronous>, transform_indices = @transform_2, window_bounds = array<i64: 1, 128>}, {pipeline_mode = #tpu.pipeline_mode<synchronous>, transform_indices = @transform_3, window_bounds = array<i64: 5, 128, 256>}, {pipeline_mode = #tpu.pipeline_mode<synchronous>, transform_indices = @transform_4, window_bounds = array<i64: 1, 128>}, {pipeline_mode = #tpu.pipeline_mode<synchronous>, transform_indices = @transform_5, window_bounds = array<i64: 4, 128, 50>}, {pipeline_mode = #tpu.pipeline_mode<synchronous>, transform_indices = @transform_6, window_bounds = array<i64: 1, 50>}, {pipeline_mode = #tpu.pipeline_mode<synchronous>, transform_indices = @transform_7, window_bounds = array<i64: 50, 128>}, {pipeline_mode = #tpu.pipeline_mode<synchronous>, transform_indices = @transform_8, window_bounds = array<i64: 1, 128>}, {transform_indices = @transform_9, window_bounds = array<i64: 16, 128>}]} {
    %c0 = arith.constant 0 : index
    %c0_0 = arith.constant 0 : index
    %c0_1 = arith.constant 0 : index
    %0 = vector.load %arg1[%c0, %c0_0, %c0_1] : memref<28x16x28xf32, #tpu.memory_space<vmem>>, vector<28x16x28xf32>
    %1 = vector.shape_cast %0 : vector<28x16x28xf32> to vector<448x28xf32>
    %2 = arith.truncf %1 : vector<448x28xf32> to vector<448x28xbf16>
    %3 = vector.extract_strided_slice %2 {offsets = [0, 0], sizes = [384, 28], strides = [1, 1]} : vector<448x28xbf16> to vector<384x28xbf16>
    %c0_2 = arith.constant 0 : index
    %c0_3 = arith.constant 0 : index
    %c0_4 = arith.constant 0 : index
    %4 = vector.load %arg2[%c0_2, %c0_3, %c0_4] : memref<5x28x256xbf16, #tpu.memory_space<vmem>>, vector<1x28x256xbf16>
    %5 = vector.shape_cast %4 : vector<1x28x256xbf16> to vector<28x256xbf16>
    %cst = arith.constant dense<0.000000e+00> : vector<384x256xf32>
    %6 = tpu.matmul %3, %5, %cst {dimension_numbers = #tpu.dot_dimension_numbers<[1], [0], [0], [1], [0, 0, 1, 1], [], []>} : vector<384x28xbf16>, vector<28x256xbf16>, vector<384x256xf32> -> vector<384x256xf32>
    %7 = vector.extract_strided_slice %2 {offsets = [16, 0], sizes = [384, 28], strides = [1, 1]} : vector<448x28xbf16> to vector<384x28xbf16>
    %c1 = arith.constant 1 : index
    %c0_5 = arith.constant 0 : index
    %c0_6 = arith.constant 0 : index
    %8 = vector.load %arg2[%c1, %c0_5, %c0_6] : memref<5x28x256xbf16, #tpu.memory_space<vmem>>, vector<1x28x256xbf16>
    %9 = vector.shape_cast %8 : vector<1x28x256xbf16> to vector<28x256xbf16>
    %cst_7 = arith.constant dense<0.000000e+00> : vector<384x256xf32>
    %10 = tpu.matmul %7, %9, %cst_7 {dimension_numbers = #tpu.dot_dimension_numbers<[1], [0], [0], [1], [0, 0, 1, 1], [], []>} : vector<384x28xbf16>, vector<28x256xbf16>, vector<384x256xf32> -> vector<384x256xf32>
    %11 = arith.addf %6, %10 : vector<384x256xf32>
    %12 = vector.extract_strided_slice %2 {offsets = [32, 0], sizes = [384, 28], strides = [1, 1]} : vector<448x28xbf16> to vector<384x28xbf16>
    %c2 = arith.constant 2 : index
    %c0_8 = arith.constant 0 : index
    %c0_9 = arith.constant 0 : index
    %13 = vector.load %arg2[%c2, %c0_8, %c0_9] : memref<5x28x256xbf16, #tpu.memory_space<vmem>>, vector<1x28x256xbf16>
    %14 = vector.shape_cast %13 : vector<1x28x256xbf16> to vector<28x256xbf16>
    %cst_10 = arith.constant dense<0.000000e+00> : vector<384x256xf32>
    %15 = tpu.matmul %12, %14, %cst_10 {dimension_numbers = #tpu.dot_dimension_numbers<[1], [0], [0], [1], [0, 0, 1, 1], [], []>} : vector<384x28xbf16>, vector<28x256xbf16>, vector<384x256xf32> -> vector<384x256xf32>
    %16 = arith.addf %11, %15 : vector<384x256xf32>
    %17 = vector.extract_strided_slice %2 {offsets = [48, 0], sizes = [384, 28], strides = [1, 1]} : vector<448x28xbf16> to vector<384x28xbf16>
    %c3 = arith.constant 3 : index
    %c0_11 = arith.constant 0 : index
    %c0_12 = arith.constant 0 : index
    %18 = vector.load %arg2[%c3, %c0_11, %c0_12] : memref<5x28x256xbf16, #tpu.memory_space<vmem>>, vector<1x28x256xbf16>
    %19 = vector.shape_cast %18 : vector<1x28x256xbf16> to vector<28x256xbf16>
    %cst_13 = arith.constant dense<0.000000e+00> : vector<384x256xf32>
    %20 = tpu.matmul %17, %19, %cst_13 {dimension_numbers = #tpu.dot_dimension_numbers<[1], [0], [0], [1], [0, 0, 1, 1], [], []>} : vector<384x28xbf16>, vector<28x256xbf16>, vector<384x256xf32> -> vector<384x256xf32>
    %21 = arith.addf %16, %20 : vector<384x256xf32>
    %22 = vector.extract_strided_slice %2 {offsets = [64, 0], sizes = [384, 28], strides = [1, 1]} : vector<448x28xbf16> to vector<384x28xbf16>
    %c4 = arith.constant 4 : index
    %c0_14 = arith.constant 0 : index
    %c0_15 = arith.constant 0 : index
    %23 = vector.load %arg2[%c4, %c0_14, %c0_15] : memref<5x28x256xbf16, #tpu.memory_space<vmem>>, vector<1x28x256xbf16>
    %24 = vector.shape_cast %23 : vector<1x28x256xbf16> to vector<28x256xbf16>
    %cst_16 = arith.constant dense<0.000000e+00> : vector<384x256xf32>
    %25 = tpu.matmul %22, %24, %cst_16 {dimension_numbers = #tpu.dot_dimension_numbers<[1], [0], [0], [1], [0, 0, 1, 1], [], []>} : vector<384x28xbf16>, vector<28x256xbf16>, vector<384x256xf32> -> vector<384x256xf32>
    %26 = arith.addf %21, %25 : vector<384x256xf32>
    %27 = vector.shape_cast %26 : vector<384x256xf32> to vector<12x2x16x256xf32>
    %28 = vector.extract_strided_slice %27 {offsets = [0, 0, 0, 0], sizes = [12, 1, 16, 256], strides = [1, 1, 1, 1]} : vector<12x2x16x256xf32> to vector<12x1x16x256xf32>
    %29 = vector.shape_cast %28 : vector<12x1x16x256xf32> to vector<12x16x256xf32>
    %30 = vector.extract_strided_slice %27 {offsets = [0, 1, 0, 0], sizes = [12, 1, 16, 256], strides = [1, 1, 1, 1]} : vector<12x2x16x256xf32> to vector<12x1x16x256xf32>
    %31 = vector.shape_cast %30 : vector<12x1x16x256xf32> to vector<12x16x256xf32>
    %32 = arith.maximumf %29, %31 : vector<12x16x256xf32>
    %33 = vector.extract_strided_slice %32 {offsets = [0, 0, 0], sizes = [12, 16, 128], strides = [1, 1, 1]} : vector<12x16x256xf32> to vector<12x16x128xf32>
    %34 = vector.extract_strided_slice %32 {offsets = [0, 0, 128], sizes = [12, 16, 128], strides = [1, 1, 1]} : vector<12x16x256xf32> to vector<12x16x128xf32>
    %35 = arith.maximumf %33, %34 : vector<12x16x128xf32>
    %36 = vector.shape_cast %35 : vector<12x16x128xf32> to vector<192x128xf32>
    %c0_17 = arith.constant 0 : index
    %c0_18 = arith.constant 0 : index
    %37 = vector.load %arg3[%c0_17, %c0_18] : memref<1x128xf32, #tpu.memory_space<vmem>>, vector<1x128xf32>
    %38 = vector.broadcast %37 : vector<1x128xf32> to vector<192x128xf32>
    %39 = arith.addf %36, %38 : vector<192x128xf32>
    %cst_19 = arith.constant 0.000000e+00 : f32
    %40 = vector.broadcast %cst_19 : f32 to vector<192x128xf32>
    %41 = arith.maximumf %39, %40 : vector<192x128xf32>
    %42 = arith.truncf %41 : vector<192x128xf32> to vector<192x128xbf16>
    %43 = vector.extract_strided_slice %42 {offsets = [0, 0], sizes = [128, 128], strides = [1, 1]} : vector<192x128xbf16> to vector<128x128xbf16>
    %c0_20 = arith.constant 0 : index
    %c0_21 = arith.constant 0 : index
    %c0_22 = arith.constant 0 : index
    %44 = vector.load %arg4[%c0_20, %c0_21, %c0_22] : memref<5x128x256xbf16, #tpu.memory_space<vmem>>, vector<1x128x256xbf16>
    %45 = vector.shape_cast %44 : vector<1x128x256xbf16> to vector<128x256xbf16>
    %cst_23 = arith.constant dense<0.000000e+00> : vector<128x256xf32>
    %46 = tpu.matmul %43, %45, %cst_23 {dimension_numbers = #tpu.dot_dimension_numbers<[1], [0], [0], [1], [0, 0, 1, 1], [], []>} : vector<128x128xbf16>, vector<128x256xbf16>, vector<128x256xf32> -> vector<128x256xf32>
    %47 = vector.extract_strided_slice %42 {offsets = [16, 0], sizes = [128, 128], strides = [1, 1]} : vector<192x128xbf16> to vector<128x128xbf16>
    %c1_24 = arith.constant 1 : index
    %c0_25 = arith.constant 0 : index
    %c0_26 = arith.constant 0 : index
    %48 = vector.load %arg4[%c1_24, %c0_25, %c0_26] : memref<5x128x256xbf16, #tpu.memory_space<vmem>>, vector<1x128x256xbf16>
    %49 = vector.shape_cast %48 : vector<1x128x256xbf16> to vector<128x256xbf16>
    %cst_27 = arith.constant dense<0.000000e+00> : vector<128x256xf32>
    %50 = tpu.matmul %47, %49, %cst_27 {dimension_numbers = #tpu.dot_dimension_numbers<[1], [0], [0], [1], [0, 0, 1, 1], [], []>} : vector<128x128xbf16>, vector<128x256xbf16>, vector<128x256xf32> -> vector<128x256xf32>
    %51 = arith.addf %46, %50 : vector<128x256xf32>
    %52 = vector.extract_strided_slice %42 {offsets = [32, 0], sizes = [128, 128], strides = [1, 1]} : vector<192x128xbf16> to vector<128x128xbf16>
    %c2_28 = arith.constant 2 : index
    %c0_29 = arith.constant 0 : index
    %c0_30 = arith.constant 0 : index
    %53 = vector.load %arg4[%c2_28, %c0_29, %c0_30] : memref<5x128x256xbf16, #tpu.memory_space<vmem>>, vector<1x128x256xbf16>
    %54 = vector.shape_cast %53 : vector<1x128x256xbf16> to vector<128x256xbf16>
    %cst_31 = arith.constant dense<0.000000e+00> : vector<128x256xf32>
    %55 = tpu.matmul %52, %54, %cst_31 {dimension_numbers = #tpu.dot_dimension_numbers<[1], [0], [0], [1], [0, 0, 1, 1], [], []>} : vector<128x128xbf16>, vector<128x256xbf16>, vector<128x256xf32> -> vector<128x256xf32>
    %56 = arith.addf %51, %55 : vector<128x256xf32>
    %57 = vector.extract_strided_slice %42 {offsets = [48, 0], sizes = [128, 128], strides = [1, 1]} : vector<192x128xbf16> to vector<128x128xbf16>
    %c3_32 = arith.constant 3 : index
    %c0_33 = arith.constant 0 : index
    %c0_34 = arith.constant 0 : index
    %58 = vector.load %arg4[%c3_32, %c0_33, %c0_34] : memref<5x128x256xbf16, #tpu.memory_space<vmem>>, vector<1x128x256xbf16>
    %59 = vector.shape_cast %58 : vector<1x128x256xbf16> to vector<128x256xbf16>
    %cst_35 = arith.constant dense<0.000000e+00> : vector<128x256xf32>
    %60 = tpu.matmul %57, %59, %cst_35 {dimension_numbers = #tpu.dot_dimension_numbers<[1], [0], [0], [1], [0, 0, 1, 1], [], []>} : vector<128x128xbf16>, vector<128x256xbf16>, vector<128x256xf32> -> vector<128x256xf32>
    %61 = arith.addf %56, %60 : vector<128x256xf32>
    %62 = vector.extract_strided_slice %42 {offsets = [64, 0], sizes = [128, 128], strides = [1, 1]} : vector<192x128xbf16> to vector<128x128xbf16>
    %c4_36 = arith.constant 4 : index
    %c0_37 = arith.constant 0 : index
    %c0_38 = arith.constant 0 : index
    %63 = vector.load %arg4[%c4_36, %c0_37, %c0_38] : memref<5x128x256xbf16, #tpu.memory_space<vmem>>, vector<1x128x256xbf16>
    %64 = vector.shape_cast %63 : vector<1x128x256xbf16> to vector<128x256xbf16>
    %cst_39 = arith.constant dense<0.000000e+00> : vector<128x256xf32>
    %65 = tpu.matmul %62, %64, %cst_39 {dimension_numbers = #tpu.dot_dimension_numbers<[1], [0], [0], [1], [0, 0, 1, 1], [], []>} : vector<128x128xbf16>, vector<128x256xbf16>, vector<128x256xf32> -> vector<128x256xf32>
    %66 = arith.addf %61, %65 : vector<128x256xf32>
    %67 = vector.shape_cast %66 : vector<128x256xf32> to vector<4x2x16x256xf32>
    %68 = vector.extract_strided_slice %67 {offsets = [0, 0, 0, 0], sizes = [4, 1, 16, 256], strides = [1, 1, 1, 1]} : vector<4x2x16x256xf32> to vector<4x1x16x256xf32>
    %69 = vector.shape_cast %68 : vector<4x1x16x256xf32> to vector<4x16x256xf32>
    %70 = vector.extract_strided_slice %67 {offsets = [0, 1, 0, 0], sizes = [4, 1, 16, 256], strides = [1, 1, 1, 1]} : vector<4x2x16x256xf32> to vector<4x1x16x256xf32>
    %71 = vector.shape_cast %70 : vector<4x1x16x256xf32> to vector<4x16x256xf32>
    %72 = arith.maximumf %69, %71 : vector<4x16x256xf32>
    %73 = vector.extract_strided_slice %72 {offsets = [0, 0, 0], sizes = [4, 16, 128], strides = [1, 1, 1]} : vector<4x16x256xf32> to vector<4x16x128xf32>
    %74 = vector.extract_strided_slice %72 {offsets = [0, 0, 128], sizes = [4, 16, 128], strides = [1, 1, 1]} : vector<4x16x256xf32> to vector<4x16x128xf32>
    %75 = arith.maximumf %73, %74 : vector<4x16x128xf32>
    %76 = vector.shape_cast %75 : vector<4x16x128xf32> to vector<64x128xf32>
    %c0_40 = arith.constant 0 : index
    %c0_41 = arith.constant 0 : index
    %77 = vector.load %arg5[%c0_40, %c0_41] : memref<1x128xf32, #tpu.memory_space<vmem>>, vector<1x128xf32>
    %78 = vector.broadcast %77 : vector<1x128xf32> to vector<64x128xf32>
    %79 = arith.addf %76, %78 : vector<64x128xf32>
    %cst_42 = arith.constant 0.000000e+00 : f32
    %80 = vector.broadcast %cst_42 : f32 to vector<64x128xf32>
    %81 = arith.maximumf %79, %80 : vector<64x128xf32>
    %82 = arith.truncf %81 : vector<64x128xf32> to vector<64x128xbf16>
    %83 = vector.extract_strided_slice %82 {offsets = [0, 0], sizes = [16, 128], strides = [1, 1]} : vector<64x128xbf16> to vector<16x128xbf16>
    %c0_43 = arith.constant 0 : index
    %c0_44 = arith.constant 0 : index
    %c0_45 = arith.constant 0 : index
    %84 = vector.load %arg6[%c0_43, %c0_44, %c0_45] : memref<4x128x50xbf16, #tpu.memory_space<vmem>>, vector<1x128x50xbf16>
    %85 = vector.shape_cast %84 : vector<1x128x50xbf16> to vector<128x50xbf16>
    %cst_46 = arith.constant dense<0.000000e+00> : vector<16x50xf32>
    %86 = tpu.matmul %83, %85, %cst_46 {dimension_numbers = #tpu.dot_dimension_numbers<[1], [0], [0], [1], [0, 0, 1, 1], [], []>} : vector<16x128xbf16>, vector<128x50xbf16>, vector<16x50xf32> -> vector<16x50xf32>
    %87 = vector.extract_strided_slice %82 {offsets = [16, 0], sizes = [16, 128], strides = [1, 1]} : vector<64x128xbf16> to vector<16x128xbf16>
    %c1_47 = arith.constant 1 : index
    %c0_48 = arith.constant 0 : index
    %c0_49 = arith.constant 0 : index
    %88 = vector.load %arg6[%c1_47, %c0_48, %c0_49] : memref<4x128x50xbf16, #tpu.memory_space<vmem>>, vector<1x128x50xbf16>
    %89 = vector.shape_cast %88 : vector<1x128x50xbf16> to vector<128x50xbf16>
    %cst_50 = arith.constant dense<0.000000e+00> : vector<16x50xf32>
    %90 = tpu.matmul %87, %89, %cst_50 {dimension_numbers = #tpu.dot_dimension_numbers<[1], [0], [0], [1], [0, 0, 1, 1], [], []>} : vector<16x128xbf16>, vector<128x50xbf16>, vector<16x50xf32> -> vector<16x50xf32>
    %91 = arith.addf %86, %90 : vector<16x50xf32>
    %92 = vector.extract_strided_slice %82 {offsets = [32, 0], sizes = [16, 128], strides = [1, 1]} : vector<64x128xbf16> to vector<16x128xbf16>
    %c2_51 = arith.constant 2 : index
    %c0_52 = arith.constant 0 : index
    %c0_53 = arith.constant 0 : index
    %93 = vector.load %arg6[%c2_51, %c0_52, %c0_53] : memref<4x128x50xbf16, #tpu.memory_space<vmem>>, vector<1x128x50xbf16>
    %94 = vector.shape_cast %93 : vector<1x128x50xbf16> to vector<128x50xbf16>
    %cst_54 = arith.constant dense<0.000000e+00> : vector<16x50xf32>
    %95 = tpu.matmul %92, %94, %cst_54 {dimension_numbers = #tpu.dot_dimension_numbers<[1], [0], [0], [1], [0, 0, 1, 1], [], []>} : vector<16x128xbf16>, vector<128x50xbf16>, vector<16x50xf32> -> vector<16x50xf32>
    %96 = arith.addf %91, %95 : vector<16x50xf32>
    %97 = vector.extract_strided_slice %82 {offsets = [48, 0], sizes = [16, 128], strides = [1, 1]} : vector<64x128xbf16> to vector<16x128xbf16>
    %c3_55 = arith.constant 3 : index
    %c0_56 = arith.constant 0 : index
    %c0_57 = arith.constant 0 : index
    %98 = vector.load %arg6[%c3_55, %c0_56, %c0_57] : memref<4x128x50xbf16, #tpu.memory_space<vmem>>, vector<1x128x50xbf16>
    %99 = vector.shape_cast %98 : vector<1x128x50xbf16> to vector<128x50xbf16>
    %cst_58 = arith.constant dense<0.000000e+00> : vector<16x50xf32>
    %100 = tpu.matmul %97, %99, %cst_58 {dimension_numbers = #tpu.dot_dimension_numbers<[1], [0], [0], [1], [0, 0, 1, 1], [], []>} : vector<16x128xbf16>, vector<128x50xbf16>, vector<16x50xf32> -> vector<16x50xf32>
    %101 = arith.addf %96, %100 : vector<16x50xf32>
    %c0_59 = arith.constant 0 : index
    %c0_60 = arith.constant 0 : index
    %102 = vector.load %arg7[%c0_59, %c0_60] : memref<1x50xf32, #tpu.memory_space<vmem>>, vector<1x50xf32>
    %103 = vector.broadcast %102 : vector<1x50xf32> to vector<16x50xf32>
    %104 = arith.addf %101, %103 : vector<16x50xf32>
    %cst_61 = arith.constant 0.000000e+00 : f32
    %105 = vector.broadcast %cst_61 : f32 to vector<16x50xf32>
    %106 = arith.maximumf %104, %105 : vector<16x50xf32>
    %107 = arith.truncf %106 : vector<16x50xf32> to vector<16x50xbf16>
    %c0_62 = arith.constant 0 : index
    %c0_63 = arith.constant 0 : index
    %108 = vector.load %arg8[%c0_62, %c0_63] : memref<50x128xbf16, #tpu.memory_space<vmem>>, vector<50x128xbf16>
    %cst_64 = arith.constant dense<0.000000e+00> : vector<16x128xf32>
    %109 = tpu.matmul %107, %108, %cst_64 {dimension_numbers = #tpu.dot_dimension_numbers<[1], [0], [0], [1], [0, 0, 1, 1], [], []>} : vector<16x50xbf16>, vector<50x128xbf16>, vector<16x128xf32> -> vector<16x128xf32>
    %c0_65 = arith.constant 0 : index
    %c0_66 = arith.constant 0 : index
    %110 = vector.load %arg9[%c0_65, %c0_66] : memref<1x128xf32, #tpu.memory_space<vmem>>, vector<1x128xf32>
    %111 = vector.broadcast %110 : vector<1x128xf32> to vector<16x128xf32>
    %112 = arith.addf %109, %111 : vector<16x128xf32>
    %c0_67 = arith.constant 0 : index
    %c0_68 = arith.constant 0 : index
    %113 = vector.load %arg10[%c0_67, %c0_68] : memref<16x128xf32, #tpu.memory_space<vmem>>, vector<16x128xf32>
    tpu.vector_store %arg10[%c0_67, %c0_68], %112 {strides = array<i32>} : memref<16x128xf32, #tpu.memory_space<vmem>>, vector<16x128xf32>,
    return
  }
  func.func @transform_0(%arg0: i32) -> (i32, i32, i32) {
    %c0_i32 = arith.constant 0 : i32
    %c0_i32_0 = arith.constant 0 : i32
    %c0_i32_1 = arith.constant 0 : i32
    return %c0_i32, %arg0, %c0_i32_0 : i32, i32, i32
  }
  func.func @transform_1(%arg0: i32) -> (i32, i32, i32) {
    %c0_i32 = arith.constant 0 : i32
    %c0_i32_0 = arith.constant 0 : i32
    %c0_i32_1 = arith.constant 0 : i32
    %c0_i32_2 = arith.constant 0 : i32
    return %c0_i32, %c0_i32_0, %c0_i32_1 : i32, i32, i32
  }
  func.func @transform_2(%arg0: i32) -> (i32, i32) {
    %c0_i32 = arith.constant 0 : i32
    %c0_i32_0 = arith.constant 0 : i32
    %c0_i32_1 = arith.constant 0 : i32
    return %c0_i32, %c0_i32_0 : i32, i32
  }
  func.func @transform_3(%arg0: i32) -> (i32, i32, i32) {
    %c0_i32 = arith.constant 0 : i32
    %c0_i32_0 = arith.constant 0 : i32
    %c0_i32_1 = arith.constant 0 : i32
    %c0_i32_2 = arith.constant 0 : i32
    return %c0_i32, %c0_i32_0, %c0_i32_1 : i32, i32, i32
  }
  func.func @transform_4(%arg0: i32) -> (i32, i32) {
    %c0_i32 = arith.constant 0 : i32
    %c0_i32_0 = arith.constant 0 : i32
    %c0_i32_1 = arith.constant 0 : i32
    return %c0_i32, %c0_i32_0 : i32, i32
  }
  func.func @transform_5(%arg0: i32) -> (i32, i32, i32) {
    %c0_i32 = arith.constant 0 : i32
    %c0_i32_0 = arith.constant 0 : i32
    %c0_i32_1 = arith.constant 0 : i32
    %c0_i32_2 = arith.constant 0 : i32
    return %c0_i32, %c0_i32_0, %c0_i32_1 : i32, i32, i32
  }
  func.func @transform_6(%arg0: i32) -> (i32, i32) {
    %c0_i32 = arith.constant 0 : i32
    %c0_i32_0 = arith.constant 0 : i32
    %c0_i32_1 = arith.constant 0 : i32
    return %c0_i32, %c0_i32_0 : i32, i32
  }
  func.func @transform_7(%arg0: i32) -> (i32, i32) {
    %c0_i32 = arith.constant 0 : i32
    %c0_i32_0 = arith.constant 0 : i32
    %c0_i32_1 = arith.constant 0 : i32
    return %c0_i32, %c0_i32_0 : i32, i32
  }
  func.func @transform_8(%arg0: i32) -> (i32, i32) {
    %c0_i32 = arith.constant 0 : i32
    %c0_i32_0 = arith.constant 0 : i32
    %c0_i32_1 = arith.constant 0 : i32
    return %c0_i32, %c0_i32_0 : i32, i32
  }
  func.func @transform_9(%arg0: i32) -> (i32, i32) {
    %c0_i32 = arith.constant 0 : i32
    %c0_i32_0 = arith.constant 0 : i32
    return %arg0, %c0_i32 : i32, i32
  }
}

</mosaic_0001>

<bundles_post_ra>
// kernel: net_forward.1
= control target key start
LH: loop header
LB: loop body
LE: loop exit
PB: predicated region body
PF: predicated region fallthrough
CT: control target
= control target key end

     0   :  { %vm365_vm0 = vcmask 1045504   ;;  %vm292_vm1 = vcmask 228352   ;;  %vm3823_vm2 = vcmask 1040384   ;;  %vm3819_vm3 = vcmask 408576   ;;  %s7477_s1 = inlined_call_operand.vmem [shape: bf16[5,28,256], index: 1, kind: input, shape index: {}]   ;;  %s7478_s0 = inlined_call_operand.vmem [shape: f32[28,16,28], index: 0, kind: input, shape index: {}]   ;;  %s7479_s3 = inlined_call_operand.vmem [shape: bf16[5,128,256], index: 3, kind: input, shape index: {}]   ;;  %s7480_s2 = inlined_call_operand.vmem [shape: f32[1,128], index: 2, kind: input, shape index: {}]   ;;  %s7481_s4 = inlined_call_operand.vmem [shape: f32[1,128], index: 4, kind: input, shape index: {}]   ;;  %s7482_s5 = inlined_call_operand.vmem [shape: bf16[4,128,50], index: 5, kind: input, shape index: {}]   ;;  %s7483_s6 = inlined_call_operand.vmem [shape: f32[1,50], index: 6, kind: input, shape index: {}]   ;;  %s7484_s8 = inlined_call_operand.vmem [shape: f32[1,128], index: 8, kind: input, shape index: {}]   ;;  %s7485_s7 = inlined_call_operand.vmem [shape: bf16[50,128], index: 7, kind: input, shape index: {}]   ;;  %s7486_s9 = inlined_call_operand.vmem [shape: f32[16,128], index: 9, kind: output, shape index: {}]  }
   0x1   :  { %v3861_v0 = vld [vmem:[%s7477_s1 + $0x30] sm:$0xf]  ;;  %v4763_v1 = vld [vmem:[%s7477_s1 + $0x34] sm:$0x30]  ;;  %v4762_v2 = vld [vmem:[%s7477_s1 + $0x34] sm:$0xf] }
   0x2   :  { %v3862_v3 = vor.u32 %v4763_v1, %v3861_v0  ;;  %v3863_v4 = vld [vmem:[%s7477_s1 + $0x38] sm:$0x30]  ;;  %v3925_v5 = vld [vmem:[%s7477_s1 + $0x10] sm:$0xf]  ;;  %v4759_v6 = vld [vmem:[%s7477_s1 + $0x14] sm:$0x30] }
   0x3   :  { %v3866_v7 = vor.u32 %v4762_v2, %v3863_v4  ;;  %v3926_v8 = vor.u32 %v4759_v6, %v3925_v5  ;;  %v4758_v9 = vld [vmem:[%s7477_s1 + $0x14] sm:$0xf]  ;;  %v3927_v10 = vld [vmem:[%s7477_s1 + $0x18] sm:$0x30]  ;;  %v3853_v11 = vld [vmem:[%s7477_s1 + $0x20] sm:$0xf] }
   0x4   :  { %v367_v12 = vsel %vm365_vm0, %v3862_v3, 0  ;;  %v3930_v13 = vor.u32 %v4758_v9, %v3927_v10  ;;  %v4761_v14 = vld [vmem:[%s7477_s1 + $0x24] sm:$0xf0]  ;;  %v4760_v15 = vld [vmem:[%s7477_s1 + $0x24] sm:$0xf]  ;;  %v35_v16 = vld [vmem:[%s7478_s0 + $0x10] sm:$0xff] }
   0x5   :  { %378 = vmatpush.bf16.msra.mxu0 %v367_v12  ;;  %v370_v17 = vsel %vm365_vm0, %v3866_v7, 0  ;;  %v657_v18 = vsel %vm365_vm0, %v3926_v8, 0  ;;  %v3854_v19 = vor.u32 %v4761_v14, %v3853_v11  ;;  %v3855_v20 = vld [vmem:[%s7477_s1 + $0x28] sm:$0xf0]  ;;  %v3917_v21 = vld [vmem:[%s7477_s1] sm:$0xf]  ;;  %v91_v22 = vpack.c.bf16 %v35_v16, %v35_v16 }
   0x6   :  { %507 = vmatpush.bf16.msra.mxu1 %v370_v17  ;;  %668 = vmatpush.bf16.msra.mxu2 %v657_v18  ;;  %v660_v23 = vsel %vm365_vm0, %v3930_v13, 0  ;;  %v3858_v24 = vor.u32 %v4760_v15, %v3855_v20  ;;  %v4757_v25 = vld [vmem:[%s7477_s1 + $0x4] sm:$0xf0]  ;;  %v4756_v26 = vld [vmem:[%s7477_s1 + $0x4] sm:$0xf]  ;;  %v36_v27 = vld [vmem:[%s7478_s0 + $0x18] sm:$0xff] }
   0x7   :  { %797 = vmatpush.bf16.msra.mxu3 %v660_v23  ;;  %v3918_v28 = vor.u32 %v4757_v25, %v3917_v21  ;;  %v3919_v29 = vld [vmem:[%s7477_s1 + $0x8] sm:$0xf0]  ;;  %v92_v30 = vpack.c.bf16 %v36_v27, %v36_v27  ;;  %v202_v31 = vunpack.c.l.b16 %v91_v22  ;;  %v33_v32 = vld [vmem:[%s7478_s0] sm:$0xff]  ;;  %v3993_v37 = vld [vmem:[%s7477_s1 + $0x50] sm:$0xf] }
   0x8   :  { %v34_v33 = vld [vmem:[%s7478_s0 + $0x8] sm:$0xff]  ;;  %v3922_v34 = vor.u32 %v4756_v26, %v3919_v29  ;;  %v89_v35 = vpack.c.bf16 %v33_v32, %v33_v32  ;;  %v4767_v38 = vld [vmem:[%s7477_s1 + $0x54] sm:$0x30]  ;;  %v4766_v39 = vld [vmem:[%s7477_s1 + $0x54] sm:$0xf] }
   0x9   :  { %v90_v36 = vpack.c.bf16 %v34_v33, %v34_v33  ;;  %379 = vmatpush.bf16.msra.mxu0 %v3854_v19  ;;  %v203_v40 = vunpack.c.l.b16 %v92_v30  ;;  %v3994_v41 = vor.u32 %v4767_v38, %v3993_v37  ;;  %v3995_v42 = vld [vmem:[%s7477_s1 + $0x58] sm:$0x30]  ;;  %v37_v50 = vld [vmem:[%s7478_s0 + $0x20] sm:$0xff]  ;;  %v38_v51 = vld [vmem:[%s7478_s0 + $0x28] sm:$0xff] }
   0xa   :  { %508 = vmatpush.bf16.msra.mxu1 %v3858_v24  ;;  %669 = vmatpush.bf16.msra.mxu2 %v3918_v28  ;;  %v632_v43 = vunpack.c.l.b16 %v89_v35  ;;  %v3998_v45 = vor.u32 %v4766_v39, %v3995_v42  ;;  %v93_v52 = vpack.c.bf16 %v37_v50, %v37_v50  ;;  %v94_v53 = vpack.c.bf16 %v38_v51, %v38_v51  ;;  %v39_v57 = vld [vmem:[%s7478_s0 + $0x30] sm:$0xff]  ;;  %v40_v58 = vld [vmem:[%s7478_s0 + $0x38] sm:$0xff]  ;;  %v41_v0 = vld [vmem:[%s7478_s0 + $0x40] sm:$0xff] }
   0xb   :  { %v633_v44 = vunpack.c.l.b16 %v90_v36  ;;  %798 = vmatpush.bf16.msra.mxu3 %v3922_v34  ;;  %v250_v46 = vpack.c.b16 %v203_v40, %v202_v31  ;;  %v952_v47 = vsel %vm365_vm0, %v3994_v41, 0  ;;  %v95_v59 = vpack.c.bf16 %v39_v57, %v39_v57  ;;  %v42_v1 = vld [vmem:[%s7478_s0 + $0x48] sm:$0xff]  ;;  %v43_v7 = vld [vmem:[%s7478_s0 + $0x50] sm:$0xff]  ;;  %v44_v8 = vld [vmem:[%s7478_s0 + $0x58] sm:$0xff] }
   0xc   :  { %v955_v49 = vsel %vm365_vm0, %v3998_v45, 0  ;;  %v204_v54 = vunpack.c.l.b16 %v93_v52  ;;  %v205_v55 = vunpack.c.l.b16 %v94_v53  ;;  %v96_v60 = vpack.c.bf16 %v40_v58, %v40_v58  ;;  %v45_v14 = vld [vmem:[%s7478_s0 + $0x60] sm:$0xff]  ;;  %v46_v15 = vld [vmem:[%s7478_s0 + $0x68] sm:$0xff]  ;;  %v47_v21 = vld [vmem:[%s7478_s0 + $0x70] sm:$0xff] }
   0xd   :  { %v634_v48 = vpack.c.b16 %v633_v44, %v632_v43  ;;  %963 = vmatpush.bf16.msrb.mxu0 %v952_v47  ;;  %3891 = vmatmul.msk.bf16.vlgmr.msra.gmra.mxu1 %vm292_vm1, %v250_v46  ;;  %v206_v61 = vunpack.c.l.b16 %v95_v59  ;;  %v97_v2 = vpack.c.bf16 %v41_v0, %v41_v0  ;;  %v98_v3 = vpack.c.bf16 %v42_v1, %v42_v1  ;;  %v48_v22 = vld [vmem:[%s7478_s0 + $0x78] sm:$0xff]  ;;  %v49_v28 = vld [vmem:[%s7478_s0 + $0x80] sm:$0xff]  ;;  %v50_v29 = vld [vmem:[%s7478_s0 + $0x88] sm:$0xff] }
   0xe   :  { %3867 = vmatmul.msk.bf16.vlgmr.msra.gmra.mxu0 %vm292_vm1, %v250_v46  ;;  %1092 = vmatpush.bf16.msrb.mxu1 %v955_v49  ;;  %v5034_v56 = vpack.c.b16 %v205_v55, %v204_v54  ;;  %v207_v62 = vunpack.c.l.b16 %v96_v60  ;;  %v99_v9 = vpack.c.bf16 %v43_v7, %v43_v7  ;;  %v100_v10 = vpack.c.bf16 %v44_v8, %v44_v8  ;;  %v51_v35 = vld [vmem:[%s7478_s0 + $0x90] sm:$0xff]  ;;  %v52_v36 = vld [vmem:[%s7478_s0 + $0x98] sm:$0xff]  ;;  %v53_v44 = vld [vmem:[%s7478_s0 + $0xa0] sm:$0xff] }
   0xf   :  { %3931 = vmatmul.msk.bf16.vlgmr.msra.gmra.mxu2 %vm292_vm1, %v634_v48  ;;  %3955 = vmatmul.msk.bf16.vlgmr.msra.gmra.mxu3 %vm292_vm1, %v634_v48  ;;  %v208_v4 = vunpack.c.l.b16 %v97_v2  ;;  %v209_v5 = vunpack.c.l.b16 %v98_v3  ;;  %v101_v16 = vpack.c.bf16 %v45_v14, %v45_v14  ;;  %v102_v17 = vpack.c.bf16 %v46_v15, %v46_v15  ;;  %v54_v45 = vld [vmem:[%s7478_s0 + $0xa8] sm:$0xff]  ;;  %v55_v1 = vld [vmem:[%s7478_s0 + $0xb0] sm:$0xff]  ;;  %v56_v2 = vld [vmem:[%s7478_s0 + $0xb8] sm:$0xff] }
  0x10   :  { %v5048_v63 = vpack.c.b16 %v207_v62, %v206_v61  ;;  %v210_v11 = vunpack.c.l.b16 %v99_v9  ;;  %v211_v12 = vunpack.c.l.b16 %v100_v10  ;;  %v103_v23 = vpack.c.bf16 %v47_v21, %v47_v21 }
  0x11   :  { %v5064_v6 = vpack.c.b16 %v209_v5, %v208_v4  ;;  %v212_v18 = vunpack.c.l.b16 %v101_v16  ;;  %v213_v19 = vunpack.c.l.b16 %v102_v17  ;;  %v104_v24 = vpack.c.bf16 %v48_v22, %v48_v22 }
  0x12   :  { %v5080_v13 = vpack.c.b16 %v211_v12, %v210_v11  ;;  %v214_v25 = vunpack.c.l.b16 %v103_v23  ;;  %v105_v30 = vpack.c.bf16 %v49_v28, %v49_v28  ;;  %v106_v31 = vpack.c.bf16 %v50_v29, %v50_v29  ;;  %v57_v23 = vld [vmem:[%s7478_s0 + $0xc0] sm:$0xff] }
  0x13   :  { %v5096_v20 = vpack.c.b16 %v213_v19, %v212_v18  ;;  %v215_v26 = vunpack.c.l.b16 %v104_v24  ;;  %v107_v37 = vpack.c.bf16 %v51_v35, %v51_v35  ;;  %v108_v38 = vpack.c.bf16 %v52_v36, %v52_v36  ;;  %v58_v24 = vld [vmem:[%s7478_s0 + $0xc8] sm:$0xff]  ;;  %v4764_v28 = vld [vmem:[%s7477_s1 + $0x44] sm:$0xf] }
  0x14   :  { %v216_v32 = vunpack.c.l.b16 %v105_v30  ;;  %v217_v33 = vunpack.c.l.b16 %v106_v31  ;;  %v109_v48 = vpack.c.bf16 %v53_v44, %v53_v44  ;;  %v110_v49 = vpack.c.bf16 %v54_v45, %v54_v45  ;;  %v3987_v30 = vld [vmem:[%s7477_s1 + $0x48] sm:$0xf0] }
  0x15   :  { %v5112_v27 = vpack.c.b16 %v215_v26, %v214_v25  ;;  %v218_v39 = vunpack.c.l.b16 %v107_v37  ;;  %v219_v40 = vunpack.c.l.b16 %v108_v38  ;;  %v111_v5 = vpack.c.bf16 %v55_v1, %v55_v1  ;;  %v3985_v25 = vld [vmem:[%s7477_s1 + $0x40] sm:$0xf]  ;;  %v4765_v26 = vld [vmem:[%s7477_s1 + $0x44] sm:$0xf0] }
  0x16   :  { %v5128_v34 = vpack.c.b16 %v217_v33, %v216_v32  ;;  %v220_v54 = vunpack.c.l.b16 %v109_v48  ;;  %v221_v55 = vunpack.c.l.b16 %v110_v49  ;;  %v112_v7 = vpack.c.bf16 %v56_v2, %v56_v2 }
  0x17   :  { %v5144_v41 = vpack.c.b16 %v219_v40, %v218_v39  ;;  %v222_v12 = vunpack.c.l.b16 %v111_v5  ;;  %v3986_v29 = vor.u32 %v4765_v26, %v3985_v25  ;;  %v3990_v31 = vor.u32 %v4764_v28, %v3987_v30 }
  0x18   :  { %7508 = vst [vmem:[#allocation2_spill] sm:$0xff] %v5128_v34  ;;  %v5164_v59 = vpack.c.b16 %v221_v55, %v220_v54  ;;  %v223_v14 = vunpack.c.l.b16 %v112_v7  ;;  %v113_v35 = vpack.c.bf16 %v57_v23, %v57_v23  ;;  %v114_v36 = vpack.c.bf16 %v58_v24, %v58_v24  ;;  %v60_v54 = vld [vmem:[%s7478_s0 + $0xd8] sm:$0xff] }
  0x19   :  { %7509 = vst [vmem:[#allocation3_spill] sm:$0xff] %v5144_v41  ;;  %964 = vmatpush.bf16.msrb.mxu0 %v3986_v29  ;;  %1093 = vmatpush.bf16.msrb.mxu1 %v3990_v31 }
  0x1a   :  { %v5188_v17 = vpack.c.b16 %v223_v14, %v222_v12 }
  0x1d   :  { %3892 = vmatmul.msk.bf16.gmra.mxu1 %vm292_vm1, %v5034_v56 }
  0x1e   :  { %3868 = vmatmul.msk.bf16.gmra.mxu0 %vm292_vm1, %v5034_v56 }
  0x1f   :  { %3932 = vmatmul.msk.bf16.gmra.mxu2 %vm292_vm1, %v250_v46  ;;  %3956 = vmatmul.msk.bf16.gmra.mxu3 %vm292_vm1, %v250_v46 }
  0x2d   :  { %3893 = vmatmul.msk.bf16.gmra.mxu1 %vm292_vm1, %v5048_v63 }
  0x2e   :  { %3869 = vmatmul.msk.bf16.gmra.mxu0 %vm292_vm1, %v5048_v63 }
  0x2f   :  { %3933 = vmatmul.msk.bf16.gmra.mxu2 %vm292_vm1, %v5034_v56  ;;  %3957 = vmatmul.msk.bf16.gmra.mxu3 %vm292_vm1, %v5034_v56 }
  0x3d   :  { %3894 = vmatmul.msk.bf16.gmra.mxu1 %vm292_vm1, %v5064_v6 }
  0x3e   :  { %3870 = vmatmul.msk.bf16.gmra.mxu0 %vm292_vm1, %v5064_v6 }
  0x3f   :  { %3934 = vmatmul.msk.bf16.gmra.mxu2 %vm292_vm1, %v5048_v63  ;;  %3958 = vmatmul.msk.bf16.gmra.mxu3 %vm292_vm1, %v5048_v63 }
  0x4d   :  { %3895 = vmatmul.msk.bf16.gmra.mxu1 %vm292_vm1, %v5080_v13 }
  0x4e   :  { %3871 = vmatmul.msk.bf16.gmra.mxu0 %vm292_vm1, %v5080_v13 }
  0x4f   :  { %3935 = vmatmul.msk.bf16.gmra.mxu2 %vm292_vm1, %v5064_v6  ;;  %3959 = vmatmul.msk.bf16.gmra.mxu3 %vm292_vm1, %v5064_v6 }
  0x5d   :  { %3896 = vmatmul.msk.bf16.gmra.mxu1 %vm292_vm1, %v5096_v20 }
  0x5e   :  { %3872 = vmatmul.msk.bf16.gmra.mxu0 %vm292_vm1, %v5096_v20 }
  0x5f   :  { %3936 = vmatmul.msk.bf16.gmra.mxu2 %vm292_vm1, %v5080_v13  ;;  %3960 = vmatmul.msk.bf16.gmra.mxu3 %vm292_vm1, %v5080_v13 }
  0x6d   :  { %3897 = vmatmul.msk.bf16.gmra.mxu1 %vm292_vm1, %v5112_v27 }
  0x6e   :  { %3873 = vmatmul.msk.bf16.gmra.mxu0 %vm292_vm1, %v5112_v27 }
  0x6f   :  { %3937 = vmatmul.msk.bf16.gmra.mxu2 %vm292_vm1, %v5096_v20  ;;  %3961 = vmatmul.msk.bf16.gmra.mxu3 %vm292_vm1, %v5096_v20 }
  0x7d   :  { %3898 = vmatmul.msk.bf16.gmra.mxu1 %vm292_vm1, %v5128_v34 }
  0x7e   :  { %3874 = vmatmul.msk.bf16.gmra.mxu0 %vm292_vm1, %v5128_v34 }
  0x7f   :  { %3938 = vmatmul.msk.bf16.gmra.mxu2 %vm292_vm1, %v5112_v27  ;;  %3962 = vmatmul.msk.bf16.gmra.mxu3 %vm292_vm1, %v5112_v27 }
  0x8a   :  { %v510_v43 = vpop.f32.mrf.mxu1 }
  0x8b   :  { %v381_v42 = vpop.f32.mrf.mxu0 }
  0x8d   :  { %3899 = vmatmul.msk.bf16.gmra.mxu1 %vm292_vm1, %v5144_v41 }
  0x8e   :  { %3875 = vmatmul.msk.bf16.gmra.mxu0 %vm292_vm1, %v5144_v41 }
  0x8f   :  { %3939 = vmatmul.msk.bf16.gmra.mxu2 %vm292_vm1, %v5128_v34  ;;  %3963 = vmatmul.msk.bf16.gmra.mxu3 %vm292_vm1, %v5128_v34 }
  0x92   :  { %v671_v46 = vpop.f32.mrf.mxu2  ;;  %v800_v47 = vpop.f32.mrf.mxu3 }
  0x93   :  { %v5160_v50 = vadd.f32 %v671_v46, %v381_v42  ;;  %v5162_v51 = vadd.f32 %v800_v47, %v510_v43  ;;  %v383_v52 = vpop.f32.mrf.mxu0  ;;  %v512_v53 = vpop.f32.mrf.mxu1  ;;  %v224_v42 = vunpack.c.l.b16 %v113_v35  ;;  %v225_v43 = vunpack.c.l.b16 %v114_v36 }
  0x95   :  { %v5224_v46 = vpack.c.b16 %v225_v43, %v224_v42 }
  0x9a   :  { %v673_v57 = vpop.f32.mrf.mxu2  ;;  %v802_v58 = vpop.f32.mrf.mxu3 }
  0x9b   :  { %v5166_v60 = vadd.f32 %v673_v57, %v383_v52  ;;  %v5168_v61 = vadd.f32 %v802_v58, %v512_v53  ;;  %v386_v62 = vpop.f32.mrf.mxu0  ;;  %v515_v0 = vpop.f32.mrf.mxu1  ;;  %v59_v53 = vld [vmem:[%s7478_s0 + $0xd0] sm:$0xff] }
  0x9c   :  { %v115_v58 = vpack.c.bf16 %v59_v53, %v59_v53 }
  0x9d   :  { %3900 = vmatmul.msk.bf16.gmra.mxu1 %vm292_vm1, %v5164_v59 }
  0x9e   :  { %3876 = vmatmul.msk.bf16.gmra.mxu0 %vm292_vm1, %v5164_v59 }
  0x9f   :  { %3940 = vmatmul.msk.bf16.gmra.mxu2 %vm292_vm1, %v5144_v41  ;;  %3964 = vmatmul.msk.bf16.gmra.mxu3 %vm292_vm1, %v5144_v41 }
  0xa2   :  { %v676_v3 = vpop.f32.mrf.mxu2  ;;  %v805_v4 = vpop.f32.mrf.mxu3 }
  0xa3   :  { %v5184_v8 = vadd.f32 %v676_v3, %v386_v62  ;;  %v5186_v9 = vadd.f32 %v805_v4, %v515_v0  ;;  %v388_v10 = vpop.f32.mrf.mxu0  ;;  %v517_v11 = vpop.f32.mrf.mxu1  ;;  %v116_v62 = vpack.c.bf16 %v60_v54, %v60_v54  ;;  %v226_v4 = vunpack.c.l.b16 %v115_v58 }
  0xa5   :  { %v227_v5 = vunpack.c.l.b16 %v116_v62 }
  0xaa   :  { %v678_v15 = vpop.f32.mrf.mxu2  ;;  %v807_v16 = vpop.f32.mrf.mxu3 }
  0xab   :  { %v5190_v18 = vadd.f32 %v678_v15, %v388_v10  ;;  %v5192_v19 = vadd.f32 %v807_v16, %v517_v11  ;;  %v391_v21 = vpop.f32.mrf.mxu0  ;;  %v520_v22 = vpop.f32.mrf.mxu1  ;;  %v5248_v11 = vpack.c.b16 %v227_v5, %v226_v4 }
  0xad   :  { %3901 = vmatmul.msk.bf16.gmra.mxu1 %vm292_vm1, %v5188_v17 }
  0xae   :  { %3877 = vmatmul.msk.bf16.gmra.mxu0 %vm292_vm1, %v5188_v17 }
  0xaf   :  { %3941 = vmatmul.msk.bf16.gmra.mxu2 %vm292_vm1, %v5164_v59  ;;  %3965 = vmatmul.msk.bf16.gmra.mxu3 %vm292_vm1, %v5164_v59 }
  0xb2   :  { %v681_v32 = vpop.f32.mrf.mxu2  ;;  %v810_v33 = vpop.f32.mrf.mxu3 }
  0xb3   :  { %v5220_v37 = vadd.f32 %v681_v32, %v391_v21  ;;  %v5222_v38 = vadd.f32 %v810_v33, %v520_v22  ;;  %v393_v39 = vpop.f32.mrf.mxu0  ;;  %v522_v40 = vpop.f32.mrf.mxu1  ;;  %v61_v21 = vld [vmem:[%s7478_s0 + $0xe0] sm:$0xff]  ;;  %v62_v22 = vld [vmem:[%s7478_s0 + $0xe8] sm:$0xff] }
  0xb4   :  { %v117_v25 = vpack.c.bf16 %v61_v21, %v61_v21  ;;  %v118_v26 = vpack.c.bf16 %v62_v22, %v62_v22 }
  0xb6   :  { %v228_v32 = vunpack.c.l.b16 %v117_v25  ;;  %v229_v33 = vunpack.c.l.b16 %v118_v26 }
  0xba   :  { %v683_v44 = vpop.f32.mrf.mxu2  ;;  %v812_v45 = vpop.f32.mrf.mxu3 }
  0xbb   :  { %v5226_v47 = vadd.f32 %v683_v44, %v393_v39  ;;  %v5228_v48 = vadd.f32 %v812_v45, %v522_v40  ;;  %v396_v49 = vpop.f32.mrf.mxu0  ;;  %v525_v52 = vpop.f32.mrf.mxu1  ;;  %v5272_v39 = vpack.c.b16 %v229_v33, %v228_v32  ;;  %v63_v45 = vld [vmem:[%s7478_s0 + $0xf0] sm:$0xff] }
  0xbc   :  { %v119_v54 = vpack.c.bf16 %v63_v45, %v63_v45 }
  0xbd   :  { %3902 = vmatmul.msk.bf16.gmra.mxu1 %vm292_vm1, %v5224_v46 }
  0xbe   :  { %3878 = vmatmul.msk.bf16.gmra.mxu0 %vm292_vm1, %v5224_v46 }
  0xbf   :  { %3942 = vmatmul.msk.bf16.gmra.mxu2 %vm292_vm1, %v5188_v17  ;;  %3966 = vmatmul.msk.bf16.gmra.mxu3 %vm292_vm1, %v5188_v17 }
  0xc2   :  { %v686_v55 = vpop.f32.mrf.mxu2  ;;  %v815_v57 = vpop.f32.mrf.mxu3 }
  0xc3   :  { %v5244_v0 = vadd.f32 %v686_v55, %v396_v49  ;;  %v5246_v1 = vadd.f32 %v815_v57, %v525_v52  ;;  %v398_v2 = vpop.f32.mrf.mxu0  ;;  %v527_v3 = vpop.f32.mrf.mxu1  ;;  %v64_v49 = vld [vmem:[%s7478_s0 + $0xf8] sm:$0xff] }
  0xc4   :  { %v120_v55 = vpack.c.bf16 %v64_v49, %v64_v49 }
  0xc6   :  { %v231_v4 = vunpack.c.l.b16 %v120_v55 }
  0xca   :  { %v688_v7 = vpop.f32.mrf.mxu2  ;;  %v817_v10 = vpop.f32.mrf.mxu3 }
  0xcb   :  { %v5250_v12 = vadd.f32 %v688_v7, %v398_v2  ;;  %v5252_v14 = vadd.f32 %v817_v10, %v527_v3  ;;  %v401_v15 = vpop.f32.mrf.mxu0  ;;  %v530_v16 = vpop.f32.mrf.mxu1  ;;  %v230_v3 = vunpack.c.l.b16 %v119_v54 }
  0xcd   :  { %3903 = vmatmul.msk.bf16.gmra.mxu1 %vm292_vm1, %v5248_v11  ;;  %v5296_v10 = vpack.c.b16 %v231_v4, %v230_v3  ;;  %v68_v3 = vld [vmem:[%s7478_s0 + $0x118] sm:$0xff] }
  0xce   :  { %3879 = vmatmul.msk.bf16.gmra.mxu0 %vm292_vm1, %v5248_v11 }
  0xcf   :  { %3943 = vmatmul.msk.bf16.gmra.mxu2 %vm292_vm1, %v5224_v46  ;;  %3967 = vmatmul.msk.bf16.gmra.mxu3 %vm292_vm1, %v5224_v46 }
  0xd2   :  { %v691_v23 = vpop.f32.mrf.mxu2  ;;  %v820_v24 = vpop.f32.mrf.mxu3 }
  0xd3   :  { %v5268_v28 = vadd.f32 %v691_v23, %v401_v15  ;;  %v5270_v29 = vadd.f32 %v820_v24, %v530_v16  ;;  %v403_v30 = vpop.f32.mrf.mxu0  ;;  %v532_v31 = vpop.f32.mrf.mxu1  ;;  %v65_v23 = vld [vmem:[%s7478_s0 + $0x100] sm:$0xff]  ;;  %v66_v24 = vld [vmem:[%s7478_s0 + $0x108] sm:$0xff] }
  0xda   :  { %v693_v35 = vpop.f32.mrf.mxu2  ;;  %v822_v36 = vpop.f32.mrf.mxu3 }
  0xdb   :  { %v5274_v40 = vadd.f32 %v693_v35, %v403_v30  ;;  %v5276_v42 = vadd.f32 %v822_v36, %v532_v31  ;;  %v406_v43 = vpop.f32.mrf.mxu0  ;;  %v535_v44 = vpop.f32.mrf.mxu1  ;;  %v121_v30 = vpack.c.bf16 %v65_v23, %v65_v23  ;;  %v122_v31 = vpack.c.bf16 %v66_v24, %v66_v24 }
  0xdd   :  { %3904 = vmatmul.msk.bf16.gmra.mxu1 %vm292_vm1, %v5272_v39 }
  0xde   :  { %3880 = vmatmul.msk.bf16.gmra.mxu0 %vm292_vm1, %v5272_v39 }
  0xdf   :  { %3944 = vmatmul.msk.bf16.gmra.mxu2 %vm292_vm1, %v5248_v11  ;;  %3968 = vmatmul.msk.bf16.gmra.mxu3 %vm292_vm1, %v5248_v11 }
  0xe2   :  { %v696_v52 = vpop.f32.mrf.mxu2  ;;  %v825_v53 = vpop.f32.mrf.mxu3 }
  0xe3   :  { %v5292_v57 = vadd.f32 %v696_v52, %v406_v43  ;;  %v5294_v58 = vadd.f32 %v825_v53, %v535_v44  ;;  %v408_v62 = vpop.f32.mrf.mxu0  ;;  %v537_v2 = vpop.f32.mrf.mxu1  ;;  %v232_v43 = vunpack.c.l.b16 %v121_v30  ;;  %v233_v44 = vunpack.c.l.b16 %v122_v31 }
  0xe5   :  { %v5320_v52 = vpack.c.b16 %v233_v44, %v232_v43 }
  0xea   :  { %v698_v5 = vpop.f32.mrf.mxu2  ;;  %v827_v7 = vpop.f32.mrf.mxu3 }
  0xeb   :  { %v5298_v15 = vadd.f32 %v698_v5, %v408_v62  ;;  %v5300_v16 = vadd.f32 %v827_v7, %v537_v2  ;;  %v411_v21 = vpop.f32.mrf.mxu0  ;;  %v540_v22 = vpop.f32.mrf.mxu1  ;;  %v67_v2 = vld [vmem:[%s7478_s0 + $0x110] sm:$0xff] }
  0xec   :  { %v123_v7 = vpack.c.bf16 %v67_v2, %v67_v2 }
  0xed   :  { %3905 = vmatmul.msk.bf16.gmra.mxu1 %vm292_vm1, %v5296_v10 }
  0xee   :  { %3881 = vmatmul.msk.bf16.gmra.mxu0 %vm292_vm1, %v5296_v10 }
  0xef   :  { %3945 = vmatmul.msk.bf16.gmra.mxu2 %vm292_vm1, %v5272_v39  ;;  %3969 = vmatmul.msk.bf16.gmra.mxu3 %vm292_vm1, %v5272_v39 }
  0xf2   :  { %v701_v25 = vpop.f32.mrf.mxu2  ;;  %v830_v26 = vpop.f32.mrf.mxu3 }
  0xf3   :  { %v5316_v32 = vadd.f32 %v701_v25, %v411_v21  ;;  %v5318_v33 = vadd.f32 %v830_v26, %v540_v22  ;;  %v413_v35 = vpop.f32.mrf.mxu0  ;;  %v542_v36 = vpop.f32.mrf.mxu1  ;;  %v124_v21 = vpack.c.bf16 %v68_v3, %v68_v3  ;;  %v234_v26 = vunpack.c.l.b16 %v123_v7 }
  0xf5   :  { %v235_v30 = vunpack.c.l.b16 %v124_v21 }
  0xfa   :  { %v703_v45 = vpop.f32.mrf.mxu2  ;;  %v832_v49 = vpop.f32.mrf.mxu3 }
  0xfb   :  { %v5322_v53 = vadd.f32 %v703_v45, %v413_v35  ;;  %v5324_v54 = vadd.f32 %v832_v49, %v542_v36  ;;  %v416_v55 = vpop.f32.mrf.mxu0  ;;  %v545_v62 = vpop.f32.mrf.mxu1  ;;  %v5344_v36 = vpack.c.b16 %v235_v30, %v234_v26 }
  0xfd   :  { %7510 = vst [vmem:[#allocation4_spill] sm:$0xff] %v5322_v53  ;;  %3906 = vmatmul.msk.bf16.gmra.mxu1 %vm292_vm1, %v5320_v52 }
  0xfe   :  { %7511 = vst [vmem:[#allocation5_spill] sm:$0xff] %v5324_v54  ;;  %3882 = vmatmul.msk.bf16.gmra.mxu0 %vm292_vm1, %v5320_v52 }
  0xff   :  { %3946 = vmatmul.msk.bf16.gmra.mxu2 %vm292_vm1, %v5296_v10  ;;  %3970 = vmatmul.msk.bf16.gmra.mxu3 %vm292_vm1, %v5296_v10 }
 0x102   :  { %v706_v4 = vpop.f32.mrf.mxu2  ;;  %v835_v5 = vpop.f32.mrf.mxu3 }
 0x103   :  { %v5340_v22 = vadd.f32 %v706_v4, %v416_v55  ;;  %v5342_v23 = vadd.f32 %v835_v5, %v545_v62  ;;  %v418_v24 = vpop.f32.mrf.mxu0  ;;  %v547_v25 = vpop.f32.mrf.mxu1  ;;  %v69_v55 = vld [vmem:[%s7478_s0 + $0x120] sm:$0xff]  ;;  %v70_v62 = vld [vmem:[%s7478_s0 + $0x128] sm:$0xff] }
 0x104   :  { %v125_v4 = vpack.c.bf16 %v69_v55, %v69_v55  ;;  %v126_v5 = vpack.c.bf16 %v70_v62, %v70_v62 }
 0x105   :  { %7512 = vst [vmem:[#allocation6_spill] sm:$0xff] %v5340_v22 }
 0x106   :  { %7513 = vst [vmem:[#allocation7_spill] sm:$0xff] %v5342_v23  ;;  %v236_v26 = vunpack.c.l.b16 %v125_v4  ;;  %v237_v30 = vunpack.c.l.b16 %v126_v5 }
 0x10a   :  { %v708_v31 = vpop.f32.mrf.mxu2  ;;  %v837_v35 = vpop.f32.mrf.mxu3 }
 0x10b   :  { %v5346_v43 = vadd.f32 %v708_v31, %v418_v24  ;;  %v5348_v44 = vadd.f32 %v837_v35, %v547_v25  ;;  %v421_v45 = vpop.f32.mrf.mxu0  ;;  %v550_v49 = vpop.f32.mrf.mxu1 }
 0x10d   :  { %7514 = vst [vmem:[#allocation8_spill] sm:$0xff] %v5346_v43  ;;  %3907 = vmatmul.msk.bf16.gmra.mxu1 %vm292_vm1, %v5344_v36 }
 0x10e   :  { %7515 = vst [vmem:[#allocation9_spill] sm:$0xff] %v5348_v44  ;;  %3883 = vmatmul.msk.bf16.gmra.mxu0 %vm292_vm1, %v5344_v36  ;;  %v5368_v44 = vpack.c.b16 %v237_v30, %v236_v26  ;;  %v4061_v26 = vld [vmem:[%s7477_s1 + $0x70] sm:$0xf]  ;;  %v4771_v30 = vld [vmem:[%s7477_s1 + $0x74] sm:$0x30] }
 0x10f   :  { %3947 = vmatmul.msk.bf16.gmra.mxu2 %vm292_vm1, %v5320_v52  ;;  %3971 = vmatmul.msk.bf16.gmra.mxu3 %vm292_vm1, %v5320_v52 }
 0x110   :  { %7518 = vst [vmem:[#allocation12_spill] sm:$0xff] %v5368_v44 }
 0x112   :  { %v711_v2 = vpop.f32.mrf.mxu2  ;;  %v840_v3 = vpop.f32.mrf.mxu3 }
 0x113   :  { %v5364_v7 = vadd.f32 %v711_v2, %v421_v45  ;;  %v5366_v21 = vadd.f32 %v840_v3, %v550_v49  ;;  %v423_v24 = vpop.f32.mrf.mxu0  ;;  %v552_v25 = vpop.f32.mrf.mxu1  ;;  %v71_v45 = vld [vmem:[%s7478_s0 + $0x130] sm:$0xff]  ;;  %v72_v49 = vld [vmem:[%s7478_s0 + $0x138] sm:$0xff] }
 0x114   :  { %v127_v2 = vpack.c.bf16 %v71_v45, %v71_v45  ;;  %v128_v3 = vpack.c.bf16 %v72_v49, %v72_v49 }
 0x115   :  { %7516 = vst [vmem:[#allocation10_spill] sm:$0xff] %v5364_v7 }
 0x116   :  { %7517 = vst [vmem:[#allocation11_spill] sm:$0xff] %v5366_v21  ;;  %v238_v45 = vunpack.c.l.b16 %v127_v2  ;;  %v239_v49 = vunpack.c.l.b16 %v128_v3  ;;  %v73_v2 = vld [vmem:[%s7478_s0 + $0x140] sm:$0xff]  ;;  %v74_v3 = vld [vmem:[%s7478_s0 + $0x148] sm:$0xff] }
 0x11a   :  { %v713_v31 = vpop.f32.mrf.mxu2  ;;  %v842_v35 = vpop.f32.mrf.mxu3 }
 0x11b   :  { %v5370_v43 = vadd.f32 %v713_v31, %v423_v24  ;;  %v5372_v23 = vadd.f32 %v842_v35, %v552_v25  ;;  %v426_v22 = vpop.f32.mrf.mxu0  ;;  %v555_v54 = vpop.f32.mrf.mxu1  ;;  %v4770_v31 = vld [vmem:[%s7477_s1 + $0x74] sm:$0xf]  ;;  %v4062_v35 = vor.u32 %v4771_v30, %v4061_v26 }
 0x11d   :  { %7519 = vst [vmem:[#allocation13_spill] sm:$0xff] %v5370_v43  ;;  %3908 = vmatmul.msk.bf16.gmra.mxu1 %vm292_vm1, %v5368_v44 }
 0x11e   :  { %7520 = vst [vmem:[#allocation14_spill] sm:$0xff] %v5372_v23  ;;  %3884 = vmatmul.msk.bf16.gmra.mxu0 %vm292_vm1, %v5368_v44  ;;  %v5406_v23 = vpack.c.b16 %v239_v49, %v238_v45 }
 0x11f   :  { %3948 = vmatmul.msk.bf16.gmra.mxu2 %vm292_vm1, %v5344_v36  ;;  %3972 = vmatmul.msk.bf16.gmra.mxu3 %vm292_vm1, %v5344_v36 }
 0x120   :  { %7523 = vst [vmem:[#allocation17_spill] sm:$0xff] %v5406_v23 }
 0x122   :  { %v716_v55 = vpop.f32.mrf.mxu2  ;;  %v845_v62 = vpop.f32.mrf.mxu3 }
 0x123   :  { %v5388_v4 = vadd.f32 %v716_v55, %v426_v22  ;;  %v5390_v5 = vadd.f32 %v845_v62, %v555_v54  ;;  %v428_v24 = vpop.f32.mrf.mxu0  ;;  %v557_v25 = vpop.f32.mrf.mxu1  ;;  %v4063_v54 = vld [vmem:[%s7477_s1 + $0x78] sm:$0x30]  ;;  %v1343_v55 = vsel %vm365_vm0, %v4062_v35, 0 }
 0x124   :  { %v4066_v22 = vor.u32 %v4770_v31, %v4063_v54  ;;  %1354 = vmatpush.bf16.msrb.mxu2 %v1343_v55 }
 0x125   :  { %7521 = vst [vmem:[#allocation15_spill] sm:$0xff] %v5388_v4 }
 0x126   :  { %7522 = vst [vmem:[#allocation16_spill] sm:$0xff] %v5390_v5  ;;  %v1346_v62 = vsel %vm365_vm0, %v4066_v22, 0 }
 0x127   :  { %1483 = vmatpush.bf16.msrb.mxu3 %v1346_v62 }
 0x12a   :  { %v718_v5 = vpop.f32.mrf.mxu2  ;;  %v847_v4 = vpop.f32.mrf.mxu3 }
 0x12b   :  { %v5408_v43 = vadd.f32 %v718_v5, %v428_v24  ;;  %v5410_v26 = vadd.f32 %v847_v4, %v557_v25  ;;  %v431_v30 = vpop.f32.mrf.mxu0  ;;  %v560_v21 = vpop.f32.mrf.mxu1  ;;  %v129_v24 = vpack.c.bf16 %v73_v2, %v73_v2  ;;  %v130_v25 = vpack.c.bf16 %v74_v3, %v74_v3 }
 0x12d   :  { %7524 = vst [vmem:[#allocation18_spill] sm:$0xff] %v5408_v43  ;;  %3909 = vmatmul.msk.bf16.gmra.mxu1 %vm292_vm1, %v5406_v23  ;;  %v240_v45 = vunpack.c.l.b16 %v129_v24  ;;  %v241_v49 = vunpack.c.l.b16 %v130_v25 }
 0x12e   :  { %7525 = vst [vmem:[#allocation19_spill] sm:$0xff] %v5410_v26  ;;  %3885 = vmatmul.msk.bf16.gmra.mxu0 %vm292_vm1, %v5406_v23 }
 0x12f   :  { %3949 = vmatmul.msk.bf16.gmra.mxu2 %vm292_vm1, %v5368_v44  ;;  %3973 = vmatmul.msk.bf16.gmra.mxu3 %vm292_vm1, %v5368_v44  ;;  %v5430_v26 = vpack.c.b16 %v241_v49, %v240_v45 }
 0x131   :  { %7528 = vst [vmem:[#allocation22_spill] sm:$0xff] %v5430_v26 }
 0x132   :  { %v721_v4 = vpop.f32.mrf.mxu2  ;;  %v850_v5 = vpop.f32.mrf.mxu3 }
 0x133   :  { %v5426_v31 = vadd.f32 %v721_v4, %v431_v30  ;;  %v5428_v35 = vadd.f32 %v850_v5, %v560_v21  ;;  %v433_v54 = vpop.f32.mrf.mxu0  ;;  %v562_v22 = vpop.f32.mrf.mxu1  ;;  %v75_v21 = vld [vmem:[%s7478_s0 + $0x150] sm:$0xff]  ;;  %v76_v30 = vld [vmem:[%s7478_s0 + $0x158] sm:$0xff] }
 0x134   :  { %v131_v4 = vpack.c.bf16 %v75_v21, %v75_v21  ;;  %v132_v5 = vpack.c.bf16 %v76_v30, %v76_v30 }
 0x135   :  { %7526 = vst [vmem:[#allocation20_spill] sm:$0xff] %v5426_v31 }
 0x136   :  { %7527 = vst [vmem:[#allocation21_spill] sm:$0xff] %v5428_v35  ;;  %v242_v45 = vunpack.c.l.b16 %v131_v4  ;;  %v243_v49 = vunpack.c.l.b16 %v132_v5 }
 0x13a   :  { %v723_v55 = vpop.f32.mrf.mxu2  ;;  %v852_v62 = vpop.f32.mrf.mxu3 }
 0x13b   :  { %v5432_v43 = vadd.f32 %v723_v55, %v433_v54  ;;  %v5434_v7 = vadd.f32 %v852_v62, %v562_v22  ;;  %v436_v44 = vpop.f32.mrf.mxu0  ;;  %v565_v53 = vpop.f32.mrf.mxu1 }
 0x13d   :  { %7529 = vst [vmem:[#allocation23_spill] sm:$0xff] %v5432_v43  ;;  %3910 = vmatmul.msk.bf16.gmra.mxu1 %vm292_vm1, %v5430_v26 }
 0x13e   :  { %7530 = vst [vmem:[#allocation24_spill] sm:$0xff] %v5434_v7  ;;  %3886 = vmatmul.msk.bf16.gmra.mxu0 %vm292_vm1, %v5430_v26  ;;  %v5454_v7 = vpack.c.b16 %v243_v49, %v242_v45 }
 0x13f   :  { %3950 = vmatmul.msk.bf16.gmra.mxu2 %vm292_vm1, %v5406_v23  ;;  %3974 = vmatmul.msk.bf16.gmra.mxu3 %vm292_vm1, %v5406_v23 }
 0x140   :  { %7533 = vst [vmem:[#allocation27_spill] sm:$0xff] %v5454_v7 }
 0x142   :  { %v726_v2 = vpop.f32.mrf.mxu2  ;;  %v855_v3 = vpop.f32.mrf.mxu3 }
 0x143   :  { %v5450_v24 = vadd.f32 %v726_v2, %v436_v44  ;;  %v5452_v25 = vadd.f32 %v855_v3, %v565_v53  ;;  %v438_v54 = vpop.f32.mrf.mxu0  ;;  %v567_v22 = vpop.f32.mrf.mxu1  ;;  %v77_v53 = vld [vmem:[%s7478_s0 + $0x160] sm:$0xff]  ;;  %v78_v44 = vld [vmem:[%s7478_s0 + $0x168] sm:$0xff] }
 0x144   :  { %v133_v2 = vpack.c.bf16 %v77_v53, %v77_v53  ;;  %v134_v3 = vpack.c.bf16 %v78_v44, %v78_v44 }
 0x145   :  { %7531 = vst [vmem:[#allocation25_spill] sm:$0xff] %v5450_v24 }
 0x146   :  { %7532 = vst [vmem:[#allocation26_spill] sm:$0xff] %v5452_v25  ;;  %v244_v45 = vunpack.c.l.b16 %v133_v2  ;;  %v245_v49 = vunpack.c.l.b16 %v134_v3 }
 0x14a   :  { %v728_v55 = vpop.f32.mrf.mxu2  ;;  %v857_v62 = vpop.f32.mrf.mxu3 }
 0x14b   :  { %v5456_v43 = vadd.f32 %v728_v55, %v438_v54  ;;  %v5458_v35 = vadd.f32 %v857_v62, %v567_v22  ;;  %v441_v31 = vpop.f32.mrf.mxu0  ;;  %v570_v23 = vpop.f32.mrf.mxu1 }
 0x14d   :  { %7534 = vst [vmem:[#allocation28_spill] sm:$0xff] %v5456_v43  ;;  %3911 = vmatmul.msk.bf16.gmra.mxu1 %vm292_vm1, %v5454_v7 }
 0x14e   :  { %7535 = vst [vmem:[#allocation29_spill] sm:$0xff] %v5458_v35  ;;  %3887 = vmatmul.msk.bf16.gmra.mxu0 %vm292_vm1, %v5454_v7  ;;  %v5478_v35 = vpack.c.b16 %v245_v49, %v244_v45 }
 0x14f   :  { %3951 = vmatmul.msk.bf16.gmra.mxu2 %vm292_vm1, %v5430_v26  ;;  %3975 = vmatmul.msk.bf16.gmra.mxu3 %vm292_vm1, %v5430_v26 }
 0x150   :  { %7538 = vst [vmem:[#allocation32_spill] sm:$0xff] %v5478_v35 }
 0x152   :  { %v731_v21 = vpop.f32.mrf.mxu2  ;;  %v860_v30 = vpop.f32.mrf.mxu3 }
 0x153   :  { %v5474_v4 = vadd.f32 %v731_v21, %v441_v31  ;;  %v5476_v5 = vadd.f32 %v860_v30, %v570_v23  ;;  %v443_v54 = vpop.f32.mrf.mxu0  ;;  %v572_v22 = vpop.f32.mrf.mxu1  ;;  %v79_v23 = vld [vmem:[%s7478_s0 + $0x170] sm:$0xff]  ;;  %v80_v31 = vld [vmem:[%s7478_s0 + $0x178] sm:$0xff] }
 0x154   :  { %v135_v21 = vpack.c.bf16 %v79_v23, %v79_v23  ;;  %v136_v30 = vpack.c.bf16 %v80_v31, %v80_v31  ;;  %v4768_v23 = vld [vmem:[%s7477_s1 + $0x64] sm:$0xf] }
 0x155   :  { %7536 = vst [vmem:[#allocation30_spill] sm:$0xff] %v5474_v4 }
 0x156   :  { %7537 = vst [vmem:[#allocation31_spill] sm:$0xff] %v5476_v5  ;;  %v246_v45 = vunpack.c.l.b16 %v135_v21  ;;  %v247_v49 = vunpack.c.l.b16 %v136_v30 }
 0x15a   :  { %v733_v55 = vpop.f32.mrf.mxu2  ;;  %v862_v62 = vpop.f32.mrf.mxu3 }
 0x15b   :  { %v5480_v43 = vadd.f32 %v733_v55, %v443_v54  ;;  %v5482_v25 = vadd.f32 %v862_v62, %v572_v22  ;;  %v446_v24 = vpop.f32.mrf.mxu0  ;;  %v575_v26 = vpop.f32.mrf.mxu1  ;;  %v4053_v55 = vld [vmem:[%s7477_s1 + $0x60] sm:$0xf]  ;;  %v4769_v62 = vld [vmem:[%s7477_s1 + $0x64] sm:$0xf0] }
 0x15d   :  { %7539 = vst [vmem:[#allocation33_spill] sm:$0xff] %v5480_v43  ;;  %3912 = vmatmul.msk.bf16.gmra.mxu1 %vm292_vm1, %v5478_v35 }
 0x15e   :  { %7540 = vst [vmem:[#allocation34_spill] sm:$0xff] %v5482_v25  ;;  %3888 = vmatmul.msk.bf16.gmra.mxu0 %vm292_vm1, %v5478_v35 }
 0x15f   :  { %3952 = vmatmul.msk.bf16.gmra.mxu2 %vm292_vm1, %v5454_v7  ;;  %3976 = vmatmul.msk.bf16.gmra.mxu3 %vm292_vm1, %v5454_v7 }
 0x162   :  { %v736_v53 = vpop.f32.mrf.mxu2  ;;  %v865_v44 = vpop.f32.mrf.mxu3 }
 0x163   :  { %v5498_v2 = vadd.f32 %v736_v53, %v446_v24  ;;  %v5500_v3 = vadd.f32 %v865_v44, %v575_v26  ;;  %v448_v54 = vpop.f32.mrf.mxu0  ;;  %v577_v22 = vpop.f32.mrf.mxu1  ;;  %v5511_v26 = vpack.c.b16 %v247_v49, %v246_v45  ;;  %v4054_v53 = vor.u32 %v4769_v62, %v4053_v55  ;;  %v4055_v44 = vld [vmem:[%s7477_s1 + $0x68] sm:$0xf0]  ;;  %v81_v45 = vld [vmem:[%s7478_s0 + $0x180] sm:$0xff]  ;;  %v4774_v49 = vld [vmem:[%s7477_s1 + $0x94] sm:$0xf] }
 0x164   :  { %v4058_v25 = vor.u32 %v4768_v23, %v4055_v44  ;;  %v4131_v62 = vld [vmem:[%s7477_s1 + $0x98] sm:$0x30] }
 0x165   :  { %7541 = vst [vmem:[#allocation35_spill] sm:$0xff] %v5498_v2  ;;  %1355 = vmatpush.bf16.msrb.mxu2 %v4054_v53  ;;  %v4134_v23 = vor.u32 %v4774_v49, %v4131_v62  ;;  %v137_v53 = vpack.c.bf16 %v81_v45, %v81_v45 }
 0x166   :  { %7542 = vst [vmem:[#allocation36_spill] sm:$0xff] %v5500_v3  ;;  %1484 = vmatpush.bf16.msrb.mxu3 %v4058_v25  ;;  %v4129_v25 = vld [vmem:[%s7477_s1 + $0x90] sm:$0xf] }
 0x167   :  { %7543 = vst [vmem:[#allocation37_spill] sm:$0xff] %v5511_v26 }
 0x16a   :  { %v738_v24 = vpop.f32.mrf.mxu2  ;;  %v867_v31 = vpop.f32.mrf.mxu3 }
 0x16b   :  { %v5516_v21 = vadd.f32 %v738_v24, %v448_v54  ;;  %v5518_v30 = vadd.f32 %v867_v31, %v577_v22  ;;  %v451_v3 = vpop.f32.mrf.mxu0  ;;  %v580_v2 = vpop.f32.mrf.mxu1  ;;  %v82_v54 = vld [vmem:[%s7478_s0 + $0x188] sm:$0xff]  ;;  %v4775_v22 = vld [vmem:[%s7477_s1 + $0x94] sm:$0x30] }
 0x16c   :  { %v4130_v55 = vor.u32 %v4775_v22, %v4129_v25  ;;  %v138_v44 = vpack.c.bf16 %v82_v54, %v82_v54  ;;  %v1737_v25 = vsel %vm365_vm0, %v4134_v23, 0  ;;  %v248_v22 = vunpack.c.l.b16 %v137_v53 }
 0x16d   :  { %7544 = vst [vmem:[#allocation38_spill] sm:$0xff] %v5516_v21  ;;  %3913 = vmatmul.msk.bf16.gmra.mxu1 %vm292_vm1, %v5511_v26 }
 0x16e   :  { %7545 = vst [vmem:[#allocation39_spill] sm:$0xff] %v5518_v30  ;;  %3889 = vmatmul.msk.bf16.gmra.mxu0 %vm292_vm1, %v5511_v26  ;;  %v1734_v30 = vsel %vm365_vm0, %v4130_v55, 0  ;;  %1874 = vmatpush.bf16.msra.mxu1 %v1737_v25 }
 0x16f   :  { %3953 = vmatmul.msk.bf16.gmra.mxu2 %vm292_vm1, %v5478_v35  ;;  %3977 = vmatmul.msk.bf16.gmra.mxu3 %vm292_vm1, %v5478_v35  ;;  %v249_v35 = vunpack.c.l.b16 %v138_v44 }
 0x170   :  { %1745 = vmatpush.bf16.msra.mxu0 %v1734_v30 }
 0x171   :  { %v5552_v62 = vpack.c.b16 %v249_v35, %v248_v22 }
 0x172   :  { %v741_v24 = vpop.f32.mrf.mxu2  ;;  %v870_v31 = vpop.f32.mrf.mxu3 }
 0x173   :  { %v5547_v21 = vadd.f32 %v741_v24, %v451_v3  ;;  %v5549_v43 = vadd.f32 %v870_v31, %v580_v2  ;;  %v453_v5 = vpop.f32.mrf.mxu0  ;;  %v582_v4 = vpop.f32.mrf.mxu1 }
 0x17a   :  { %v743_v7 = vpop.f32.mrf.mxu2  ;;  %v872_v49 = vpop.f32.mrf.mxu3 }
 0x17b   :  { %v5554_v45 = vadd.f32 %v743_v7, %v453_v5  ;;  %v5556_v54 = vadd.f32 %v872_v49, %v582_v4  ;;  %v456_v3 = vpop.f32.mrf.mxu0  ;;  %v585_v55 = vpop.f32.mrf.mxu1 }
 0x17d   :  { %3914 = vmatmul.msk.bf16.gmra.mxu1 %vm292_vm1, %v5552_v62 }
 0x17e   :  { %3890 = vmatmul.msk.bf16.gmra.mxu0 %vm292_vm1, %v5552_v62 }
 0x17f   :  { %3954 = vmatmul.msk.bf16.gmra.mxu2 %vm292_vm1, %v5511_v26  ;;  %3978 = vmatmul.msk.bf16.gmra.mxu3 %vm292_vm1, %v5511_v26 }
 0x182   :  { %v746_v35 = vpop.f32.mrf.mxu2  ;;  %v875_v2 = vpop.f32.mrf.mxu3 }
 0x183   :  { %v5566_v7 = vadd.f32 %v746_v35, %v456_v3  ;;  %v5568_v4 = vadd.f32 %v875_v2, %v585_v55  ;;  %v458_v5 = vpop.f32.mrf.mxu0  ;;  %v587_v30 = vpop.f32.mrf.mxu1 }
 0x18a   :  { %v748_v23 = vpop.f32.mrf.mxu2  ;;  %v877_v24 = vpop.f32.mrf.mxu3 }
 0x18b   :  { %v5570_v31 = vadd.f32 %v748_v23, %v458_v5  ;;  %v5572_v53 = vadd.f32 %v877_v24, %v587_v30  ;;  %v461_v44 = vpop.f32.mrf.mxu0  ;;  %v590_v25 = vpop.f32.mrf.mxu1 }
 0x18d   :  { %7546 = vst [vmem:[#allocation40_spill] sm:$0xff] %v5572_v53  ;;  %4023 = vmatmul.msk.bf16.vlgmr.msrb.gmra.mxu1 %vm292_vm1, %v5034_v56 }
 0x18e   :  { %3999 = vmatmul.msk.bf16.vlgmr.msrb.gmra.mxu0 %vm292_vm1, %v5034_v56 }
 0x18f   :  { %4067 = vmatmul.msk.bf16.vlgmr.msrb.gmra.mxu2 %vm292_vm1, %v5048_v63  ;;  %4091 = vmatmul.msk.bf16.vlgmr.msrb.gmra.mxu3 %vm292_vm1, %v5048_v63 }
 0x192   :  { %v751_v22 = vpop.f32.mrf.mxu2  ;;  %v880_v49 = vpop.f32.mrf.mxu3 }
 0x193   :  { %v5582_v3 = vadd.f32 %v751_v22, %v461_v44  ;;  %v5584_v55 = vadd.f32 %v880_v49, %v590_v25  ;;  %v463_v35 = vpop.f32.mrf.mxu0  ;;  %v592_v2 = vpop.f32.mrf.mxu1 }
 0x195   :  { %7547 = vst [vmem:[#allocation41_spill] sm:$0xff] %v5584_v55 }
 0x19a   :  { %v753_v5 = vpop.f32.mrf.mxu2  ;;  %v882_v30 = vpop.f32.mrf.mxu3 }
 0x19b   :  { %v5586_v23 = vadd.f32 %v753_v5, %v463_v35  ;;  %v5588_v24 = vadd.f32 %v882_v30, %v592_v2  ;;  %v466_v56 = vpop.f32.mrf.mxu0  ;;  %v595_v53 = vpop.f32.mrf.mxu1 }
 0x19d   :  { %7548 = vst [vmem:[#allocation42_spill] sm:$0xff] %v5586_v23  ;;  %4024 = vmatmul.msk.bf16.gmra.mxu1 %vm292_vm1, %v5048_v63 }
 0x19e   :  { %7549 = vst [vmem:[#allocation43_spill] sm:$0xff] %v5588_v24  ;;  %4000 = vmatmul.msk.bf16.gmra.mxu0 %vm292_vm1, %v5048_v63 }
 0x19f   :  { %4068 = vmatmul.msk.bf16.gmra.mxu2 %vm292_vm1, %v5064_v6  ;;  %4092 = vmatmul.msk.bf16.gmra.mxu3 %vm292_vm1, %v5064_v6 }
 0x1a2   :  { %v756_v44 = vpop.f32.mrf.mxu2  ;;  %v885_v25 = vpop.f32.mrf.mxu3 }
 0x1a3   :  { %v5598_v22 = vadd.f32 %v756_v44, %v466_v56  ;;  %v5600_v49 = vadd.f32 %v885_v25, %v595_v53  ;;  %v468_v35 = vpop.f32.mrf.mxu0  ;;  %v597_v2 = vpop.f32.mrf.mxu1 }
 0x1a5   :  { %7550 = vst [vmem:[#allocation44_spill] sm:$0xff] %v5598_v22 }
 0x1a6   :  { %7551 = vst [vmem:[#allocation45_spill] sm:$0xff] %v5600_v49 }
 0x1aa   :  { %v758_v5 = vpop.f32.mrf.mxu2  ;;  %v887_v30 = vpop.f32.mrf.mxu3 }
 0x1ab   :  { %v5602_v24 = vadd.f32 %v758_v5, %v468_v35  ;;  %v5604_v23 = vadd.f32 %v887_v30, %v597_v2  ;;  %v471_v63 = vpop.f32.mrf.mxu0  ;;  %v600_v55 = vpop.f32.mrf.mxu1 }
 0x1ad   :  { %7552 = vst [vmem:[#allocation46_spill] sm:$0xff] %v5602_v24  ;;  %4025 = vmatmul.msk.bf16.gmra.mxu1 %vm292_vm1, %v5064_v6 }
 0x1ae   :  { %7553 = vst [vmem:[#allocation47_spill] sm:$0xff] %v5604_v23  ;;  %4001 = vmatmul.msk.bf16.gmra.mxu0 %vm292_vm1, %v5064_v6 }
 0x1af   :  { %4069 = vmatmul.msk.bf16.gmra.mxu2 %vm292_vm1, %v5080_v13  ;;  %4093 = vmatmul.msk.bf16.gmra.mxu3 %vm292_vm1, %v5080_v13 }
 0x1b2   :  { %v761_v53 = vpop.f32.mrf.mxu2  ;;  %v890_v56 = vpop.f32.mrf.mxu3 }
 0x1b3   :  { %v5614_v44 = vadd.f32 %v761_v53, %v471_v63  ;;  %v5616_v25 = vadd.f32 %v890_v56, %v600_v55  ;;  %v473_v35 = vpop.f32.mrf.mxu0  ;;  %v602_v2 = vpop.f32.mrf.mxu1 }
 0x1b5   :  { %7554 = vst [vmem:[#allocation48_spill] sm:$0xff] %v5614_v44 }
 0x1b6   :  { %7555 = vst [vmem:[#allocation49_spill] sm:$0xff] %v5616_v25 }
 0x1ba   :  { %v763_v5 = vpop.f32.mrf.mxu2  ;;  %v892_v30 = vpop.f32.mrf.mxu3 }
 0x1bb   :  { %v5618_v23 = vadd.f32 %v763_v5, %v473_v35  ;;  %v5620_v24 = vadd.f32 %v892_v30, %v602_v2  ;;  %v476_v49 = vpop.f32.mrf.mxu0  ;;  %v605_v22 = vpop.f32.mrf.mxu1 }
 0x1bd   :  { %7556 = vst [vmem:[#allocation50_spill] sm:$0xff] %v5618_v23  ;;  %4026 = vmatmul.msk.bf16.gmra.mxu1 %vm292_vm1, %v5080_v13 }
 0x1be   :  { %7557 = vst [vmem:[#allocation51_spill] sm:$0xff] %v5620_v24  ;;  %4002 = vmatmul.msk.bf16.gmra.mxu0 %vm292_vm1, %v5080_v13 }
 0x1bf   :  { %4070 = vmatmul.msk.bf16.gmra.mxu2 %vm292_vm1, %v5096_v20  ;;  %4094 = vmatmul.msk.bf16.gmra.mxu3 %vm292_vm1, %v5096_v20 }
 0x1c2   :  { %v766_v55 = vpop.f32.mrf.mxu2  ;;  %v895_v63 = vpop.f32.mrf.mxu3 }
 0x1c3   :  { %v5630_v53 = vadd.f32 %v766_v55, %v476_v49  ;;  %v5632_v56 = vadd.f32 %v895_v63, %v605_v22  ;;  %v478_v35 = vpop.f32.mrf.mxu0  ;;  %v607_v2 = vpop.f32.mrf.mxu1 }
 0x1c5   :  { %7558 = vst [vmem:[#allocation52_spill] sm:$0xff] %v5630_v53 }
 0x1c6   :  { %7559 = vst [vmem:[#allocation53_spill] sm:$0xff] %v5632_v56 }
 0x1ca   :  { %v768_v5 = vpop.f32.mrf.mxu2  ;;  %v897_v30 = vpop.f32.mrf.mxu3 }
 0x1cb   :  { %v5634_v24 = vadd.f32 %v768_v5, %v478_v35  ;;  %v5636_v23 = vadd.f32 %v897_v30, %v607_v2  ;;  %v481_v25 = vpop.f32.mrf.mxu0  ;;  %v610_v44 = vpop.f32.mrf.mxu1 }
 0x1cd   :  { %7560 = vst [vmem:[#allocation54_spill] sm:$0xff] %v5634_v24  ;;  %4027 = vmatmul.msk.bf16.gmra.mxu1 %vm292_vm1, %v5096_v20 }
 0x1ce   :  { %7561 = vst [vmem:[#allocation55_spill] sm:$0xff] %v5636_v23  ;;  %4003 = vmatmul.msk.bf16.gmra.mxu0 %vm292_vm1, %v5096_v20 }
 0x1cf   :  { %4071 = vmatmul.msk.bf16.gmra.mxu2 %vm292_vm1, %v5112_v27  ;;  %4095 = vmatmul.msk.bf16.gmra.mxu3 %vm292_vm1, %v5112_v27 }
 0x1d2   :  { %v771_v22 = vpop.f32.mrf.mxu2  ;;  %v900_v49 = vpop.f32.mrf.mxu3 }
 0x1d3   :  { %v5646_v55 = vadd.f32 %v771_v22, %v481_v25  ;;  %v5648_v63 = vadd.f32 %v900_v49, %v610_v44  ;;  %v483_v35 = vpop.f32.mrf.mxu0  ;;  %v612_v2 = vpop.f32.mrf.mxu1 }
 0x1d5   :  { %7562 = vst [vmem:[#allocation56_spill] sm:$0xff] %v5646_v55 }
 0x1d6   :  { %7563 = vst [vmem:[#allocation57_spill] sm:$0xff] %v5648_v63 }
 0x1da   :  { %v773_v5 = vpop.f32.mrf.mxu2  ;;  %v902_v30 = vpop.f32.mrf.mxu3 }
 0x1db   :  { %v5650_v23 = vadd.f32 %v773_v5, %v483_v35  ;;  %v5652_v24 = vadd.f32 %v902_v30, %v612_v2  ;;  %v486_v56 = vpop.f32.mrf.mxu0  ;;  %v615_v53 = vpop.f32.mrf.mxu1 }
 0x1dd   :  { %7564 = vst [vmem:[#allocation58_spill] sm:$0xff] %v5650_v23  ;;  %4028 = vmatmul.msk.bf16.gmra.mxu1 %vm292_vm1, %v5112_v27 }
 0x1de   :  { %7565 = vst [vmem:[#allocation59_spill] sm:$0xff] %v5652_v24  ;;  %4004 = vmatmul.msk.bf16.gmra.mxu0 %vm292_vm1, %v5112_v27 }
 0x1df   :  { %4072 = vmatmul.msk.bf16.gmra.mxu2 %vm292_vm1, %v5128_v34  ;;  %4096 = vmatmul.msk.bf16.gmra.mxu3 %vm292_vm1, %v5128_v34 }
 0x1e2   :  { %v776_v44 = vpop.f32.mrf.mxu2  ;;  %v905_v25 = vpop.f32.mrf.mxu3 }
 0x1e3   :  { %v5662_v22 = vadd.f32 %v776_v44, %v486_v56  ;;  %v5664_v49 = vadd.f32 %v905_v25, %v615_v53  ;;  %v488_v35 = vpop.f32.mrf.mxu0  ;;  %v617_v2 = vpop.f32.mrf.mxu1 }
 0x1e5   :  { %7566 = vst [vmem:[#allocation60_spill] sm:$0xff] %v5662_v22 }
 0x1e6   :  { %7567 = vst [vmem:[#allocation61_spill] sm:$0xff] %v5664_v49 }
 0x1ea   :  { %v778_v5 = vpop.f32.mrf.mxu2  ;;  %v907_v30 = vpop.f32.mrf.mxu3 }
 0x1eb   :  { %v5666_v24 = vadd.f32 %v778_v5, %v488_v35  ;;  %v5668_v23 = vadd.f32 %v907_v30, %v617_v2  ;;  %v491_v63 = vpop.f32.mrf.mxu0  ;;  %v620_v55 = vpop.f32.mrf.mxu1 }
 0x1ed   :  { %7568 = vst [vmem:[#allocation62_spill] sm:$0xff] %v5666_v24  ;;  %4029 = vmatmul.msk.bf16.gmra.mxu1 %vm292_vm1, %v5128_v34 }
 0x1ee   :  { %7569 = vst [vmem:[#allocation63_spill] sm:$0xff] %v5668_v23  ;;  %4005 = vmatmul.msk.bf16.gmra.mxu0 %vm292_vm1, %v5128_v34 }
 0x1ef   :  { %4073 = vmatmul.msk.bf16.gmra.mxu2 %vm292_vm1, %v5144_v41  ;;  %4097 = vmatmul.msk.bf16.gmra.mxu3 %vm292_vm1, %v5144_v41 }
 0x1f2   :  { %v781_v53 = vpop.f32.mrf.mxu2  ;;  %v910_v56 = vpop.f32.mrf.mxu3 }
 0x1f3   :  { %v5678_v44 = vadd.f32 %v781_v53, %v491_v63  ;;  %v5680_v25 = vadd.f32 %v910_v56, %v620_v55  ;;  %v493_v35 = vpop.f32.mrf.mxu0  ;;  %v622_v2 = vpop.f32.mrf.mxu1 }
 0x1f5   :  { %7570 = vst [vmem:[#allocation64_spill] sm:$0xff] %v5678_v44 }
 0x1f6   :  { %7571 = vst [vmem:[#allocation65_spill] sm:$0xff] %v5680_v25 }
 0x1fa   :  { %v783_v5 = vpop.f32.mrf.mxu2  ;;  %v912_v30 = vpop.f32.mrf.mxu3 }
 0x1fb   :  { %v5682_v23 = vadd.f32 %v783_v5, %v493_v35  ;;  %v5684_v24 = vadd.f32 %v912_v30, %v622_v2  ;;  %v496_v49 = vpop.f32.mrf.mxu0  ;;  %v625_v22 = vpop.f32.mrf.mxu1 }
 0x1fd   :  { %7572 = vst [vmem:[#allocation66_spill] sm:$0xff] %v5682_v23  ;;  %4030 = vmatmul.msk.bf16.gmra.mxu1 %vm292_vm1, %v5144_v41 }
 0x1fe   :  { %7573 = vst [vmem:[#allocation67_spill] sm:$0xff] %v5684_v24  ;;  %4006 = vmatmul.msk.bf16.gmra.mxu0 %vm292_vm1, %v5144_v41 }
 0x1ff   :  { %4074 = vmatmul.msk.bf16.gmra.mxu2 %vm292_vm1, %v5164_v59  ;;  %4098 = vmatmul.msk.bf16.gmra.mxu3 %vm292_vm1, %v5164_v59 }
 0x202   :  { %v786_v55 = vpop.f32.mrf.mxu2  ;;  %v915_v63 = vpop.f32.mrf.mxu3 }
 0x203   :  { %v5694_v53 = vadd.f32 %v786_v55, %v496_v49  ;;  %v5696_v56 = vadd.f32 %v915_v63, %v625_v22  ;;  %v498_v35 = vpop.f32.mrf.mxu0  ;;  %v627_v2 = vpop.f32.mrf.mxu1 }
 0x205   :  { %7574 = vst [vmem:[#allocation68_spill] sm:$0xff] %v5696_v56 }
 0x20a   :  { %v788_v5 = vpop.f32.mrf.mxu2  ;;  %v917_v30 = vpop.f32.mrf.mxu3 }
 0x20b   :  { %v5698_v24 = vadd.f32 %v788_v5, %v498_v35  ;;  %v5700_v23 = vadd.f32 %v917_v30, %v627_v2  ;;  %v966_v25 = vpop.f32.mrf.mxu0  ;;  %v1095_v44 = vpop.f32.mrf.mxu1 }
 0x20c   :  { %v1215_v41 = vadd.f32 %v966_v25, %v5160_v50  ;;  %v1216_v34 = vadd.f32 %v1095_v44, %v5162_v51 }
 0x20d   :  { %7575 = vst [vmem:[#allocation69_spill] sm:$0xff] %v5698_v24  ;;  %4031 = vmatmul.msk.bf16.gmra.mxu1 %vm292_vm1, %v5164_v59 }
 0x20e   :  { %7576 = vst [vmem:[#allocation70_spill] sm:$0xff] %v5700_v23  ;;  %4007 = vmatmul.msk.bf16.gmra.mxu0 %vm292_vm1, %v5164_v59 }
 0x20f   :  { %4075 = vmatmul.msk.bf16.gmra.mxu2 %vm292_vm1, %v5188_v17  ;;  %4099 = vmatmul.msk.bf16.gmra.mxu3 %vm292_vm1, %v5188_v17 }
 0x212   :  { %v1357_v22 = vpop.f32.mrf.mxu2  ;;  %v1486_v49 = vpop.f32.mrf.mxu3 }
 0x213   :  { %v5712_v55 = vadd.f32 %v1357_v22, %v1215_v41  ;;  %v5714_v63 = vadd.f32 %v1486_v49, %v1216_v34  ;;  %v968_v50 = vpop.f32.mrf.mxu0  ;;  %v1097_v51 = vpop.f32.mrf.mxu1 }
 0x214   :  { %v1217_v44 = vadd.f32 %v968_v50, %v5166_v60  ;;  %v1218_v25 = vadd.f32 %v1097_v51, %v5168_v61 }
 0x21a   :  { %v1359_v35 = vpop.f32.mrf.mxu2  ;;  %v1488_v2 = vpop.f32.mrf.mxu3 }
 0x21b   :  { %v5718_v5 = vadd.f32 %v1359_v35, %v1217_v44  ;;  %v5720_v30 = vadd.f32 %v1488_v2, %v1218_v25  ;;  %v971_v23 = vpop.f32.mrf.mxu0  ;;  %v1100_v24 = vpop.f32.mrf.mxu1 }
 0x21c   :  { %v1219_v56 = vadd.f32 %v971_v23, %v5184_v8  ;;  %v1220_v41 = vadd.f32 %v1100_v24, %v5186_v9 }
 0x21d   :  { %4032 = vmatmul.msk.bf16.gmra.mxu1 %vm292_vm1, %v5188_v17 }
 0x21e   :  { %4008 = vmatmul.msk.bf16.gmra.mxu0 %vm292_vm1, %v5188_v17 }
 0x21f   :  { %4076 = vmatmul.msk.bf16.gmra.mxu2 %vm292_vm1, %v5224_v46  ;;  %4100 = vmatmul.msk.bf16.gmra.mxu3 %vm292_vm1, %v5224_v46 }
 0x222   :  { %v1362_v34 = vpop.f32.mrf.mxu2  ;;  %v1491_v60 = vpop.f32.mrf.mxu3 }
 0x223   :  { %v5732_v61 = vadd.f32 %v1362_v34, %v1219_v56  ;;  %v5734_v22 = vadd.f32 %v1491_v60, %v1220_v41  ;;  %v973_v8 = vpop.f32.mrf.mxu0  ;;  %v1102_v9 = vpop.f32.mrf.mxu1  ;;  %v4123_v41 = vld [vmem:[%s7477_s1 + $0x88] sm:$0xf0] }
 0x224   :  { %v1221_v23 = vadd.f32 %v973_v8, %v5190_v18  ;;  %v1222_v24 = vadd.f32 %v1102_v9, %v5192_v19  ;;  %v4121_v18 = vld [vmem:[%s7477_s1 + $0x80] sm:$0xf]  ;;  %v4773_v19 = vld [vmem:[%s7477_s1 + $0x84] sm:$0xf0] }
 0x22a   :  { %v1364_v49 = vpop.f32.mrf.mxu2  ;;  %v1493_v50 = vpop.f32.mrf.mxu3 }
 0x22b   :  { %v5738_v51 = vadd.f32 %v1364_v49, %v1221_v23  ;;  %v5740_v44 = vadd.f32 %v1493_v50, %v1222_v24  ;;  %v976_v25 = vpop.f32.mrf.mxu0  ;;  %v1105_v35 = vpop.f32.mrf.mxu1 }
 0x22c   :  { %v1223_v2 = vadd.f32 %v976_v25, %v5220_v37  ;;  %v1224_v56 = vadd.f32 %v1105_v35, %v5222_v38  ;;  %v4772_v37 = vld [vmem:[%s7477_s1 + $0x84] sm:$0xf]  ;;  %v4122_v38 = vor.u32 %v4773_v19, %v4121_v18 }
 0x22d   :  { %7577 = vst [vmem:[#allocation71_spill] sm:$0xff] %v5740_v44  ;;  %4033 = vmatmul.msk.bf16.gmra.mxu1 %vm292_vm1, %v5224_v46  ;;  %v4126_v34 = vor.u32 %v4772_v37, %v4123_v41 }
 0x22e   :  { %4009 = vmatmul.msk.bf16.gmra.mxu0 %vm292_vm1, %v5224_v46 }
 0x22f   :  { %4077 = vmatmul.msk.bf16.gmra.mxu2 %vm292_vm1, %v5248_v11  ;;  %4101 = vmatmul.msk.bf16.gmra.mxu3 %vm292_vm1, %v5248_v11 }
 0x230   :  { %1746 = vmatpush.bf16.msra.mxu0 %v4122_v38  ;;  %1875 = vmatpush.bf16.msra.mxu1 %v4126_v34 }
 0x232   :  { %v1367_v60 = vpop.f32.mrf.mxu2  ;;  %v1496_v8 = vpop.f32.mrf.mxu3 }
 0x233   :  { %v5764_v9 = vadd.f32 %v1367_v60, %v1223_v2  ;;  %v5766_v23 = vadd.f32 %v1496_v8, %v1224_v56  ;;  %v978_v24 = vpop.f32.mrf.mxu0  ;;  %v1107_v49 = vpop.f32.mrf.mxu1 }
 0x234   :  { %v1225_v50 = vadd.f32 %v978_v24, %v5226_v47  ;;  %v1226_v25 = vadd.f32 %v1107_v49, %v5228_v48 }
 0x23a   :  { %v1369_v35 = vpop.f32.mrf.mxu2  ;;  %v1498_v18 = vpop.f32.mrf.mxu3 }
 0x23b   :  { %v5770_v19 = vadd.f32 %v1369_v35, %v1225_v50  ;;  %v5772_v44 = vadd.f32 %v1498_v18, %v1226_v25  ;;  %v981_v37 = vpop.f32.mrf.mxu0  ;;  %v1110_v41 = vpop.f32.mrf.mxu1 }
 0x23c   :  { %v1227_v2 = vadd.f32 %v981_v37, %v5244_v0  ;;  %v1228_v56 = vadd.f32 %v1110_v41, %v5246_v1 }
 0x23d   :  { %4034 = vmatmul.msk.bf16.gmra.mxu1 %vm292_vm1, %v5248_v11 }
 0x23e   :  { %4010 = vmatmul.msk.bf16.gmra.mxu0 %vm292_vm1, %v5248_v11 }
 0x23f   :  { %4078 = vmatmul.msk.bf16.gmra.mxu2 %vm292_vm1, %v5272_v39  ;;  %4102 = vmatmul.msk.bf16.gmra.mxu3 %vm292_vm1, %v5272_v39 }
 0x242   :  { %v1372_v47 = vpop.f32.mrf.mxu2  ;;  %v1501_v48 = vpop.f32.mrf.mxu3 }
 0x243   :  { %v5784_v38 = vadd.f32 %v1372_v47, %v1227_v2  ;;  %v5786_v34 = vadd.f32 %v1501_v48, %v1228_v56  ;;  %v983_v0 = vpop.f32.mrf.mxu0  ;;  %v1112_v1 = vpop.f32.mrf.mxu1 }
 0x244   :  { %v1229_v60 = vadd.f32 %v983_v0, %v5250_v12  ;;  %v1230_v8 = vadd.f32 %v1112_v1, %v5252_v14 }
 0x24a   :  { %v1374_v24 = vpop.f32.mrf.mxu2  ;;  %v1503_v49 = vpop.f32.mrf.mxu3 }
 0x24b   :  { %v5790_v50 = vadd.f32 %v1374_v24, %v1229_v60  ;;  %v5792_v25 = vadd.f32 %v1503_v49, %v1230_v8  ;;  %v986_v35 = vpop.f32.mrf.mxu0  ;;  %v1115_v18 = vpop.f32.mrf.mxu1 }
 0x24c   :  { %v1231_v37 = vadd.f32 %v986_v35, %v5268_v28  ;;  %v1232_v41 = vadd.f32 %v1115_v18, %v5270_v29 }
 0x24d   :  { %4035 = vmatmul.msk.bf16.gmra.mxu1 %vm292_vm1, %v5272_v39 }
 0x24e   :  { %4011 = vmatmul.msk.bf16.gmra.mxu0 %vm292_vm1, %v5272_v39 }
 0x24f   :  { %4079 = vmatmul.msk.bf16.gmra.mxu2 %vm292_vm1, %v5296_v10  ;;  %4103 = vmatmul.msk.bf16.gmra.mxu3 %vm292_vm1, %v5296_v10 }
 0x252   :  { %v1377_v12 = vpop.f32.mrf.mxu2  ;;  %v1506_v14 = vpop.f32.mrf.mxu3 }
 0x253   :  { %v5804_v2 = vadd.f32 %v1377_v12, %v1231_v37  ;;  %v5806_v56 = vadd.f32 %v1506_v14, %v1232_v41  ;;  %v988_v28 = vpop.f32.mrf.mxu0  ;;  %v1117_v29 = vpop.f32.mrf.mxu1 }
 0x254   :  { %v1233_v47 = vadd.f32 %v988_v28, %v5274_v40  ;;  %v1234_v48 = vadd.f32 %v1117_v29, %v5276_v42 }
 0x25a   :  { %v1379_v0 = vpop.f32.mrf.mxu2  ;;  %v1508_v1 = vpop.f32.mrf.mxu3 }
 0x25b   :  { %v5810_v60 = vadd.f32 %v1379_v0, %v1233_v47  ;;  %v5812_v8 = vadd.f32 %v1508_v1, %v1234_v48  ;;  %v991_v24 = vpop.f32.mrf.mxu0  ;;  %v1120_v49 = vpop.f32.mrf.mxu1 }
 0x25c   :  { %v1235_v35 = vadd.f32 %v991_v24, %v5292_v57  ;;  %v1236_v18 = vadd.f32 %v1120_v49, %v5294_v58 }
 0x25d   :  { %7578 = vst [vmem:[#allocation72_spill] sm:$0xff] %v5812_v8  ;;  %4036 = vmatmul.msk.bf16.gmra.mxu1 %vm292_vm1, %v5296_v10 }
 0x25e   :  { %4012 = vmatmul.msk.bf16.gmra.mxu0 %vm292_vm1, %v5296_v10 }
 0x25f   :  { %4080 = vmatmul.msk.bf16.gmra.mxu2 %vm292_vm1, %v5320_v52  ;;  %4104 = vmatmul.msk.bf16.gmra.mxu3 %vm292_vm1, %v5320_v52 }
 0x262   :  { %v1382_v40 = vpop.f32.mrf.mxu2  ;;  %v1511_v42 = vpop.f32.mrf.mxu3 }
 0x263   :  { %v5824_v37 = vadd.f32 %v1382_v40, %v1235_v35  ;;  %v5826_v41 = vadd.f32 %v1511_v42, %v1236_v18  ;;  %v993_v57 = vpop.f32.mrf.mxu0  ;;  %v1122_v58 = vpop.f32.mrf.mxu1  ;;  %v7583_v40 = vld [vmem:[#allocation4_spill] sm:$0xff] }
 0x264   :  { %v1237_v12 = vadd.f32 %v993_v57, %v5298_v15  ;;  %v1238_v14 = vadd.f32 %v1122_v58, %v5300_v16  ;;  %v7584_v57 = vld [vmem:[#allocation5_spill] sm:$0xff] }
 0x26a   :  { %v1384_v28 = vpop.f32.mrf.mxu2  ;;  %v1513_v29 = vpop.f32.mrf.mxu3 }
 0x26b   :  { %v5830_v47 = vadd.f32 %v1384_v28, %v1237_v12  ;;  %v5832_v48 = vadd.f32 %v1513_v29, %v1238_v14  ;;  %v996_v0 = vpop.f32.mrf.mxu0  ;;  %v1125_v1 = vpop.f32.mrf.mxu1 }
 0x26c   :  { %v1239_v24 = vadd.f32 %v996_v0, %v5316_v32  ;;  %v1240_v49 = vadd.f32 %v1125_v1, %v5318_v33 }
 0x26d   :  { %7579 = vst [vmem:[#allocation73_spill] sm:$0xff] %v5830_v47  ;;  %4037 = vmatmul.msk.bf16.gmra.mxu1 %vm292_vm1, %v5320_v52 }
 0x26e   :  { %7580 = vst [vmem:[#allocation74_spill] sm:$0xff] %v5832_v48  ;;  %4013 = vmatmul.msk.bf16.gmra.mxu0 %vm292_vm1, %v5320_v52  ;;  %v7587_v48 = vld [vmem:[#allocation6_spill] sm:$0xff] }
 0x26f   :  { %4081 = vmatmul.msk.bf16.gmra.mxu2 %vm292_vm1, %v5344_v36  ;;  %4105 = vmatmul.msk.bf16.gmra.mxu3 %vm292_vm1, %v5344_v36 }
 0x272   :  { %v1387_v15 = vpop.f32.mrf.mxu2  ;;  %v1516_v16 = vpop.f32.mrf.mxu3 }
 0x273   :  { %v5844_v35 = vadd.f32 %v1387_v15, %v1239_v24  ;;  %v5846_v18 = vadd.f32 %v1516_v16, %v1240_v49  ;;  %v998_v32 = vpop.f32.mrf.mxu0  ;;  %v1127_v33 = vpop.f32.mrf.mxu1  ;;  %v7588_v24 = vld [vmem:[#allocation7_spill] sm:$0xff]  ;;  %v7589_v49 = vld [vmem:[#allocation12_spill] sm:$0xff] }
 0x274   :  { %v1241_v42 = vadd.f32 %v998_v32, %v7583_v40  ;;  %v1242_v58 = vadd.f32 %v1127_v33, %v7584_v57  ;;  %v7592_v57 = vld [vmem:[#allocation8_spill] sm:$0xff] }
 0x275   :  { %7581 = vst [vmem:[#allocation75_spill] sm:$0xff] %v5844_v35  ;;  %v7596_v35 = vld [vmem:[#allocation10_spill] sm:$0xff] }
 0x276   :  { %7582 = vst [vmem:[#allocation76_spill] sm:$0xff] %v5846_v18 }
 0x27a   :  { %v1389_v12 = vpop.f32.mrf.mxu2  ;;  %v1518_v14 = vpop.f32.mrf.mxu3 }
 0x27b   :  { %v5850_v28 = vadd.f32 %v1389_v12, %v1241_v42  ;;  %v5852_v29 = vadd.f32 %v1518_v14, %v1242_v58  ;;  %v1001_v0 = vpop.f32.mrf.mxu0  ;;  %v1130_v1 = vpop.f32.mrf.mxu1  ;;  %v7593_v12 = vld [vmem:[#allocation9_spill] sm:$0xff] }
 0x27c   :  { %v1243_v47 = vadd.f32 %v1001_v0, %v7587_v48  ;;  %v1244_v15 = vadd.f32 %v1130_v1, %v7588_v24 }
 0x27d   :  { %7585 = vst [vmem:[#allocation4_spill] sm:$0xff] %v5850_v28  ;;  %4038 = vmatmul.msk.bf16.gmra.mxu1 %vm292_vm1, %v5344_v36 }
 0x27e   :  { %7586 = vst [vmem:[#allocation5_spill] sm:$0xff] %v5852_v29  ;;  %4014 = vmatmul.msk.bf16.gmra.mxu0 %vm292_vm1, %v5344_v36 }
 0x27f   :  { %4082 = vmatmul.msk.bf16.gmra.mxu2 %vm292_vm1, %v7589_v49  ;;  %4106 = vmatmul.msk.bf16.gmra.mxu3 %vm292_vm1, %v7589_v49 }
 0x282   :  { %v1392_v16 = vpop.f32.mrf.mxu2  ;;  %v1521_v32 = vpop.f32.mrf.mxu3 }
 0x283   :  { %v5864_v33 = vadd.f32 %v1392_v16, %v1243_v47  ;;  %v5866_v40 = vadd.f32 %v1521_v32, %v1244_v15  ;;  %v1003_v48 = vpop.f32.mrf.mxu0  ;;  %v1132_v42 = vpop.f32.mrf.mxu1  ;;  %v7597_v47 = vld [vmem:[#allocation11_spill] sm:$0xff]  ;;  %v7598_v15 = vld [vmem:[#allocation17_spill] sm:$0xff] }
 0x284   :  { %v1245_v58 = vadd.f32 %v1003_v48, %v7592_v57  ;;  %v1246_v14 = vadd.f32 %v1132_v42, %v7593_v12  ;;  %v7602_v12 = vld [vmem:[#allocation14_spill] sm:$0xff] }
 0x285   :  { %7590 = vst [vmem:[#allocation6_spill] sm:$0xff] %v5864_v33  ;;  %v7605_v33 = vld [vmem:[#allocation15_spill] sm:$0xff] }
 0x286   :  { %7591 = vst [vmem:[#allocation7_spill] sm:$0xff] %v5866_v40 }
 0x28a   :  { %v1394_v0 = vpop.f32.mrf.mxu2  ;;  %v1523_v1 = vpop.f32.mrf.mxu3 }
 0x28b   :  { %v5870_v24 = vadd.f32 %v1394_v0, %v1245_v58  ;;  %v5872_v29 = vadd.f32 %v1523_v1, %v1246_v14  ;;  %v1006_v28 = vpop.f32.mrf.mxu0  ;;  %v1135_v18 = vpop.f32.mrf.mxu1 }
 0x28c   :  { %v1247_v8 = vadd.f32 %v1006_v28, %v7596_v35  ;;  %v1248_v16 = vadd.f32 %v1135_v18, %v7597_v47  ;;  %v7601_v28 = vld [vmem:[#allocation13_spill] sm:$0xff] }
 0x28d   :  { %7594 = vst [vmem:[#allocation8_spill] sm:$0xff] %v5870_v24  ;;  %4039 = vmatmul.msk.bf16.gmra.mxu1 %vm292_vm1, %v7589_v49 }
 0x28e   :  { %7595 = vst [vmem:[#allocation9_spill] sm:$0xff] %v5872_v29  ;;  %4015 = vmatmul.msk.bf16.gmra.mxu0 %vm292_vm1, %v7589_v49 }
 0x28f   :  { %4083 = vmatmul.msk.bf16.gmra.mxu2 %vm292_vm1, %v7598_v15  ;;  %4107 = vmatmul.msk.bf16.gmra.mxu3 %vm292_vm1, %v7598_v15 }
 0x292   :  { %v1397_v32 = vpop.f32.mrf.mxu2  ;;  %v1526_v48 = vpop.f32.mrf.mxu3 }
 0x293   :  { %v5884_v42 = vadd.f32 %v1397_v32, %v1247_v8  ;;  %v5886_v57 = vadd.f32 %v1526_v48, %v1248_v16  ;;  %v1008_v35 = vpop.f32.mrf.mxu0  ;;  %v1137_v18 = vpop.f32.mrf.mxu1  ;;  %v7606_v8 = vld [vmem:[#allocation16_spill] sm:$0xff]  ;;  %v7607_v16 = vld [vmem:[#allocation22_spill] sm:$0xff] }
 0x294   :  { %v1249_v58 = vadd.f32 %v1008_v35, %v7601_v28  ;;  %v1250_v14 = vadd.f32 %v1137_v18, %v7602_v12  ;;  %v7611_v12 = vld [vmem:[#allocation19_spill] sm:$0xff] }
 0x295   :  { %7599 = vst [vmem:[#allocation10_spill] sm:$0xff] %v5884_v42 }
 0x296   :  { %7600 = vst [vmem:[#allocation11_spill] sm:$0xff] %v5886_v57 }
 0x29a   :  { %v1399_v0 = vpop.f32.mrf.mxu2  ;;  %v1528_v1 = vpop.f32.mrf.mxu3 }
 0x29b   :  { %v5890_v47 = vadd.f32 %v1399_v0, %v1249_v58  ;;  %v5892_v29 = vadd.f32 %v1528_v1, %v1250_v14  ;;  %v1011_v24 = vpop.f32.mrf.mxu0  ;;  %v1140_v40 = vpop.f32.mrf.mxu1  ;;  %v4257_v0 = vld [vmem:[%s7479_s3 + $0xf0] sm:$0xf]  ;;  %v4807_v1 = vld [vmem:[%s7479_s3 + $0xf4] sm:$0xf0] }
 0x29c   :  { %v1251_v49 = vadd.f32 %v1011_v24, %v7605_v33  ;;  %v1252_v32 = vadd.f32 %v1140_v40, %v7606_v8  ;;  %v7610_v24 = vld [vmem:[#allocation18_spill] sm:$0xff]  ;;  %v4258_v8 = vor.u32 %v4807_v1, %v4257_v0  ;;  %v7616_v0 = vld [vmem:[#allocation27_spill] sm:$0xff] }
 0x29d   :  { %7603 = vst [vmem:[#allocation13_spill] sm:$0xff] %v5890_v47  ;;  %4040 = vmatmul.msk.bf16.gmra.mxu1 %vm292_vm1, %v7598_v15  ;;  %v7614_v47 = vld [vmem:[#allocation20_spill] sm:$0xff] }
 0x29e   :  { %7604 = vst [vmem:[#allocation14_spill] sm:$0xff] %v5892_v29  ;;  %4016 = vmatmul.msk.bf16.gmra.mxu0 %vm292_vm1, %v7598_v15  ;;  %2402 = vmatpush.bf16.msra.mxu2 %v4258_v8 }
 0x29f   :  { %4084 = vmatmul.msk.bf16.gmra.mxu2 %vm292_vm1, %v7607_v16  ;;  %4108 = vmatmul.msk.bf16.gmra.mxu3 %vm292_vm1, %v7607_v16 }
 0x2a2   :  { %v1402_v48 = vpop.f32.mrf.mxu2  ;;  %v1531_v35 = vpop.f32.mrf.mxu3 }
 0x2a3   :  { %v5904_v18 = vadd.f32 %v1402_v48, %v1251_v49  ;;  %v5906_v28 = vadd.f32 %v1531_v35, %v1252_v32  ;;  %v1013_v33 = vpop.f32.mrf.mxu0  ;;  %v1142_v40 = vpop.f32.mrf.mxu1  ;;  %v4806_v49 = vld [vmem:[%s7479_s3 + $0xf4] sm:$0xf]  ;;  %v4259_v32 = vld [vmem:[%s7479_s3 + $0xf8] sm:$0xf0] }
 0x2a4   :  { %v1253_v58 = vadd.f32 %v1013_v33, %v7610_v24  ;;  %v1254_v14 = vadd.f32 %v1142_v40, %v7611_v12  ;;  %v4262_v48 = vor.u32 %v4806_v49, %v4259_v32  ;;  %v7620_v32 = vld [vmem:[#allocation24_spill] sm:$0xff] }
 0x2a5   :  { %7608 = vst [vmem:[#allocation15_spill] sm:$0xff] %v5904_v18  ;;  %v7615_v18 = vld [vmem:[#allocation21_spill] sm:$0xff] }
 0x2a6   :  { %7609 = vst [vmem:[#allocation16_spill] sm:$0xff] %v5906_v28  ;;  %2451 = vmatpush.bf16.msra.mxu3 %v4262_v48 }
 0x2aa   :  { %v1404_v35 = vpop.f32.mrf.mxu2  ;;  %v1533_v33 = vpop.f32.mrf.mxu3 }
 0x2ab   :  { %v5922_v40 = vadd.f32 %v1404_v35, %v1253_v58  ;;  %v5924_v24 = vadd.f32 %v1533_v33, %v1254_v14  ;;  %v1016_v12 = vpop.f32.mrf.mxu0  ;;  %v1145_v29 = vpop.f32.mrf.mxu1 }
 0x2ac   :  { %v1255_v28 = vadd.f32 %v1016_v12, %v7614_v47  ;;  %v1256_v57 = vadd.f32 %v1145_v29, %v7615_v18  ;;  %v7619_v18 = vld [vmem:[#allocation23_spill] sm:$0xff] }
 0x2ad   :  { %7612 = vst [vmem:[#allocation18_spill] sm:$0xff] %v5922_v40  ;;  %4041 = vmatmul.msk.bf16.gmra.mxu1 %vm292_vm1, %v7607_v16 }
 0x2ae   :  { %7613 = vst [vmem:[#allocation19_spill] sm:$0xff] %v5924_v24  ;;  %4017 = vmatmul.msk.bf16.gmra.mxu0 %vm292_vm1, %v7607_v16  ;;  %v7623_v16 = vld [vmem:[#allocation25_spill] sm:$0xff] }
 0x2af   :  { %4085 = vmatmul.msk.bf16.gmra.mxu2 %vm292_vm1, %v7616_v0  ;;  %4109 = vmatmul.msk.bf16.gmra.mxu3 %vm292_vm1, %v7616_v0 }
 0x2b2   :  { %v1407_v58 = vpop.f32.mrf.mxu2  ;;  %v1536_v14 = vpop.f32.mrf.mxu3 }
 0x2b3   :  { %v5936_v1 = vadd.f32 %v1407_v58, %v1255_v28  ;;  %v5938_v49 = vadd.f32 %v1536_v14, %v1256_v57  ;;  %v1018_v47 = vpop.f32.mrf.mxu0  ;;  %v1147_v29 = vpop.f32.mrf.mxu1  ;;  %v7624_v28 = vld [vmem:[#allocation26_spill] sm:$0xff]  ;;  %v7625_v57 = vld [vmem:[#allocation32_spill] sm:$0xff] }
 0x2b4   :  { %v1257_v8 = vadd.f32 %v1018_v47, %v7619_v18  ;;  %v1258_v48 = vadd.f32 %v1147_v29, %v7620_v32  ;;  %v7628_v32 = vld [vmem:[#allocation29_spill] sm:$0xff] }
 0x2b5   :  { %7617 = vst [vmem:[#allocation20_spill] sm:$0xff] %v5936_v1  ;;  %v7631_v1 = vld [vmem:[#allocation30_spill] sm:$0xff] }
 0x2b6   :  { %7618 = vst [vmem:[#allocation21_spill] sm:$0xff] %v5938_v49 }
 0x2ba   :  { %v1409_v35 = vpop.f32.mrf.mxu2  ;;  %v1538_v33 = vpop.f32.mrf.mxu3 }
 0x2bb   :  { %v5942_v12 = vadd.f32 %v1409_v35, %v1257_v8  ;;  %v5944_v24 = vadd.f32 %v1538_v33, %v1258_v48  ;;  %v1021_v40 = vpop.f32.mrf.mxu0  ;;  %v1150_v42 = vpop.f32.mrf.mxu1 }
 0x2bc   :  { %v1259_v15 = vadd.f32 %v1021_v40, %v7623_v16  ;;  %v1260_v58 = vadd.f32 %v1150_v42, %v7624_v28  ;;  %v7627_v40 = vld [vmem:[#allocation28_spill] sm:$0xff] }
 0x2bd   :  { %7621 = vst [vmem:[#allocation23_spill] sm:$0xff] %v5942_v12  ;;  %4042 = vmatmul.msk.bf16.gmra.mxu1 %vm292_vm1, %v7616_v0 }
 0x2be   :  { %7622 = vst [vmem:[#allocation24_spill] sm:$0xff] %v5944_v24  ;;  %4018 = vmatmul.msk.bf16.gmra.mxu0 %vm292_vm1, %v7616_v0 }
 0x2bf   :  { %4086 = vmatmul.msk.bf16.gmra.mxu2 %vm292_vm1, %v7625_v57  ;;  %4110 = vmatmul.msk.bf16.gmra.mxu3 %vm292_vm1, %v7625_v57 }
 0x2c2   :  { %v1412_v14 = vpop.f32.mrf.mxu2  ;;  %v1541_v47 = vpop.f32.mrf.mxu3 }
 0x2c3   :  { %v5956_v29 = vadd.f32 %v1412_v14, %v1259_v15  ;;  %v5958_v18 = vadd.f32 %v1541_v47, %v1260_v58  ;;  %v1023_v16 = vpop.f32.mrf.mxu0  ;;  %v1152_v42 = vpop.f32.mrf.mxu1  ;;  %v7632_v15 = vld [vmem:[#allocation31_spill] sm:$0xff] }
 0x2c4   :  { %v1261_v8 = vadd.f32 %v1023_v16, %v7627_v40  ;;  %v1262_v48 = vadd.f32 %v1152_v42, %v7628_v32 }
 0x2c5   :  { %7626 = vst [vmem:[#allocation25_spill] sm:$0xff] %v5958_v18 }
 0x2ca   :  { %v1414_v35 = vpop.f32.mrf.mxu2  ;;  %v1543_v33 = vpop.f32.mrf.mxu3 }
 0x2cb   :  { %v5962_v28 = vadd.f32 %v1414_v35, %v1261_v8  ;;  %v5964_v24 = vadd.f32 %v1543_v33, %v1262_v48  ;;  %v1026_v12 = vpop.f32.mrf.mxu0  ;;  %v1155_v49 = vpop.f32.mrf.mxu1  ;;  %v7637_v8 = vld [vmem:[#allocation34_spill] sm:$0xff]  ;;  %v4805_v35 = vld [vmem:[%s7479_s3 + $0xe4] sm:$0xf0] }
 0x2cc   :  { %v1263_v0 = vadd.f32 %v1026_v12, %v7631_v1  ;;  %v1264_v14 = vadd.f32 %v1155_v49, %v7632_v15  ;;  %v7635_v12 = vld [vmem:[#allocation33_spill] sm:$0xff]  ;;  %v4249_v48 = vld [vmem:[%s7479_s3 + $0xe0] sm:$0xf]  ;;  %v4251_v15 = vld [vmem:[%s7479_s3 + $0xe8] sm:$0xf0] }
 0x2cd   :  { %7629 = vst [vmem:[#allocation26_spill] sm:$0xff] %v5962_v28  ;;  %4043 = vmatmul.msk.bf16.gmra.mxu1 %vm292_vm1, %v7625_v57  ;;  %v4250_v33 = vor.u32 %v4805_v35, %v4249_v48  ;;  %v83_v48 = vld [vmem:[%s7478_s0 + $0x190] sm:$0xff] }
 0x2ce   :  { %7630 = vst [vmem:[#allocation32_spill] sm:$0xff] %v5964_v24  ;;  %4019 = vmatmul.msk.bf16.gmra.mxu0 %vm292_vm1, %v7625_v57 }
 0x2cf   :  { %4087 = vmatmul.msk.bf16.gmra.mxu2 %vm292_vm1, %v5511_v26  ;;  %4111 = vmatmul.msk.bf16.gmra.mxu3 %vm292_vm1, %v5511_v26 }
 0x2d0   :  { %2403 = vmatpush.bf16.msra.mxu2 %v4250_v33 }
 0x2d2   :  { %v1417_v58 = vpop.f32.mrf.mxu2  ;;  %v1546_v47 = vpop.f32.mrf.mxu3 }
 0x2d3   :  { %v5976_v16 = vadd.f32 %v1417_v58, %v1263_v0  ;;  %v5978_v42 = vadd.f32 %v1546_v47, %v1264_v14  ;;  %v1028_v1 = vpop.f32.mrf.mxu0  ;;  %v1157_v49 = vpop.f32.mrf.mxu1  ;;  %v4804_v0 = vld [vmem:[%s7479_s3 + $0xe4] sm:$0xf] }
 0x2d4   :  { %v5981_v40 = vadd.f32 %v1028_v1, %v7635_v12  ;;  %v5984_v32 = vadd.f32 %v1157_v49, %v7637_v8  ;;  %v4254_v14 = vor.u32 %v4804_v0, %v4251_v15  ;;  %v7641_v12 = vld [vmem:[#allocation35_spill] sm:$0xff] }
 0x2d5   :  { %7633 = vst [vmem:[#allocation28_spill] sm:$0xff] %v5976_v16 }
 0x2d6   :  { %7634 = vst [vmem:[#allocation29_spill] sm:$0xff] %v5978_v42  ;;  %2452 = vmatpush.bf16.msra.mxu3 %v4254_v14  ;;  %v7644_v42 = vld [vmem:[#allocation39_spill] sm:$0xff] }
 0x2d7   :  { %7636 = vst [vmem:[#allocation30_spill] sm:$0xff] %v5981_v40 }
 0x2d8   :  { %7638 = vst [vmem:[#allocation31_spill] sm:$0xff] %v5984_v32  ;;  %v7642_v32 = vld [vmem:[#allocation36_spill] sm:$0xff] }
 0x2da   :  { %v5998_v58 = vpop.f32.mrf.mxu2  ;;  %v6000_v47 = vpop.f32.mrf.mxu3 }
 0x2db   :  { %7639 = vst [vmem:[#allocation33_spill] sm:$0xff] %v5998_v58  ;;  %v1031_v1 = vpop.f32.mrf.mxu0  ;;  %v1160_v49 = vpop.f32.mrf.mxu1 }
 0x2dc   :  { %7640 = vst [vmem:[#allocation34_spill] sm:$0xff] %v6000_v47  ;;  %v1267_v8 = vadd.f32 %v1031_v1, %v7641_v12  ;;  %v1268_v40 = vadd.f32 %v1160_v49, %v7642_v32  ;;  %v84_v32 = vld [vmem:[%s7478_s0 + $0x198] sm:$0xff]  ;;  %v139_v49 = vpack.c.bf16 %v83_v48, %v83_v48  ;;  %v7643_v47 = vld [vmem:[#allocation38_spill] sm:$0xff] }
 0x2dd   :  { %4044 = vmatmul.msk.bf16.gmra.mxu1 %vm292_vm1, %v5511_v26  ;;  %v140_v12 = vpack.c.bf16 %v84_v32, %v84_v32 }
 0x2de   :  { %4020 = vmatmul.msk.bf16.gmra.mxu0 %vm292_vm1, %v5511_v26  ;;  %v927_v24 = vunpack.c.l.b16 %v139_v49 }
 0x2df   :  { %4088 = vmatmul.msk.bf16.gmra.mxu2 %vm292_vm1, %v5552_v62  ;;  %4112 = vmatmul.msk.bf16.gmra.mxu3 %vm292_vm1, %v5552_v62  ;;  %v928_v28 = vunpack.c.l.b16 %v140_v12 }
 0x2e2   :  { %v1422_v35 = vpop.f32.mrf.mxu2  ;;  %v1551_v0 = vpop.f32.mrf.mxu3 }
 0x2e3   :  { %v6018_v33 = vadd.f32 %v1422_v35, %v1267_v8  ;;  %v6020_v15 = vadd.f32 %v1551_v0, %v1268_v40  ;;  %v1033_v14 = vpop.f32.mrf.mxu0  ;;  %v1162_v1 = vpop.f32.mrf.mxu1  ;;  %v6032_v40 = vpack.c.b16 %v928_v28, %v927_v24  ;;  %v85_v24 = vld [vmem:[%s7478_s0 + $0x1a0] sm:$0xff] }
 0x2e4   :  { %v6023_v58 = vadd.f32 %v1033_v14, %v7643_v47  ;;  %v6026_v16 = vadd.f32 %v1162_v1, %v7644_v42  ;;  %v141_v1 = vpack.c.bf16 %v85_v24, %v85_v24 }
 0x2e6   :  { %7645 = vst [vmem:[#allocation35_spill] sm:$0xff] %v6026_v16 }
 0x2ea   :  { %v6028_v26 = vpop.f32.mrf.mxu2  ;;  %v6030_v18 = vpop.f32.mrf.mxu3 }
 0x2eb   :  { %7646 = vst [vmem:[#allocation36_spill] sm:$0xff] %v6028_v26  ;;  %v1036_v8 = vpop.f32.mrf.mxu0  ;;  %v1165_v35 = vpop.f32.mrf.mxu1 }
 0x2ec   :  { %7647 = vst [vmem:[#allocation38_spill] sm:$0xff] %v6030_v18  ;;  %v1271_v0 = vadd.f32 %v1036_v8, %v5547_v21  ;;  %v1272_v48 = vadd.f32 %v1165_v35, %v5549_v43  ;;  %v86_v43 = vld [vmem:[%s7478_s0 + $0x1a8] sm:$0xff]  ;;  %v1318_v35 = vunpack.c.l.b16 %v141_v1 }
 0x2ed   :  { %4045 = vmatmul.msk.bf16.gmra.mxu1 %vm292_vm1, %v5552_v62  ;;  %v142_v49 = vpack.c.bf16 %v86_v43, %v86_v43 }
 0x2ee   :  { %4021 = vmatmul.msk.bf16.gmra.mxu0 %vm292_vm1, %v5552_v62 }
 0x2ef   :  { %4089 = vmatmul.msk.bf16.gmra.mxu2 %vm292_vm1, %v6032_v40  ;;  %4113 = vmatmul.msk.bf16.gmra.mxu3 %vm292_vm1, %v6032_v40  ;;  %v1319_v18 = vunpack.c.l.b16 %v142_v49  ;;  %v4241_v49 = vld [vmem:[%s7479_s3 + $0xd0] sm:$0xf] }
 0x2f2   :  { %v1427_v21 = vpop.f32.mrf.mxu2  ;;  %v1556_v28 = vpop.f32.mrf.mxu3 }
 0x2f3   :  { %v6050_v42 = vadd.f32 %v1427_v21, %v1271_v0  ;;  %v6052_v47 = vadd.f32 %v1556_v28, %v1272_v48  ;;  %v1038_v32 = vpop.f32.mrf.mxu0  ;;  %v1167_v14 = vpop.f32.mrf.mxu1  ;;  %v6064_v48 = vpack.c.b16 %v1319_v18, %v1318_v35  ;;  %v4803_v35 = vld [vmem:[%s7479_s3 + $0xd4] sm:$0xf0] }
 0x2f4   :  { %v6055_v12 = vadd.f32 %v1038_v32, %v5554_v45  ;;  %v6058_v8 = vadd.f32 %v1167_v14, %v5556_v54  ;;  %v7652_v14 = vld [vmem:[#allocation40_spill] sm:$0xff] }
 0x2f6   :  { %7648 = vst [vmem:[#allocation39_spill] sm:$0xff] %v6058_v8 }
 0x2fa   :  { %v6060_v16 = vpop.f32.mrf.mxu2  ;;  %v6062_v26 = vpop.f32.mrf.mxu3 }
 0x2fb   :  { %7649 = vst [vmem:[#allocation77_spill] sm:$0xff] %v6060_v16  ;;  %v1041_v0 = vpop.f32.mrf.mxu0  ;;  %v1170_v21 = vpop.f32.mrf.mxu1 }
 0x2fc   :  { %7650 = vst [vmem:[#allocation78_spill] sm:$0xff] %v6062_v26  ;;  %v1275_v28 = vadd.f32 %v1041_v0, %v5566_v7  ;;  %v1276_v24 = vadd.f32 %v1170_v21, %v5568_v4  ;;  %v4802_v0 = vld [vmem:[%s7479_s3 + $0xd4] sm:$0xf]  ;;  %v4242_v21 = vor.u32 %v4803_v35, %v4241_v49 }
 0x2fd   :  { %4046 = vmatmul.msk.bf16.gmra.mxu1 %vm292_vm1, %v6032_v40  ;;  %v7665_v26 = vld [vmem:[#allocation44_spill] sm:$0xff] }
 0x2fe   :  { %4022 = vmatmul.msk.bf16.gmra.mxu0 %vm292_vm1, %v6032_v40  ;;  %2404 = vmatpush.bf16.msra.mxu2 %v4242_v21 }
 0x2ff   :  { %4090 = vmatmul.msk.bf16.gmra.mxu2 %vm292_vm1, %v6064_v48  ;;  %4114 = vmatmul.msk.bf16.gmra.mxu3 %vm292_vm1, %v6064_v48 }
 0x302   :  { %v1432_v45 = vpop.f32.mrf.mxu2  ;;  %v1561_v54 = vpop.f32.mrf.mxu3 }
 0x303   :  { %v6076_v18 = vadd.f32 %v1432_v45, %v1275_v28  ;;  %v6078_v43 = vadd.f32 %v1561_v54, %v1276_v24  ;;  %v1043_v7 = vpop.f32.mrf.mxu0  ;;  %v1172_v4 = vpop.f32.mrf.mxu1 }
 0x304   :  { %v6081_v32 = vadd.f32 %v1043_v7, %v5570_v31  ;;  %v6084_v1 = vadd.f32 %v1172_v4, %v7652_v14  ;;  %v4243_v31 = vld [vmem:[%s7479_s3 + $0xd8] sm:$0xf0] }
 0x305   :  { %v4246_v28 = vor.u32 %v4802_v0, %v4243_v31  ;;  %v7656_v14 = vld [vmem:[#allocation41_spill] sm:$0xff] }
 0x306   :  { %7651 = vst [vmem:[#allocation79_spill] sm:$0xff] %v6081_v32 }
 0x307   :  { %7653 = vst [vmem:[#allocation40_spill] sm:$0xff] %v6084_v1  ;;  %2453 = vmatpush.bf16.msra.mxu3 %v4246_v28 }
 0x30a   :  { %v6098_v24 = vpop.f32.mrf.mxu2  ;;  %v6100_v45 = vpop.f32.mrf.mxu3 }
 0x30b   :  { %7654 = vst [vmem:[#allocation80_spill] sm:$0xff] %v6098_v24  ;;  %v1046_v54 = vpop.f32.mrf.mxu0  ;;  %v1175_v7 = vpop.f32.mrf.mxu1 }
 0x30c   :  { %7655 = vst [vmem:[#allocation81_spill] sm:$0xff] %v6100_v45  ;;  %v1279_v4 = vadd.f32 %v1046_v54, %v5582_v3  ;;  %v1280_v1 = vadd.f32 %v1175_v7, %v7656_v14  ;;  %v7659_v45 = vld [vmem:[#allocation42_spill] sm:$0xff]  ;;  %v7661_v3 = vld [vmem:[#allocation43_spill] sm:$0xff] }
 0x30d   :  { %4159 = vmatmul.msk.bf16.vlgmr.msra.gmra.mxu1 %vm292_vm1, %v5064_v6 }
 0x30e   :  { %4135 = vmatmul.msk.bf16.vlgmr.msra.gmra.mxu0 %vm292_vm1, %v5064_v6 }
 0x312   :  { %v1437_v49 = vpop.f32.mrf.mxu2  ;;  %v1566_v35 = vpop.f32.mrf.mxu3 }
 0x313   :  { %v6108_v0 = vadd.f32 %v1437_v49, %v1279_v4  ;;  %v6110_v21 = vadd.f32 %v1566_v35, %v1280_v1  ;;  %v1048_v31 = vpop.f32.mrf.mxu0  ;;  %v1177_v28 = vpop.f32.mrf.mxu1  ;;  %v7666_v4 = vld [vmem:[#allocation45_spill] sm:$0xff] }
 0x314   :  { %v6113_v24 = vadd.f32 %v1048_v31, %v7659_v45  ;;  %v6116_v54 = vadd.f32 %v1177_v28, %v7661_v3 }
 0x315   :  { %7657 = vst [vmem:[#allocation41_spill] sm:$0xff] %v6108_v0  ;;  %v7669_v0 = vld [vmem:[#allocation48_spill] sm:$0xff] }
 0x316   :  { %7658 = vst [vmem:[#allocation82_spill] sm:$0xff] %v6110_v21 }
 0x317   :  { %7660 = vst [vmem:[#allocation42_spill] sm:$0xff] %v6113_v24 }
 0x318   :  { %7662 = vst [vmem:[#allocation43_spill] sm:$0xff] %v6116_v54 }
 0x31a   :  { %v6118_v7 = vpop.f32.mrf.mxu2  ;;  %v6120_v14 = vpop.f32.mrf.mxu3 }
 0x31b   :  { %7663 = vst [vmem:[#allocation83_spill] sm:$0xff] %v6118_v7  ;;  %v1051_v32 = vpop.f32.mrf.mxu0  ;;  %v1180_v6 = vpop.f32.mrf.mxu1  ;;  %v7668_v7 = vld [vmem:[#allocation47_spill] sm:$0xff] }
 0x31c   :  { %7664 = vst [vmem:[#allocation84_spill] sm:$0xff] %v6120_v14  ;;  %v1283_v8 = vadd.f32 %v1051_v32, %v7665_v26  ;;  %v1284_v49 = vadd.f32 %v1180_v6, %v7666_v4  ;;  %v7667_v14 = vld [vmem:[#allocation46_spill] sm:$0xff] }
 0x31d   :  { %4160 = vmatmul.msk.bf16.gmra.mxu1 %vm292_vm1, %v5080_v13 }
 0x31e   :  { %4136 = vmatmul.msk.bf16.gmra.mxu0 %vm292_vm1, %v5080_v13 }
 0x322   :  { %v1442_v1 = vpop.f32.mrf.mxu2  ;;  %v1571_v45 = vpop.f32.mrf.mxu3 }
 0x323   :  { %v6128_v35 = vadd.f32 %v1442_v1, %v1283_v8  ;;  %v6130_v31 = vadd.f32 %v1571_v45, %v1284_v49  ;;  %v1053_v28 = vpop.f32.mrf.mxu0  ;;  %v1182_v3 = vpop.f32.mrf.mxu1  ;;  %v7670_v8 = vld [vmem:[#allocation49_spill] sm:$0xff] }
 0x324   :  { %v1285_v54 = vadd.f32 %v1053_v28, %v7667_v14  ;;  %v1286_v26 = vadd.f32 %v1182_v3, %v7668_v7  ;;  %v7673_v3 = vld [vmem:[#allocation50_spill] sm:$0xff] }
 0x32a   :  { %v1444_v32 = vpop.f32.mrf.mxu2  ;;  %v1573_v6 = vpop.f32.mrf.mxu3 }
 0x32b   :  { %v6134_v4 = vadd.f32 %v1444_v32, %v1285_v54  ;;  %v6136_v24 = vadd.f32 %v1573_v6, %v1286_v26  ;;  %v1056_v21 = vpop.f32.mrf.mxu0  ;;  %v1185_v13 = vpop.f32.mrf.mxu1  ;;  %v4233_v32 = vld [vmem:[%s7479_s3 + $0xc0] sm:$0xf] }
 0x32c   :  { %v1287_v16 = vadd.f32 %v1056_v21, %v7669_v0  ;;  %v1288_v1 = vadd.f32 %v1185_v13, %v7670_v8  ;;  %v7675_v0 = vld [vmem:[#allocation51_spill] sm:$0xff] }
 0x32d   :  { %4161 = vmatmul.msk.bf16.gmra.mxu1 %vm292_vm1, %v5096_v20  ;;  %v4235_v13 = vld [vmem:[%s7479_s3 + $0xc8] sm:$0xf0] }
 0x32e   :  { %4137 = vmatmul.msk.bf16.gmra.mxu0 %vm292_vm1, %v5096_v20  ;;  %v4801_v20 = vld [vmem:[%s7479_s3 + $0xc4] sm:$0xf0] }
 0x32f   :  { %v4234_v6 = vor.u32 %v4801_v20, %v4233_v32 }
 0x331   :  { %2405 = vmatpush.bf16.msra.mxu2 %v4234_v6 }
 0x332   :  { %v1447_v14 = vpop.f32.mrf.mxu2  ;;  %v1576_v7 = vpop.f32.mrf.mxu3 }
 0x333   :  { %v6144_v49 = vadd.f32 %v1447_v14, %v1287_v16  ;;  %v6146_v54 = vadd.f32 %v1576_v7, %v1288_v1  ;;  %v1058_v45 = vpop.f32.mrf.mxu0  ;;  %v1187_v28 = vpop.f32.mrf.mxu1  ;;  %v4800_v16 = vld [vmem:[%s7479_s3 + $0xc4] sm:$0xf] }
 0x334   :  { %v6149_v26 = vadd.f32 %v1058_v45, %v7673_v3  ;;  %v6152_v21 = vadd.f32 %v1187_v28, %v7675_v0  ;;  %v4238_v8 = vor.u32 %v4800_v16, %v4235_v13  ;;  %v7679_v28 = vld [vmem:[#allocation52_spill] sm:$0xff]  ;;  %v7680_v0 = vld [vmem:[#allocation53_spill] sm:$0xff] }
 0x335   :  { %7671 = vst [vmem:[#allocation44_spill] sm:$0xff] %v6144_v49 }
 0x336   :  { %7672 = vst [vmem:[#allocation45_spill] sm:$0xff] %v6146_v54  ;;  %2454 = vmatpush.bf16.msra.mxu3 %v4238_v8  ;;  %v7689_v54 = vld [vmem:[#allocation56_spill] sm:$0xff] }
 0x337   :  { %7674 = vst [vmem:[#allocation46_spill] sm:$0xff] %v6149_v26 }
 0x338   :  { %7676 = vst [vmem:[#allocation47_spill] sm:$0xff] %v6152_v21 }
 0x33a   :  { %v6166_v1 = vpop.f32.mrf.mxu2  ;;  %v6168_v14 = vpop.f32.mrf.mxu3 }
 0x33b   :  { %7677 = vst [vmem:[#allocation48_spill] sm:$0xff] %v6166_v1  ;;  %v1061_v7 = vpop.f32.mrf.mxu0  ;;  %v1190_v45 = vpop.f32.mrf.mxu1 }
 0x33c   :  { %7678 = vst [vmem:[#allocation49_spill] sm:$0xff] %v6168_v14  ;;  %v1291_v3 = vadd.f32 %v1061_v7, %v7679_v28  ;;  %v1292_v21 = vadd.f32 %v1190_v45, %v7680_v0  ;;  %v7683_v14 = vld [vmem:[#allocation54_spill] sm:$0xff]  ;;  %v7685_v7 = vld [vmem:[#allocation55_spill] sm:$0xff] }
 0x33d   :  { %4162 = vmatmul.msk.bf16.gmra.mxu1 %vm292_vm1, %v5112_v27 }
 0x33e   :  { %4138 = vmatmul.msk.bf16.gmra.mxu0 %vm292_vm1, %v5112_v27 }
 0x342   :  { %v1452_v32 = vpop.f32.mrf.mxu2  ;;  %v1581_v20 = vpop.f32.mrf.mxu3 }
 0x343   :  { %v6176_v16 = vadd.f32 %v1452_v32, %v1291_v3  ;;  %v6178_v6 = vadd.f32 %v1581_v20, %v1292_v21  ;;  %v1063_v13 = vpop.f32.mrf.mxu0  ;;  %v1192_v8 = vpop.f32.mrf.mxu1  ;;  %v7690_v3 = vld [vmem:[#allocation57_spill] sm:$0xff]  ;;  %v7691_v21 = vld [vmem:[#allocation2_spill] sm:$0xff] }
 0x344   :  { %v6181_v1 = vadd.f32 %v1063_v13, %v7683_v14  ;;  %v6184_v28 = vadd.f32 %v1192_v8, %v7685_v7 }
 0x345   :  { %7681 = vst [vmem:[#allocation50_spill] sm:$0xff] %v6176_v16 }
 0x346   :  { %7682 = vst [vmem:[#allocation51_spill] sm:$0xff] %v6178_v6  ;;  %v7698_v6 = vld [vmem:[#allocation60_spill] sm:$0xff] }
 0x347   :  { %7684 = vst [vmem:[#allocation52_spill] sm:$0xff] %v6181_v1 }
 0x348   :  { %7686 = vst [vmem:[#allocation53_spill] sm:$0xff] %v6184_v28  ;;  %v7692_v28 = vld [vmem:[#allocation58_spill] sm:$0xff] }
 0x34a   :  { %v6186_v45 = vpop.f32.mrf.mxu2  ;;  %v6188_v0 = vpop.f32.mrf.mxu3 }
 0x34b   :  { %7687 = vst [vmem:[#allocation54_spill] sm:$0xff] %v6186_v45  ;;  %v1066_v26 = vpop.f32.mrf.mxu0  ;;  %v1195_v27 = vpop.f32.mrf.mxu1 }
 0x34c   :  { %7688 = vst [vmem:[#allocation55_spill] sm:$0xff] %v6188_v0  ;;  %v1295_v49 = vadd.f32 %v1066_v26, %v7689_v54  ;;  %v1296_v32 = vadd.f32 %v1195_v27, %v7690_v3  ;;  %v7694_v54 = vld [vmem:[#allocation59_spill] sm:$0xff] }
 0x34d   :  { %4163 = vmatmul.msk.bf16.gmra.mxu1 %vm292_vm1, %v7691_v21 }
 0x34e   :  { %4139 = vmatmul.msk.bf16.gmra.mxu0 %vm292_vm1, %v7691_v21 }
 0x352   :  { %v1457_v14 = vpop.f32.mrf.mxu2  ;;  %v1586_v20 = vpop.f32.mrf.mxu3 }
 0x353   :  { %v6196_v13 = vadd.f32 %v1457_v14, %v1295_v49  ;;  %v6198_v8 = vadd.f32 %v1586_v20, %v1296_v32  ;;  %v1068_v7 = vpop.f32.mrf.mxu0  ;;  %v1197_v0 = vpop.f32.mrf.mxu1  ;;  %v7699_v49 = vld [vmem:[#allocation61_spill] sm:$0xff]  ;;  %v7700_v32 = vld [vmem:[#allocation3_spill] sm:$0xff] }
 0x354   :  { %v6201_v45 = vadd.f32 %v1068_v7, %v7692_v28  ;;  %v6204_v26 = vadd.f32 %v1197_v0, %v7694_v54 }
 0x356   :  { %7693 = vst [vmem:[#allocation56_spill] sm:$0xff] %v6201_v45 }
 0x357   :  { %7695 = vst [vmem:[#allocation57_spill] sm:$0xff] %v6204_v26  ;;  %v7703_v26 = vld [vmem:[#allocation62_spill] sm:$0xff] }
 0x35a   :  { %v6206_v27 = vpop.f32.mrf.mxu2  ;;  %v6208_v3 = vpop.f32.mrf.mxu3 }
 0x35b   :  { %7696 = vst [vmem:[#allocation2_spill] sm:$0xff] %v6206_v27  ;;  %v1071_v1 = vpop.f32.mrf.mxu0  ;;  %v1200_v21 = vpop.f32.mrf.mxu1 }
 0x35c   :  { %7697 = vst [vmem:[#allocation58_spill] sm:$0xff] %v6208_v3  ;;  %v1299_v16 = vadd.f32 %v1071_v1, %v7698_v6  ;;  %v1300_v14 = vadd.f32 %v1200_v21, %v7699_v49  ;;  %v7705_v1 = vld [vmem:[#allocation63_spill] sm:$0xff]  ;;  %v4225_v21 = vld [vmem:[%s7479_s3 + $0xb0] sm:$0xf]  ;;  %v4799_v49 = vld [vmem:[%s7479_s3 + $0xb4] sm:$0xf0] }
 0x35d   :  { %4164 = vmatmul.msk.bf16.gmra.mxu1 %vm292_vm1, %v7700_v32 }
 0x35e   :  { %4140 = vmatmul.msk.bf16.gmra.mxu0 %vm292_vm1, %v7700_v32 }
 0x362   :  { %v1462_v28 = vpop.f32.mrf.mxu2  ;;  %v1591_v20 = vpop.f32.mrf.mxu3 }
 0x363   :  { %v6216_v0 = vadd.f32 %v1462_v28, %v1299_v16  ;;  %v6218_v7 = vadd.f32 %v1591_v20, %v1300_v14  ;;  %v1073_v54 = vpop.f32.mrf.mxu0  ;;  %v1202_v3 = vpop.f32.mrf.mxu1  ;;  %v4798_v16 = vld [vmem:[%s7479_s3 + $0xb4] sm:$0xf]  ;;  %v4226_v14 = vor.u32 %v4799_v49, %v4225_v21 }
 0x364   :  { %v6221_v27 = vadd.f32 %v1073_v54, %v7703_v26  ;;  %v6224_v6 = vadd.f32 %v1202_v3, %v7705_v1  ;;  %v4227_v26 = vld [vmem:[%s7479_s3 + $0xb8] sm:$0xf0]  ;;  %v7709_v1 = vld [vmem:[#allocation64_spill] sm:$0xff] }
 0x365   :  { %7701 = vst [vmem:[#allocation59_spill] sm:$0xff] %v6216_v0  ;;  %v4230_v32 = vor.u32 %v4798_v16, %v4227_v26  ;;  %2406 = vmatpush.bf16.msra.mxu2 %v4226_v14 }
 0x366   :  { %7702 = vst [vmem:[#allocation60_spill] sm:$0xff] %v6218_v7 }
 0x367   :  { %7704 = vst [vmem:[#allocation61_spill] sm:$0xff] %v6221_v27  ;;  %2455 = vmatpush.bf16.msra.mxu3 %v4230_v32  ;;  %v7710_v27 = vld [vmem:[#allocation65_spill] sm:$0xff] }
 0x368   :  { %7706 = vst [vmem:[#allocation3_spill] sm:$0xff] %v6224_v6 }
 0x36a   :  { %v6238_v3 = vpop.f32.mrf.mxu2  ;;  %v6240_v28 = vpop.f32.mrf.mxu3 }
 0x36b   :  { %7707 = vst [vmem:[#allocation62_spill] sm:$0xff] %v6238_v3  ;;  %v1076_v20 = vpop.f32.mrf.mxu0  ;;  %v1205_v54 = vpop.f32.mrf.mxu1 }
 0x36c   :  { %7708 = vst [vmem:[#allocation63_spill] sm:$0xff] %v6240_v28  ;;  %v1303_v6 = vadd.f32 %v1076_v20, %v7709_v1  ;;  %v1304_v45 = vadd.f32 %v1205_v54, %v7710_v27  ;;  %v7711_v28 = vld [vmem:[#allocation66_spill] sm:$0xff]  ;;  %v7712_v20 = vld [vmem:[#allocation67_spill] sm:$0xff] }
 0x36d   :  { %4165 = vmatmul.msk.bf16.gmra.mxu1 %vm292_vm1, %v5164_v59 }
 0x36e   :  { %4141 = vmatmul.msk.bf16.gmra.mxu0 %vm292_vm1, %v5164_v59 }
 0x372   :  { %v1467_v21 = vpop.f32.mrf.mxu2  ;;  %v1596_v49 = vpop.f32.mrf.mxu3 }
 0x373   :  { %v6248_v16 = vadd.f32 %v1467_v21, %v1303_v6  ;;  %v6250_v14 = vadd.f32 %v1596_v49, %v1304_v45  ;;  %v1078_v26 = vpop.f32.mrf.mxu0  ;;  %v1207_v32 = vpop.f32.mrf.mxu1  ;;  %v7716_v6 = vld [vmem:[#allocation68_spill] sm:$0xff] }
 0x374   :  { %v6253_v3 = vadd.f32 %v1078_v26, %v7711_v28  ;;  %v6256_v1 = vadd.f32 %v1207_v32, %v7712_v20 }
 0x376   :  { %7713 = vst [vmem:[#allocation64_spill] sm:$0xff] %v6256_v1 }
 0x37a   :  { %v6258_v27 = vpop.f32.mrf.mxu2  ;;  %v6260_v54 = vpop.f32.mrf.mxu3 }
 0x37b   :  { %7714 = vst [vmem:[#allocation65_spill] sm:$0xff] %v6258_v27  ;;  %v1081_v7 = vpop.f32.mrf.mxu0  ;;  %v1210_v59 = vpop.f32.mrf.mxu1 }
 0x37c   :  { %7715 = vst [vmem:[#allocation66_spill] sm:$0xff] %v6260_v54  ;;  %v1307_v0 = vadd.f32 %v1081_v7, %v5694_v53  ;;  %v1308_v21 = vadd.f32 %v1210_v59, %v7716_v6  ;;  %v7717_v54 = vld [vmem:[#allocation69_spill] sm:$0xff]  ;;  %v7718_v53 = vld [vmem:[#allocation70_spill] sm:$0xff] }
 0x37d   :  { %4166 = vmatmul.msk.bf16.gmra.mxu1 %vm292_vm1, %v5188_v17 }
 0x37e   :  { %4142 = vmatmul.msk.bf16.gmra.mxu0 %vm292_vm1, %v5188_v17 }
 0x382   :  { %v1472_v45 = vpop.f32.mrf.mxu2  ;;  %v1601_v28 = vpop.f32.mrf.mxu3 }
 0x383   :  { %v6268_v49 = vadd.f32 %v1472_v45, %v1307_v0  ;;  %v6270_v26 = vadd.f32 %v1601_v28, %v1308_v21  ;;  %v1083_v32 = vpop.f32.mrf.mxu0  ;;  %v1212_v20 = vpop.f32.mrf.mxu1  ;;  %v4217_v28 = vld [vmem:[%s7479_s3 + $0xa0] sm:$0xf] }
 0x384   :  { %v6273_v1 = vadd.f32 %v1083_v32, %v7717_v54  ;;  %v6276_v7 = vadd.f32 %v1212_v20, %v7718_v53 }
 0x38b   :  { %v1748_v59 = vpop.f32.mrf.mxu0  ;;  %v1877_v6 = vpop.f32.mrf.mxu1 }
 0x38c   :  { %v1997_v27 = vadd.f32 %v1748_v59, %v5712_v55  ;;  %v1998_v17 = vadd.f32 %v1877_v6, %v5714_v63  ;;  %v4797_v55 = vld [vmem:[%s7479_s3 + $0xa4] sm:$0xf0]  ;;  %v4796_v63 = vld [vmem:[%s7479_s3 + $0xa4] sm:$0xf] }
 0x38d   :  { %4167 = vmatmul.msk.bf16.gmra.mxu1 %vm292_vm1, %v5224_v46  ;;  %v4218_v32 = vor.u32 %v4797_v55, %v4217_v28  ;;  %v6307_v28 = vld [vmem:[%s7480_s2] ss:$0 sm:$0xff] }
 0x38e   :  { %4143 = vmatmul.msk.bf16.gmra.mxu0 %vm292_vm1, %v5224_v46  ;;  %v4219_v46 = vld [vmem:[%s7479_s3 + $0xa8] sm:$0xf0] }
 0x38f   :  { %2407 = vmatpush.bf16.msra.mxu2 %v4218_v32 }
 0x393   :  { %v1750_v0 = vpop.f32.mrf.mxu0  ;;  %v1879_v21 = vpop.f32.mrf.mxu1 }
 0x394   :  { %v1999_v54 = vadd.f32 %v1750_v0, %v5718_v5  ;;  %v2000_v45 = vadd.f32 %v1879_v21, %v5720_v30  ;;  %v4222_v5 = vor.u32 %v4796_v63, %v4219_v46 }
 0x396   :  { %2456 = vmatpush.bf16.msra.mxu3 %v4222_v5 }
 0x39b   :  { %v1753_v30 = vpop.f32.mrf.mxu0  ;;  %v1882_v20 = vpop.f32.mrf.mxu1 }
 0x39c   :  { %v2001_v53 = vadd.f32 %v1753_v30, %v5732_v61  ;;  %v2002_v59 = vadd.f32 %v1882_v20, %v5734_v22 }
 0x39d   :  { %4168 = vmatmul.msk.bf16.gmra.mxu1 %vm292_vm1, %v5248_v11 }
 0x39e   :  { %v2093_v6 = vmax.f32 %v1997_v27, %v2001_v53  ;;  %v2094_v0 = vmax.f32 %v1998_v17, %v2002_v59  ;;  %4144 = vmatmul.msk.bf16.gmra.mxu0 %vm292_vm1, %v5248_v11  ;;  %v7719_v27 = vld [vmem:[#allocation71_spill] sm:$0xff]  ;;  %v4209_v59 = vld [vmem:[%s7479_s3 + $0x90] sm:$0xf] }
 0x3a0   :  { %v2141_v21 = vmax.f32 %v2093_v6, %v2094_v0  ;;  %v4795_v6 = vld [vmem:[%s7479_s3 + $0x94] sm:$0xf0] }
 0x3a1   :  { %v4210_v0 = vor.u32 %v4795_v6, %v4209_v59 }
 0x3a2   :  { %v2169_v61 = vadd.f32 %v6307_v28, %v2141_v21  ;;  %v4211_v21 = vld [vmem:[%s7479_s3 + $0x98] sm:$0xf0] }
 0x3a3   :  { %v1755_v55 = vpop.f32.mrf.mxu0  ;;  %v1884_v63 = vpop.f32.mrf.mxu1  ;;  %2408 = vmatpush.bf16.msra.mxu2 %v4210_v0 }
 0x3a4   :  { %v2003_v22 = vadd.f32 %v1755_v55, %v5738_v51  ;;  %v2004_v17 = vadd.f32 %v1884_v63, %v7719_v27  ;;  %v2193_v5 = vmax.f32 %v2169_v61, 0.0  ;;  %v4794_v51 = vld [vmem:[%s7479_s3 + $0x94] sm:$0xf]  ;;  %v4201_v61 = vld [vmem:[%s7479_s3 + $0x80] sm:$0xf] }
 0x3a5   :  { %v4214_v55 = vor.u32 %v4794_v51, %v4211_v21  ;;  %v4792_v27 = vld [vmem:[%s7479_s3 + $0x84] sm:$0xf] }
 0x3a6   :  { %v2095_v32 = vmax.f32 %v1999_v54, %v2003_v22  ;;  %v2096_v46 = vmax.f32 %v2000_v45, %v2004_v17  ;;  %v2217_v54 = vpack.c.bf16 %v2193_v5, %v2193_v5  ;;  %v4793_v22 = vld [vmem:[%s7479_s3 + $0x84] sm:$0xf0] }
 0x3a7   :  { %2457 = vmatpush.bf16.msra.mxu3 %v4214_v55 }
 0x3a8   :  { %v2142_v30 = vmax.f32 %v2095_v32, %v2096_v46  ;;  %v2502_v17 = vunpack.c.l.b16 %v2217_v54  ;;  %v4202_v46 = vor.u32 %v4793_v22, %v4201_v61 }
 0x3aa   :  { %v2170_v11 = vadd.f32 %v6307_v28, %v2142_v30  ;;  %2409 = vmatpush.bf16.msra.mxu2 %v4202_v46 }
 0x3ab   :  { %v1758_v20 = vpop.f32.mrf.mxu0  ;;  %v1887_v53 = vpop.f32.mrf.mxu1 }
 0x3ac   :  { %v2194_v45 = vmax.f32 %v2170_v11, 0.0  ;;  %v2006_v0 = vadd.f32 %v1887_v53, %v5766_v23 }
 0x3ad   :  { %4169 = vmatmul.msk.bf16.gmra.mxu1 %vm292_vm1, %v5272_v39 }
 0x3ae   :  { %v2218_v63 = vpack.c.bf16 %v2194_v45, %v2194_v45  ;;  %4145 = vmatmul.msk.bf16.gmra.mxu0 %vm292_vm1, %v5272_v39  ;;  %v4203_v39 = vld [vmem:[%s7479_s3 + $0x88] sm:$0xf0]  ;;  %v2005_v45 = vadd.f32 %v1758_v20, %v5764_v9 }
 0x3af   :  { %v4206_v5 = vor.u32 %v4792_v27, %v4203_v39 }
 0x3b0   :  { %v2503_v32 = vunpack.c.l.b16 %v2218_v63 }
 0x3b1   :  { %2458 = vmatpush.bf16.msra.mxu3 %v4206_v5 }
 0x3b2   :  { %v6341_v30 = vpack.c.b16 %v2503_v32, %v2502_v17 }
 0x3b3   :  { %v1760_v11 = vpop.f32.mrf.mxu0  ;;  %v1889_v59 = vpop.f32.mrf.mxu1 }
 0x3b4   :  { %v2007_v22 = vadd.f32 %v1760_v11, %v5770_v19  ;;  %v2008_v9 = vadd.f32 %v1889_v59, %v5772_v44 }
 0x3bb   :  { %v1763_v6 = vpop.f32.mrf.mxu0  ;;  %v1892_v51 = vpop.f32.mrf.mxu1 }
 0x3bc   :  { %v2009_v54 = vadd.f32 %v1763_v6, %v5784_v38  ;;  %v2010_v21 = vadd.f32 %v1892_v51, %v5786_v34 }
 0x3bd   :  { %4170 = vmatmul.msk.bf16.gmra.mxu1 %vm292_vm1, %v5296_v10 }
 0x3be   :  { %v2097_v55 = vmax.f32 %v2005_v45, %v2009_v54  ;;  %v2098_v63 = vmax.f32 %v2006_v0, %v2010_v21  ;;  %4146 = vmatmul.msk.bf16.gmra.mxu0 %vm292_vm1, %v5296_v10 }
 0x3c0   :  { %v2143_v61 = vmax.f32 %v2097_v55, %v2098_v63 }
 0x3c2   :  { %v2171_v23 = vadd.f32 %v6307_v28, %v2143_v61 }
 0x3c3   :  { %v1765_v27 = vpop.f32.mrf.mxu0  ;;  %v1894_v17 = vpop.f32.mrf.mxu1 }
 0x3c4   :  { %v2011_v38 = vadd.f32 %v1765_v27, %v5790_v50  ;;  %v2012_v34 = vadd.f32 %v1894_v17, %v5792_v25  ;;  %v2195_v32 = vmax.f32 %v2171_v23, 0.0 }
 0x3c6   :  { %v2099_v20 = vmax.f32 %v2007_v22, %v2011_v38  ;;  %v2100_v53 = vmax.f32 %v2008_v9, %v2012_v34  ;;  %v2219_v6 = vpack.c.bf16 %v2195_v32, %v2195_v32 }
 0x3c8   :  { %v2144_v46 = vmax.f32 %v2099_v20, %v2100_v53  ;;  %v2290_v44 = vunpack.c.l.b16 %v2219_v6 }
 0x3ca   :  { %v2172_v39 = vadd.f32 %v6307_v28, %v2144_v46 }
 0x3cb   :  { %v1768_v10 = vpop.f32.mrf.mxu0  ;;  %v1897_v5 = vpop.f32.mrf.mxu1 }
 0x3cc   :  { %v2196_v19 = vmax.f32 %v2172_v39, 0.0  ;;  %v2013_v54 = vadd.f32 %v1768_v10, %v5804_v2  ;;  %v2014_v21 = vadd.f32 %v1897_v5, %v5806_v56  ;;  %v7720_v2 = vld [vmem:[#allocation72_spill] sm:$0xff] }
 0x3cd   :  { %4171 = vmatmul.msk.bf16.gmra.mxu1 %vm292_vm1, %v5320_v52 }
 0x3ce   :  { %v2220_v11 = vpack.c.bf16 %v2196_v19, %v2196_v19  ;;  %4147 = vmatmul.msk.bf16.gmra.mxu0 %vm292_vm1, %v5320_v52  ;;  %v7723_v19 = vld [vmem:[#allocation12_spill] sm:$0xff] }
 0x3d0   :  { %v2291_v50 = vunpack.c.l.b16 %v2220_v11 }
 0x3d2   :  { %v6361_v25 = vpack.c.b16 %v2291_v50, %v2290_v44 }
 0x3d3   :  { %v1770_v59 = vpop.f32.mrf.mxu0  ;;  %v1899_v51 = vpop.f32.mrf.mxu1 }
 0x3d4   :  { %2410 = vmatmul.bf16.vlgmr.msra.gmra.mxu2 %v6361_v25  ;;  %2459 = vmatmul.bf16.vlgmr.msra.gmra.mxu3 %v6361_v25  ;;  %v2015_v27 = vadd.f32 %v1770_v59, %v5810_v60  ;;  %v2016_v23 = vadd.f32 %v1899_v51, %v7720_v2  ;;  %v7728_v2 = vld [vmem:[#allocation17_spill] sm:$0xff] }
 0x3db   :  { %v1773_v45 = vpop.f32.mrf.mxu0  ;;  %v1902_v0 = vpop.f32.mrf.mxu1 }
 0x3dc   :  { %v2017_v55 = vadd.f32 %v1773_v45, %v5824_v37  ;;  %v2018_v52 = vadd.f32 %v1902_v0, %v5826_v41  ;;  %v7721_v37 = vld [vmem:[#allocation73_spill] sm:$0xff]  ;;  %v7722_v41 = vld [vmem:[#allocation74_spill] sm:$0xff] }
 0x3dd   :  { %4172 = vmatmul.msk.bf16.gmra.mxu1 %vm292_vm1, %v5344_v36 }
 0x3de   :  { %v2101_v63 = vmax.f32 %v2013_v54, %v2017_v55  ;;  %v2102_v61 = vmax.f32 %v2014_v21, %v2018_v52  ;;  %4148 = vmatmul.msk.bf16.gmra.mxu0 %vm292_vm1, %v5344_v36  ;;  %v7724_v54 = vld [vmem:[#allocation75_spill] sm:$0xff]  ;;  %v7725_v55 = vld [vmem:[#allocation76_spill] sm:$0xff] }
 0x3e0   :  { %v2145_v22 = vmax.f32 %v2101_v63, %v2102_v61  ;;  %v7726_v63 = vld [vmem:[#allocation6_spill] sm:$0xff] }
 0x3e2   :  { %v2173_v56 = vadd.f32 %v6307_v28, %v2145_v22  ;;  %v7727_v22 = vld [vmem:[#allocation7_spill] sm:$0xff] }
 0x3e3   :  { %v1775_v17 = vpop.f32.mrf.mxu0  ;;  %v1904_v9 = vpop.f32.mrf.mxu1 }
 0x3e4   :  { %v2019_v38 = vadd.f32 %v1775_v17, %v7721_v37  ;;  %v2020_v34 = vadd.f32 %v1904_v9, %v7722_v41  ;;  %v2197_v32 = vmax.f32 %v2173_v56, 0.0  ;;  %v7729_v56 = vld [vmem:[#allocation4_spill] sm:$0xff] }
 0x3e6   :  { %v2103_v20 = vmax.f32 %v2015_v27, %v2019_v38  ;;  %v2104_v53 = vmax.f32 %v2016_v23, %v2020_v34  ;;  %v2221_v5 = vpack.c.bf16 %v2197_v32, %v2197_v32  ;;  %v7730_v34 = vld [vmem:[#allocation5_spill] sm:$0xff]  ;;  %v7731_v32 = vld [vmem:[#allocation8_spill] sm:$0xff] }
 0x3e8   :  { %v2146_v46 = vmax.f32 %v2103_v20, %v2104_v53  ;;  %v2292_v11 = vunpack.c.l.b16 %v2221_v5 }
 0x3ea   :  { %v2174_v39 = vadd.f32 %v6307_v28, %v2146_v46 }
 0x3eb   :  { %v1778_v36 = vpop.f32.mrf.mxu0  ;;  %v1907_v10 = vpop.f32.mrf.mxu1 }
 0x3ec   :  { %v2198_v60 = vmax.f32 %v2174_v39, 0.0  ;;  %v2021_v21 = vadd.f32 %v1778_v36, %v7724_v54  ;;  %v2022_v52 = vadd.f32 %v1907_v10, %v7725_v55  ;;  %v7732_v39 = vld [vmem:[#allocation9_spill] sm:$0xff]  ;;  %v7733_v54 = vld [vmem:[#allocation22_spill] sm:$0xff] }
 0x3ed   :  { %4173 = vmatmul.msk.bf16.gmra.mxu1 %vm292_vm1, %v7723_v19 }
 0x3ee   :  { %v2222_v6 = vpack.c.bf16 %v2198_v60, %v2198_v60  ;;  %4149 = vmatmul.msk.bf16.gmra.mxu0 %vm292_vm1, %v7723_v19 }
 0x3f0   :  { %v2293_v44 = vunpack.c.l.b16 %v2222_v6 }
 0x3f2   :  { %v6383_v50 = vpack.c.b16 %v2293_v44, %v2292_v11 }
 0x3f3   :  { %v1780_v59 = vpop.f32.mrf.mxu0  ;;  %v1909_v51 = vpop.f32.mrf.mxu1 }
 0x3f4   :  { %2415 = vmatmul.bf16.gmra.mxu2 %v6383_v50  ;;  %2464 = vmatmul.bf16.gmra.mxu3 %v6383_v50  ;;  %v2023_v37 = vadd.f32 %v1780_v59, %v7729_v56  ;;  %v2024_v20 = vadd.f32 %v1909_v51, %v7730_v34 }
 0x3fb   :  { %v1783_v45 = vpop.f32.mrf.mxu0  ;;  %v1912_v0 = vpop.f32.mrf.mxu1 }
 0x3fc   :  { %v2025_v61 = vadd.f32 %v1783_v45, %v7726_v63  ;;  %v2026_v27 = vadd.f32 %v1912_v0, %v7727_v22 }
 0x3fd   :  { %4174 = vmatmul.msk.bf16.gmra.mxu1 %vm292_vm1, %v7728_v2 }
 0x3fe   :  { %v2105_v17 = vmax.f32 %v2021_v21, %v2025_v61  ;;  %v2106_v9 = vmax.f32 %v2022_v52, %v2026_v27  ;;  %4150 = vmatmul.msk.bf16.gmra.mxu0 %vm292_vm1, %v7728_v2  ;;  %v7734_v27 = vld [vmem:[#allocation10_spill] sm:$0xff] }
 0x400   :  { %v2147_v23 = vmax.f32 %v2105_v17, %v2106_v9  ;;  %v7735_v9 = vld [vmem:[#allocation11_spill] sm:$0xff] }
 0x402   :  { %v2175_v53 = vadd.f32 %v6307_v28, %v2147_v23  ;;  %v7736_v23 = vld [vmem:[#allocation15_spill] sm:$0xff] }
 0x403   :  { %v1785_v38 = vpop.f32.mrf.mxu0  ;;  %v1914_v41 = vpop.f32.mrf.mxu1 }
 0x404   :  { %v2027_v46 = vadd.f32 %v1785_v38, %v7731_v32  ;;  %v2028_v36 = vadd.f32 %v1914_v41, %v7732_v39  ;;  %v2199_v60 = vmax.f32 %v2175_v53, 0.0  ;;  %v7739_v32 = vld [vmem:[#allocation13_spill] sm:$0xff] }
 0x406   :  { %v2107_v10 = vmax.f32 %v2023_v37, %v2027_v46  ;;  %v2108_v5 = vmax.f32 %v2024_v20, %v2028_v36  ;;  %v2223_v45 = vpack.c.bf16 %v2199_v60, %v2199_v60  ;;  %v7737_v37 = vld [vmem:[#allocation16_spill] sm:$0xff]  ;;  %v7738_v20 = vld [vmem:[#allocation27_spill] sm:$0xff] }
 0x408   :  { %v2148_v6 = vmax.f32 %v2107_v10, %v2108_v5  ;;  %v2294_v51 = vunpack.c.l.b16 %v2223_v45  ;;  %v7740_v10 = vld [vmem:[#allocation14_spill] sm:$0xff] }
 0x40a   :  { %v2176_v19 = vadd.f32 %v6307_v28, %v2148_v6  ;;  %v7741_v6 = vld [vmem:[#allocation18_spill] sm:$0xff] }
 0x40b   :  { %v1788_v11 = vpop.f32.mrf.mxu0  ;;  %v1917_v44 = vpop.f32.mrf.mxu1 }
 0x40c   :  { %v2200_v59 = vmax.f32 %v2176_v19, 0.0  ;;  %v2029_v17 = vadd.f32 %v1788_v11, %v7734_v27  ;;  %v2030_v2 = vadd.f32 %v1917_v44, %v7735_v9  ;;  %v7742_v11 = vld [vmem:[#allocation19_spill] sm:$0xff] }
 0x40d   :  { %4175 = vmatmul.msk.bf16.gmra.mxu1 %vm292_vm1, %v7733_v54 }
 0x40e   :  { %v2224_v0 = vpack.c.bf16 %v2200_v59, %v2200_v59  ;;  %4151 = vmatmul.msk.bf16.gmra.mxu0 %vm292_vm1, %v7733_v54 }
 0x410   :  { %v2295_v21 = vunpack.c.l.b16 %v2224_v0 }
 0x412   :  { %v6405_v55 = vpack.c.b16 %v2295_v21, %v2294_v51 }
 0x413   :  { %v1790_v52 = vpop.f32.mrf.mxu0  ;;  %v1919_v63 = vpop.f32.mrf.mxu1 }
 0x414   :  { %2420 = vmatmul.bf16.gmra.mxu2 %v6405_v55  ;;  %2469 = vmatmul.bf16.gmra.mxu3 %v6405_v55  ;;  %v2031_v46 = vadd.f32 %v1790_v52, %v7739_v32  ;;  %v2032_v5 = vadd.f32 %v1919_v63, %v7740_v10  ;;  %v4838_v32 = vld [vmem:[%s7479_s3 + $0x1f4] sm:$0xf] }
 0x41b   :  { %v1793_v61 = vpop.f32.mrf.mxu0  ;;  %v1922_v22 = vpop.f32.mrf.mxu1 }
 0x41c   :  { %v2033_v56 = vadd.f32 %v1793_v61, %v7736_v23  ;;  %v2034_v38 = vadd.f32 %v1922_v22, %v7737_v37  ;;  %v4791_v23 = vld [vmem:[%s7479_s3 + $0x74] sm:$0xf0] }
 0x41d   :  { %4176 = vmatmul.msk.bf16.gmra.mxu1 %vm292_vm1, %v7738_v20 }
 0x41e   :  { %v2109_v41 = vmax.f32 %v2029_v17, %v2033_v56  ;;  %v2110_v34 = vmax.f32 %v2030_v2, %v2034_v38  ;;  %4152 = vmatmul.msk.bf16.gmra.mxu0 %vm292_vm1, %v7738_v20  ;;  %v4321_v2 = vld [vmem:[%s7479_s3 + $0x70] sm:$0xf]  ;;  %v4790_v56 = vld [vmem:[%s7479_s3 + $0x74] sm:$0xf]  ;;  %v4839_v20 = vld [vmem:[%s7479_s3 + $0x1f4] sm:$0xf0] }
 0x420   :  { %v2149_v53 = vmax.f32 %v2109_v41, %v2110_v34  ;;  %v4322_v41 = vor.u32 %v4791_v23, %v4321_v2  ;;  %v4481_v34 = vld [vmem:[%s7479_s3 + $0x1f0] sm:$0xf]  ;;  %v7746_v2 = vld [vmem:[#allocation37_spill] sm:$0xff] }
 0x422   :  { %v2177_v60 = vadd.f32 %v6307_v28, %v2149_v53  ;;  %2586 = vmatpush.bf16.msrb.mxu2 %v4322_v41 }
 0x423   :  { %v1795_v39 = vpop.f32.mrf.mxu0  ;;  %v1924_v36 = vpop.f32.mrf.mxu1 }
 0x424   :  { %v2035_v19 = vadd.f32 %v1795_v39, %v7741_v6  ;;  %v2036_v44 = vadd.f32 %v1924_v36, %v7742_v11  ;;  %v2201_v0 = vmax.f32 %v2177_v60, 0.0  ;;  %v4313_v39 = vld [vmem:[%s7479_s3 + $0x60] sm:$0xf]  ;;  %v4482_v36 = vor.u32 %v4839_v20, %v4481_v34  ;;  %v4788_v60 = vld [vmem:[%s7479_s3 + $0x64] sm:$0xf] }
 0x425   :  { %v4315_v6 = vld [vmem:[%s7479_s3 + $0x68] sm:$0xf0] }
 0x426   :  { %v2111_v45 = vmax.f32 %v2031_v46, %v2035_v19  ;;  %v2112_v59 = vmax.f32 %v2032_v5, %v2036_v44  ;;  %v2225_v22 = vpack.c.bf16 %v2201_v0, %v2201_v0  ;;  %v4483_v46 = vld [vmem:[%s7479_s3 + $0x1f8] sm:$0xf0]  ;;  %v4789_v5 = vld [vmem:[%s7479_s3 + $0x64] sm:$0xf0]  ;;  %v4318_v11 = vor.u32 %v4788_v60, %v4315_v6  ;;  %3020 = vmatpush.bf16.msrb.mxu0 %v4482_v36 }
 0x427   :  { %v4486_v10 = vor.u32 %v4838_v32, %v4483_v46  ;;  %v4314_v19 = vor.u32 %v4789_v5, %v4313_v39  ;;  %v7750_v32 = vld [vmem:[#allocation32_spill] sm:$0xff] }
 0x428   :  { %v2150_v54 = vmax.f32 %v2111_v45, %v2112_v59  ;;  %v2296_v63 = vunpack.c.l.b16 %v2225_v22  ;;  %v7743_v59 = vld [vmem:[#allocation20_spill] sm:$0xff] }
 0x429   :  { %3069 = vmatpush.bf16.msrb.mxu1 %v4486_v10  ;;  %2587 = vmatpush.bf16.msrb.mxu2 %v4314_v19 }
 0x42a   :  { %v2178_v51 = vadd.f32 %v6307_v28, %v2150_v54  ;;  %v7744_v54 = vld [vmem:[#allocation21_spill] sm:$0xff] }
 0x42b   :  { %v1798_v21 = vpop.f32.mrf.mxu0  ;;  %v1927_v61 = vpop.f32.mrf.mxu1 }
 0x42c   :  { %v2202_v52 = vmax.f32 %v2178_v51, 0.0  ;;  %v2037_v0 = vadd.f32 %v1798_v21, %v7743_v59  ;;  %v2038_v51 = vadd.f32 %v1927_v61, %v7744_v54  ;;  %v7748_v21 = vld [vmem:[#allocation24_spill] sm:$0xff]  ;;  %v4473_v59 = vld [vmem:[%s7479_s3 + $0x1e0] sm:$0xf]  ;;  %v4836_v54 = vld [vmem:[%s7479_s3 + $0x1e4] sm:$0xf] }
 0x42d   :  { %4177 = vmatmul.msk.bf16.gmra.mxu1 %vm292_vm1, %v7625_v57 }
 0x42e   :  { %v2226_v27 = vpack.c.bf16 %v2202_v52, %v2202_v52  ;;  %4153 = vmatmul.msk.bf16.gmra.mxu0 %vm292_vm1, %v7625_v57  ;;  %v4323_v57 = vld [vmem:[%s7479_s3 + $0x78] sm:$0xf0] }
 0x42f   :  { %v4326_v53 = vor.u32 %v4790_v56, %v4323_v57  ;;  %v7745_v52 = vld [vmem:[#allocation25_spill] sm:$0xff]  ;;  %v7747_v56 = vld [vmem:[#allocation23_spill] sm:$0xff] }
 0x430   :  { %v2297_v17 = vunpack.c.l.b16 %v2226_v27 }
 0x431   :  { %2635 = vmatpush.bf16.msrb.mxu3 %v4326_v53 }
 0x432   :  { %v6427_v9 = vpack.c.b16 %v2297_v17, %v2296_v63 }
 0x433   :  { %v1800_v37 = vpop.f32.mrf.mxu0  ;;  %v1929_v38 = vpop.f32.mrf.mxu1 }
 0x434   :  { %2425 = vmatmul.bf16.gmra.mxu2 %v6427_v9  ;;  %2474 = vmatmul.bf16.gmra.mxu3 %v6427_v9  ;;  %v2039_v41 = vadd.f32 %v1800_v37, %v7747_v56  ;;  %v2040_v20 = vadd.f32 %v1929_v38, %v7748_v21  ;;  %v4475_v56 = vld [vmem:[%s7479_s3 + $0x1e8] sm:$0xf0]  ;;  %v4784_v21 = vld [vmem:[%s7479_s3 + $0x44] sm:$0xf] }
 0x435   :  { %2636 = vmatpush.bf16.msrb.mxu3 %v4318_v11 }
 0x43b   :  { %v1803_v44 = vpop.f32.mrf.mxu0  ;;  %v1932_v45 = vpop.f32.mrf.mxu1 }
 0x43c   :  { %v2041_v22 = vadd.f32 %v1803_v44, %v5956_v29  ;;  %v2042_v27 = vadd.f32 %v1932_v45, %v7745_v52  ;;  %v7749_v29 = vld [vmem:[#allocation26_spill] sm:$0xff]  ;;  %v4786_v52 = vld [vmem:[%s7479_s3 + $0x54] sm:$0xf] }
 0x43d   :  { %4178 = vmatmul.msk.bf16.gmra.mxu1 %vm292_vm1, %v7746_v2 }
 0x43e   :  { %v2113_v63 = vmax.f32 %v2037_v0, %v2041_v22  ;;  %v2114_v17 = vmax.f32 %v2038_v51, %v2042_v27  ;;  %4154 = vmatmul.msk.bf16.gmra.mxu0 %vm292_vm1, %v7746_v2  ;;  %v4837_v0 = vld [vmem:[%s7479_s3 + $0x1e4] sm:$0xf0]  ;;  %v4787_v22 = vld [vmem:[%s7479_s3 + $0x54] sm:$0xf0] }
 0x43f   :  { %v4474_v27 = vor.u32 %v4837_v0, %v4473_v59 }
 0x440   :  { %v2151_v23 = vmax.f32 %v2113_v63, %v2114_v17 }
 0x441   :  { %3021 = vmatpush.bf16.msrb.mxu0 %v4474_v27 }
 0x442   :  { %v2179_v61 = vadd.f32 %v6307_v28, %v2151_v23  ;;  %v4307_v23 = vld [vmem:[%s7479_s3 + $0x58] sm:$0xf0] }
 0x443   :  { %v1805_v57 = vpop.f32.mrf.mxu0  ;;  %v1934_v34 = vpop.f32.mrf.mxu1 }
 0x444   :  { %v2043_v53 = vadd.f32 %v1805_v57, %v7749_v29  ;;  %v2044_v46 = vadd.f32 %v1934_v34, %v7750_v32  ;;  %v2203_v10 = vmax.f32 %v2179_v61, 0.0  ;;  %v4297_v57 = vld [vmem:[%s7479_s3 + $0x40] sm:$0xf]  ;;  %v4785_v34 = vld [vmem:[%s7479_s3 + $0x44] sm:$0xf0] }
 0x445   :  { %v4298_v61 = vor.u32 %v4785_v34, %v4297_v57  ;;  %v4299_v29 = vld [vmem:[%s7479_s3 + $0x48] sm:$0xf0]  ;;  %v4835_v32 = vld [vmem:[%s7479_s3 + $0x1d4] sm:$0xf0] }
 0x446   :  { %v2115_v39 = vmax.f32 %v2039_v41, %v2043_v53  ;;  %v2116_v36 = vmax.f32 %v2040_v20, %v2044_v46  ;;  %v2227_v11 = vpack.c.bf16 %v2203_v10, %v2203_v10  ;;  %v4310_v41 = vor.u32 %v4786_v52, %v4307_v23  ;;  %v4465_v53 = vld [vmem:[%s7479_s3 + $0x1d0] sm:$0xf]  ;;  %v4467_v10 = vld [vmem:[%s7479_s3 + $0x1d8] sm:$0xf0] }
 0x447   :  { %v4478_v20 = vor.u32 %v4836_v54, %v4475_v56  ;;  %v4302_v46 = vor.u32 %v4784_v21, %v4299_v29  ;;  %v7751_v54 = vld [vmem:[#allocation28_spill] sm:$0xff]  ;;  %v4831_v56 = vld [vmem:[%s7479_s3 + $0x1b4] sm:$0xf0]  ;;  %v7753_v21 = vld [vmem:[#allocation30_spill] sm:$0xff] }
 0x448   :  { %v2152_v5 = vmax.f32 %v2115_v39, %v2116_v36  ;;  %v2298_v38 = vunpack.c.l.b16 %v2227_v11  ;;  %2637 = vmatpush.bf16.msrb.mxu3 %v4310_v41  ;;  %v4466_v39 = vor.u32 %v4835_v32, %v4465_v53  ;;  %v4834_v36 = vld [vmem:[%s7479_s3 + $0x1d4] sm:$0xf]  ;;  %v4833_v11 = vld [vmem:[%s7479_s3 + $0x1c4] sm:$0xf0]  ;;  %v4449_v23 = vld [vmem:[%s7479_s3 + $0x1b0] sm:$0xf] }
 0x449   :  { %3070 = vmatpush.bf16.msrb.mxu1 %v4478_v20  ;;  %v4830_v41 = vld [vmem:[%s7479_s3 + $0x1b4] sm:$0xf]  ;;  %v7754_v20 = vld [vmem:[#allocation33_spill] sm:$0xff]  ;;  %v4441_v29 = vld [vmem:[%s7479_s3 + $0x1a0] sm:$0xf] }
 0x44a   :  { %v2180_v60 = vadd.f32 %v6307_v28, %v2152_v5  ;;  %v4470_v5 = vor.u32 %v4834_v36, %v4467_v10  ;;  %3022 = vmatpush.bf16.msrb.mxu0 %v4466_v39  ;;  %v4828_v53 = vld [vmem:[%s7479_s3 + $0x1a4] sm:$0xf]  ;;  %v7755_v32 = vld [vmem:[#allocation31_spill] sm:$0xff]  ;;  %v7757_v36 = vld [vmem:[#allocation36_spill] sm:$0xff] }
 0x44b   :  { %v1808_v6 = vpop.f32.mrf.mxu0  ;;  %v1937_v19 = vpop.f32.mrf.mxu1  ;;  %v1660_v10 = vadd.f32 %v7757_v36, %v6023_v58  ;;  %v88_v36 = vld [vmem:[%s7478_s0 + $0x1b8] sm:$0xff] }
 0x44c   :  { %v2204_v37 = vmax.f32 %v2180_v60, 0.0  ;;  %v4457_v60 = vld [vmem:[%s7479_s3 + $0x1c0] sm:$0xf]  ;;  %2638 = vmatpush.bf16.msrb.mxu3 %v4302_v46 }
 0x44d   :  { %4179 = vmatmul.msk.bf16.gmra.mxu1 %vm292_vm1, %v5552_v62  ;;  %v7756_v46 = vld [vmem:[#allocation34_spill] sm:$0xff] }
 0x44e   :  { %v2228_v44 = vpack.c.bf16 %v2204_v37, %v2204_v37  ;;  %4155 = vmatmul.msk.bf16.gmra.mxu0 %vm292_vm1, %v5552_v62  ;;  %v4305_v62 = vld [vmem:[%s7479_s3 + $0x50] sm:$0xf]  ;;  %v4832_v37 = vld [vmem:[%s7479_s3 + $0x1c4] sm:$0xf]  ;;  %3071 = vmatpush.bf16.msrb.mxu1 %v4470_v5  ;;  %v1657_v39 = vadd.f32 %v7756_v46, %v7755_v32  ;;  %v7758_v5 = vld [vmem:[#allocation35_spill] sm:$0xff] }
 0x44f   :  { %v4306_v2 = vor.u32 %v4787_v22, %v4305_v62  ;;  %v2045_v62 = vadd.f32 %v1808_v6, %v7751_v54  ;;  %v7752_v22 = vld [vmem:[#allocation29_spill] sm:$0xff] }
 0x450   :  { %v2299_v45 = vunpack.c.l.b16 %v2228_v44  ;;  %v4458_v44 = vor.u32 %v4833_v11, %v4457_v60  ;;  %v2046_v52 = vadd.f32 %v1937_v19, %v7752_v22  ;;  %v7759_v60 = vld [vmem:[#allocation38_spill] sm:$0xff] }
 0x451   :  { %2588 = vmatpush.bf16.msrb.mxu2 %v4306_v2  ;;  %v1661_v11 = vadd.f32 %v7759_v60, %v7758_v5 }
 0x452   :  { %v6494_v51 = vpack.c.b16 %v2299_v45, %v2298_v38  ;;  %v4459_v38 = vld [vmem:[%s7479_s3 + $0x1c8] sm:$0xf0]  ;;  %3023 = vmatpush.bf16.msrb.mxu0 %v4458_v44 }
 0x453   :  { %v6505_v63 = vpop.f32.mrf.mxu0  ;;  %v6507_v17 = vpop.f32.mrf.mxu1  ;;  %v4462_v0 = vor.u32 %v4832_v37, %v4459_v38  ;;  %v4443_v44 = vld [vmem:[%s7479_s3 + $0x1a8] sm:$0xf0] }
 0x454   :  { %2430 = vmatmul.bf16.gmra.mxu2 %v6494_v51  ;;  %2479 = vmatmul.bf16.gmra.mxu3 %v6494_v51  ;;  %v2048_v54 = vadd.f32 %v6507_v17, %v1657_v39  ;;  %v87_v39 = vld [vmem:[%s7478_s0 + $0x1b0] sm:$0xff] }
 0x455   :  { %2589 = vmatpush.bf16.msrb.mxu2 %v4298_v61  ;;  %3072 = vmatpush.bf16.msrb.mxu1 %v4462_v0  ;;  %v1656_v61 = vadd.f32 %v7754_v20, %v7753_v21  ;;  %v4446_v0 = vor.u32 %v4828_v53, %v4443_v44  ;;  %v4427_v20 = vld [vmem:[%s7479_s3 + $0x188] sm:$0xf0]  ;;  %v4289_v44 = vld [vmem:[%s7479_s3 + $0x30] sm:$0xf] }
 0x457   :  { %v2047_v38 = vadd.f32 %v6505_v63, %v1656_v61  ;;  %v4826_v63 = vld [vmem:[%s7479_s3 + $0x194] sm:$0xf] }
 0x45b   :  { %v1813_v45 = vpop.f32.mrf.mxu0  ;;  %v1942_v59 = vpop.f32.mrf.mxu1 }
 0x45c   :  { %v2049_v27 = vadd.f32 %v1813_v45, %v6018_v33  ;;  %v2050_v2 = vadd.f32 %v1942_v59, %v6020_v15  ;;  %v4450_v33 = vor.u32 %v4831_v56, %v4449_v23  ;;  %v4451_v15 = vld [vmem:[%s7479_s3 + $0x1b8] sm:$0xf0] }
 0x45d   :  { %4180 = vmatmul.msk.bf16.gmra.mxu1 %vm292_vm1, %v6032_v40  ;;  %v4454_v19 = vor.u32 %v4830_v41, %v4451_v15  ;;  %v4435_v56 = vld [vmem:[%s7479_s3 + $0x198] sm:$0xf0]  ;;  %v4825_v15 = vld [vmem:[%s7479_s3 + $0x184] sm:$0xf0] }
 0x45e   :  { %v2117_v6 = vmax.f32 %v2045_v62, %v2049_v27  ;;  %v2118_v57 = vmax.f32 %v2046_v52, %v2050_v2  ;;  %4156 = vmatmul.msk.bf16.gmra.mxu0 %vm292_vm1, %v6032_v40  ;;  %v4829_v40 = vld [vmem:[%s7479_s3 + $0x1a4] sm:$0xf0]  ;;  %v4433_v52 = vld [vmem:[%s7479_s3 + $0x190] sm:$0xf]  ;;  %v4827_v27 = vld [vmem:[%s7479_s3 + $0x194] sm:$0xf0]  ;;  %v4438_v41 = vor.u32 %v4826_v63, %v4435_v56 }
 0x45f   :  { %3024 = vmatpush.bf16.msrb.mxu0 %v4450_v33  ;;  %v4442_v37 = vor.u32 %v4829_v40, %v4441_v29  ;;  %3073 = vmatpush.bf16.msrb.mxu1 %v4454_v19  ;;  %v4434_v17 = vor.u32 %v4827_v27, %v4433_v52  ;;  %v4425_v33 = vld [vmem:[%s7479_s3 + $0x180] sm:$0xf]  ;;  %v4824_v19 = vld [vmem:[%s7479_s3 + $0x184] sm:$0xf]  ;;  %v4283_v63 = vld [vmem:[%s7479_s3 + $0x28] sm:$0xf0] }
 0x460   :  { %v2153_v34 = vmax.f32 %v2117_v6, %v2118_v57  ;;  %v4426_v21 = vor.u32 %v4825_v15, %v4425_v33  ;;  %v4430_v40 = vor.u32 %v4824_v19, %v4427_v20  ;;  %v4780_v52 = vld [vmem:[%s7479_s3 + $0x24] sm:$0xf] }
 0x462   :  { %v2181_v62 = vadd.f32 %v6307_v28, %v2153_v34 }
 0x463   :  { %v1815_v45 = vpop.f32.mrf.mxu0  ;;  %v1944_v59 = vpop.f32.mrf.mxu1  ;;  %3025 = vmatpush.bf16.msrb.mxu0 %v4442_v37  ;;  %3074 = vmatpush.bf16.msrb.mxu1 %v4446_v0  ;;  %v144_v37 = vpack.c.bf16 %v88_v36, %v88_v36 }
 0x464   :  { %v2051_v22 = vadd.f32 %v1815_v45, %v1660_v10  ;;  %v2052_v58 = vadd.f32 %v1944_v59, %v1661_v11  ;;  %v2205_v6 = vmax.f32 %v2181_v62, 0.0  ;;  %v143_v11 = vpack.c.bf16 %v87_v39, %v87_v39 }
 0x466   :  { %v2119_v2 = vmax.f32 %v2047_v38, %v2051_v22  ;;  %v2120_v23 = vmax.f32 %v2048_v54, %v2052_v58  ;;  %v2229_v53 = vpack.c.bf16 %v2205_v6, %v2205_v6  ;;  %v4782_v38 = vld [vmem:[%s7479_s3 + $0x34] sm:$0xf]  ;;  %v4291_v54 = vld [vmem:[%s7479_s3 + $0x38] sm:$0xf0]  ;;  %v4281_v22 = vld [vmem:[%s7479_s3 + $0x20] sm:$0xf] }
 0x467   :  { %3026 = vmatpush.bf16.msrb.mxu0 %v4434_v17  ;;  %3075 = vmatpush.bf16.msrb.mxu1 %v4438_v41  ;;  %v4294_v62 = vor.u32 %v4782_v38, %v4291_v54  ;;  %v4781_v58 = vld [vmem:[%s7479_s3 + $0x24] sm:$0xf0]  ;;  %v4286_v17 = vor.u32 %v4780_v52, %v4283_v63 }
 0x468   :  { %v2154_v57 = vmax.f32 %v2119_v2, %v2120_v23  ;;  %v2300_v10 = vunpack.c.l.b16 %v2229_v53  ;;  %v4282_v27 = vor.u32 %v4781_v58, %v4281_v22  ;;  %v1709_v2 = vunpack.c.l.b16 %v143_v11 }
 0x469   :  { %v1710_v23 = vunpack.c.l.b16 %v144_v37  ;;  %2639 = vmatpush.bf16.msrb.mxu3 %v4294_v62 }
 0x46a   :  { %v2182_v34 = vadd.f32 %v6307_v28, %v2154_v57 }
 0x46b   :  { %v1818_v61 = vpop.f32.mrf.mxu0  ;;  %v1947_v29 = vpop.f32.mrf.mxu1  ;;  %3027 = vmatpush.bf16.msrb.mxu0 %v4426_v21  ;;  %3076 = vmatpush.bf16.msrb.mxu1 %v4430_v40  ;;  %v1711_v56 = vpack.c.b16 %v1710_v23, %v1709_v2  ;;  %v7760_v40 = vld [vmem:[#allocation77_spill] sm:$0xff]  ;;  %v4273_v23 = vld [vmem:[%s7479_s3 + $0x10] sm:$0xf] }
 0x46c   :  { %v2206_v32 = vmax.f32 %v2182_v34, 0.0  ;;  %v2053_v57 = vadd.f32 %v1818_v61, %v6050_v42  ;;  %v2054_v33 = vadd.f32 %v1947_v29, %v6052_v47  ;;  %v1664_v53 = vadd.f32 %v7760_v40, %v6055_v12  ;;  %v7763_v42 = vld [vmem:[#allocation79_spill] sm:$0xff]  ;;  %v7764_v61 = vld [vmem:[#allocation80_spill] sm:$0xff] }
 0x46d   :  { %4181 = vmatmul.msk.bf16.gmra.mxu1 %vm292_vm1, %v6064_v48  ;;  %2640 = vmatpush.bf16.msrb.mxu3 %v4286_v17  ;;  %v1668_v47 = vadd.f32 %v7764_v61, %v7763_v42  ;;  %v7765_v29 = vld [vmem:[#allocation40_spill] sm:$0xff]  ;;  %v4779_v17 = vld [vmem:[%s7479_s3 + $0x14] sm:$0xf0]  ;;  %v4267_v40 = vld [vmem:[%s7479_s3 + $0x8] sm:$0xf0] }
 0x46e   :  { %v2230_v46 = vpack.c.bf16 %v2206_v32, %v2206_v32  ;;  %4157 = vmatmul.msk.bf16.gmra.mxu0 %vm292_vm1, %v6064_v48  ;;  %v4783_v48 = vld [vmem:[%s7479_s3 + $0x34] sm:$0xf0]  ;;  %v7761_v32 = vld [vmem:[#allocation39_spill] sm:$0xff]  ;;  %v7768_v61 = vld [vmem:[#allocation82_spill] sm:$0xff] }
 0x46f   :  { %v4290_v0 = vor.u32 %v4783_v48, %v4289_v44 }
 0x470   :  { %v2301_v5 = vunpack.c.l.b16 %v2230_v46  ;;  %v7762_v46 = vld [vmem:[#allocation78_spill] sm:$0xff] }
 0x471   :  { %2590 = vmatpush.bf16.msrb.mxu2 %v4290_v0  ;;  %v1665_v39 = vadd.f32 %v7762_v46, %v7761_v32 }
 0x472   :  { %v6631_v60 = vpack.c.b16 %v2301_v5, %v2300_v10 }
 0x473   :  { %v1820_v45 = vpop.f32.mrf.mxu0  ;;  %v1949_v59 = vpop.f32.mrf.mxu1 }
 0x474   :  { %2435 = vmatmul.bf16.gmra.mxu2 %v6631_v60  ;;  %2484 = vmatmul.bf16.gmra.mxu3 %v6631_v60  ;;  %v2056_v11 = vadd.f32 %v1949_v59, %v1665_v39  ;;  %v7767_v39 = vld [vmem:[#allocation41_spill] sm:$0xff] }
 0x475   :  { %2591 = vmatpush.bf16.msrb.mxu2 %v4282_v27 }
 0x47b   :  { %v1823_v41 = vpop.f32.mrf.mxu0  ;;  %v1952_v6 = vpop.f32.mrf.mxu1 }
 0x47c   :  { %v2057_v15 = vadd.f32 %v1823_v41, %v6076_v18  ;;  %v2058_v19 = vadd.f32 %v1952_v6, %v6078_v43  ;;  %v7766_v18 = vld [vmem:[#allocation81_spill] sm:$0xff]  ;;  %v2055_v43 = vadd.f32 %v1820_v45, %v1664_v53 }
 0x47d   :  { %4182 = vmatmul.msk.bf16.gmra.mxu1 %vm292_vm1, %v1711_v56  ;;  %v1669_v36 = vadd.f32 %v7766_v18, %v7765_v29 }
 0x47e   :  { %v2121_v34 = vmax.f32 %v2053_v57, %v2057_v15  ;;  %v2122_v21 = vmax.f32 %v2054_v33, %v2058_v19  ;;  %4158 = vmatmul.msk.bf16.gmra.mxu0 %vm292_vm1, %v1711_v56  ;;  %v4778_v56 = vld [vmem:[%s7479_s3 + $0x14] sm:$0xf]  ;;  %v4274_v57 = vor.u32 %v4779_v17, %v4273_v23  ;;  %v4275_v33 = vld [vmem:[%s7479_s3 + $0x18] sm:$0xf0]  ;;  %v4265_v19 = vld [vmem:[%s7479_s3] sm:$0xf] }
 0x47f   :  { %v4278_v15 = vor.u32 %v4778_v56, %v4275_v33 }
 0x480   :  { %v2155_v20 = vmax.f32 %v2121_v34, %v2122_v21  ;;  %v4777_v34 = vld [vmem:[%s7479_s3 + $0x4] sm:$0xf0]  ;;  %v4776_v21 = vld [vmem:[%s7479_s3 + $0x4] sm:$0xf]  ;;  %2592 = vmatpush.bf16.msrb.mxu2 %v4274_v57 }
 0x481   :  { %2641 = vmatpush.bf16.msrb.mxu3 %v4278_v15  ;;  %v4270_v53 = vor.u32 %v4776_v21, %v4267_v40  ;;  %v4823_v15 = vld [vmem:[%s7479_s3 + $0x174] sm:$0xf0]  ;;  %v4403_v40 = vld [vmem:[%s7479_s3 + $0x178] sm:$0xf0] }
 0x482   :  { %v2183_v37 = vadd.f32 %v6307_v28, %v2155_v20  ;;  %v4266_v20 = vor.u32 %v4777_v34, %v4265_v19  ;;  %v4822_v19 = vld [vmem:[%s7479_s3 + $0x174] sm:$0xf] }
 0x483   :  { %v1825_v10 = vpop.f32.mrf.mxu0  ;;  %v1954_v5 = vpop.f32.mrf.mxu1 }
 0x484   :  { %v2059_v44 = vadd.f32 %v1825_v10, %v1668_v47  ;;  %v2060_v48 = vadd.f32 %v1954_v5, %v1669_v36  ;;  %v2207_v12 = vmax.f32 %v2183_v37, 0.0  ;;  %2593 = vmatpush.bf16.msrb.mxu2 %v4266_v20  ;;  %v7769_v5 = vld [vmem:[#allocation42_spill] sm:$0xff] }
 0x485   :  { %2642 = vmatpush.bf16.msrb.mxu3 %v4270_v53  ;;  %v4406_v53 = vor.u32 %v4822_v19, %v4403_v40 }
 0x486   :  { %v2123_v38 = vmax.f32 %v2055_v43, %v2059_v44  ;;  %v2124_v0 = vmax.f32 %v2056_v11, %v2060_v48  ;;  %v2231_v52 = vpack.c.bf16 %v2207_v12, %v2207_v12  ;;  %v7770_v11 = vld [vmem:[#allocation83_spill] sm:$0xff]  ;;  %v7772_v48 = vld [vmem:[#allocation84_spill] sm:$0xff] }
 0x487   :  { %v1672_v37 = vadd.f32 %v7770_v11, %v7769_v5  ;;  %v7771_v44 = vld [vmem:[#allocation43_spill] sm:$0xff]  ;;  %v7774_v11 = vld [vmem:[#allocation45_spill] sm:$0xff] }
 0x488   :  { %v2156_v54 = vmax.f32 %v2123_v38, %v2124_v0  ;;  %v2302_v45 = vunpack.c.l.b16 %v2231_v52  ;;  %v1673_v38 = vadd.f32 %v7772_v48, %v7771_v44  ;;  %v7775_v44 = vld [vmem:[#allocation50_spill] sm:$0xff] }
 0x489   :  { %2836 = vmatpush.bf16.msra.mxu3 %v4406_v53 }
 0x48a   :  { %v2184_v62 = vadd.f32 %v6307_v28, %v2156_v54 }
 0x48b   :  { %v1828_v22 = vpop.f32.mrf.mxu0  ;;  %v1957_v58 = vpop.f32.mrf.mxu1 }
 0x48c   :  { %v2208_v27 = vmax.f32 %v2184_v62, 0.0  ;;  %v2061_v42 = vadd.f32 %v1828_v22, %v7767_v39  ;;  %v2062_v47 = vadd.f32 %v1957_v58, %v7768_v61  ;;  %v4820_v39 = vld [vmem:[%s7479_s3 + $0x164] sm:$0xf]  ;;  %v4395_v61 = vld [vmem:[%s7479_s3 + $0x168] sm:$0xf0] }
 0x48d   :  { %3077 = vmatmul.bf16.vlgmr.msrb.gmra.mxu1 %v6405_v55 }
 0x48e   :  { %v2232_v63 = vpack.c.bf16 %v2208_v27, %v2208_v27  ;;  %3028 = vmatmul.bf16.vlgmr.msrb.gmra.mxu0 %v6405_v55 }
 0x490   :  { %v2303_v59 = vunpack.c.l.b16 %v2232_v63 }
 0x492   :  { %v6677_v2 = vpack.c.b16 %v2303_v59, %v2302_v45 }
 0x493   :  { %v1830_v41 = vpop.f32.mrf.mxu0  ;;  %v1959_v6 = vpop.f32.mrf.mxu1 }
 0x494   :  { %2440 = vmatmul.bf16.gmra.mxu2 %v6677_v2  ;;  %2489 = vmatmul.bf16.gmra.mxu3 %v6677_v2  ;;  %v2063_v0 = vadd.f32 %v1830_v41, %v1672_v37  ;;  %v2064_v62 = vadd.f32 %v1959_v6, %v1673_v38  ;;  %v6721_v6 = vpop.f32.mrf.mxu2  ;;  %v7776_v38 = vld [vmem:[#allocation51_spill] sm:$0xff] }
 0x49b   :  { %v1833_v32 = vpop.f32.mrf.mxu0  ;;  %v1962_v46 = vpop.f32.mrf.mxu1 }
 0x49c   :  { %v2065_v29 = vadd.f32 %v1833_v32, %v6128_v35  ;;  %v2066_v18 = vadd.f32 %v1962_v46, %v6130_v31  ;;  %v4393_v32 = vld [vmem:[%s7479_s3 + $0x160] sm:$0xf]  ;;  %v4821_v46 = vld [vmem:[%s7479_s3 + $0x164] sm:$0xf0] }
 0x49d   :  { %3082 = vmatmul.bf16.gmra.mxu1 %v6427_v9 }
 0x49e   :  { %v2125_v36 = vmax.f32 %v2061_v42, %v2065_v29  ;;  %v2126_v43 = vmax.f32 %v2062_v47, %v2066_v18  ;;  %3033 = vmatmul.bf16.gmra.mxu0 %v6427_v9  ;;  %v4394_v42 = vor.u32 %v4821_v46, %v4393_v32  ;;  %v4398_v47 = vor.u32 %v4820_v39, %v4395_v61  ;;  %v6753_v29 = vpop.f32.mrf.mxu2 }
 0x4a0   :  { %v2157_v10 = vmax.f32 %v2125_v36, %v2126_v43  ;;  %2837 = vmatpush.bf16.msra.mxu3 %v4398_v47 }
 0x4a2   :  { %v2185_v35 = vadd.f32 %v6307_v28, %v2157_v10  ;;  %v7773_v10 = vld [vmem:[#allocation44_spill] sm:$0xff] }
 0x4a3   :  { %v1835_v12 = vpop.f32.mrf.mxu0  ;;  %v1964_v54 = vpop.f32.mrf.mxu1 }
 0x4a4   :  { %v2067_v31 = vadd.f32 %v1835_v12, %v6134_v4  ;;  %v2068_v22 = vadd.f32 %v1964_v54, %v6136_v24  ;;  %v2209_v27 = vmax.f32 %v2185_v35, 0.0  ;;  %v6723_v4 = vpop.f32.mrf.mxu3  ;;  %v7777_v35 = vld [vmem:[#allocation46_spill] sm:$0xff] }
 0x4a6   :  { %v2127_v58 = vmax.f32 %v2063_v0, %v2067_v31  ;;  %v2128_v52 = vmax.f32 %v2064_v62, %v2068_v22  ;;  %v2233_v17 = vpack.c.bf16 %v2209_v27, %v2209_v27  ;;  %v7778_v31 = vld [vmem:[#allocation48_spill] sm:$0xff] }
 0x4a7   :  { %v1680_v22 = vadd.f32 %v7778_v31, %v7777_v35 }
 0x4a8   :  { %v2158_v63 = vmax.f32 %v2127_v58, %v2128_v52  ;;  %v2304_v24 = vunpack.c.l.b16 %v2233_v17  ;;  %v7779_v58 = vld [vmem:[#allocation47_spill] sm:$0xff]  ;;  %v7780_v52 = vld [vmem:[#allocation49_spill] sm:$0xff] }
 0x4a9   :  { %v1681_v27 = vadd.f32 %v7780_v52, %v7779_v58  ;;  %v7784_v17 = vld [vmem:[#allocation55_spill] sm:$0xff]  ;;  %v4816_v52 = vld [vmem:[%s7479_s3 + $0x144] sm:$0xf] }
 0x4aa   :  { %v2186_v45 = vadd.f32 %v6307_v28, %v2158_v63  ;;  %v4401_v28 = vld [vmem:[%s7479_s3 + $0x170] sm:$0xf]  ;;  %v4817_v58 = vld [vmem:[%s7479_s3 + $0x144] sm:$0xf0] }
 0x4ab   :  { %v1838_v59 = vpop.f32.mrf.mxu0  ;;  %v1967_v23 = vpop.f32.mrf.mxu1  ;;  %v4402_v20 = vor.u32 %v4823_v15, %v4401_v28  ;;  %v7781_v63 = vld [vmem:[#allocation52_spill] sm:$0xff] }
 0x4ac   :  { %v2210_v56 = vmax.f32 %v2186_v45, 0.0  ;;  %v6755_v18 = vpop.f32.mrf.mxu3  ;;  %v2069_v5 = vadd.f32 %v1838_v59, %v7773_v10  ;;  %v2070_v37 = vadd.f32 %v1967_v23, %v7774_v11  ;;  %v7782_v45 = vld [vmem:[#allocation54_spill] sm:$0xff]  ;;  %v7783_v23 = vld [vmem:[#allocation53_spill] sm:$0xff] }
 0x4ad   :  { %3087 = vmatmul.bf16.gmra.mxu1 %v6494_v51  ;;  %2787 = vmatpush.bf16.msra.mxu2 %v4402_v20  ;;  %v1684_v59 = vadd.f32 %v7782_v45, %v7781_v63  ;;  %v6778_v20 = vld [vmem:[%s7480_s2] ss:$0 sm:$0xff] }
 0x4ae   :  { %v2234_v41 = vpack.c.bf16 %v2210_v56, %v2210_v56  ;;  %3038 = vmatmul.bf16.gmra.mxu0 %v6494_v51  ;;  %v1685_v56 = vadd.f32 %v7784_v17, %v7783_v23 }
 0x4b0   :  { %v2305_v57 = vunpack.c.l.b16 %v2234_v41  ;;  %v6771_v41 = vpop.f32.mrf.mxu2 }
 0x4b1   :  { %2788 = vmatpush.bf16.msra.mxu2 %v4394_v42 }
 0x4b2   :  { %v6725_v33 = vpack.c.b16 %v2305_v57, %v2304_v24 }
 0x4b3   :  { %v1840_v34 = vpop.f32.mrf.mxu0  ;;  %v1969_v21 = vpop.f32.mrf.mxu1 }
 0x4b4   :  { %2445 = vmatmul.bf16.gmra.mxu2 %v6725_v33  ;;  %2494 = vmatmul.bf16.gmra.mxu3 %v6725_v33  ;;  %v6773_v24 = vpop.f32.mrf.mxu3  ;;  %v2071_v57 = vadd.f32 %v1840_v34, %v1680_v22  ;;  %v2072_v28 = vadd.f32 %v1969_v21, %v1681_v27  ;;  %v4377_v22 = vld [vmem:[%s7479_s3 + $0x140] sm:$0xf] }
 0x4b5   :  { %v4378_v45 = vor.u32 %v4817_v58, %v4377_v22 }
 0x4b8   :  { %v6783_v21 = vpop.f32.mrf.mxu2 }
 0x4bb   :  { %v1843_v36 = vpop.f32.mrf.mxu0  ;;  %v1972_v43 = vpop.f32.mrf.mxu1 }
 0x4bc   :  { %v2073_v48 = vadd.f32 %v1843_v36, %v7775_v44  ;;  %v2074_v0 = vadd.f32 %v1972_v43, %v7776_v38  ;;  %v6785_v61 = vpop.f32.mrf.mxu3  ;;  %v4385_v44 = vld [vmem:[%s7479_s3 + $0x150] sm:$0xf]  ;;  %v4818_v38 = vld [vmem:[%s7479_s3 + $0x154] sm:$0xf] }
 0x4bd   :  { %3092 = vmatmul.bf16.gmra.mxu1 %v6631_v60 }
 0x4be   :  { %v2129_v12 = vmax.f32 %v2069_v5, %v2073_v48  ;;  %v2130_v54 = vmax.f32 %v2070_v37, %v2074_v0  ;;  %3043 = vmatmul.bf16.gmra.mxu0 %v6631_v60  ;;  %v4819_v48 = vld [vmem:[%s7479_s3 + $0x154] sm:$0xf0] }
 0x4bf   :  { %v4386_v0 = vor.u32 %v4819_v48, %v4385_v44 }
 0x4c0   :  { %v2159_v62 = vmax.f32 %v2129_v12, %v2130_v54  ;;  %v4387_v12 = vld [vmem:[%s7479_s3 + $0x158] sm:$0xf0]  ;;  %v6815_v27 = vpop.f32.mrf.mxu2 }
 0x4c1   :  { %2789 = vmatpush.bf16.msra.mxu2 %v4386_v0 }
 0x4c2   :  { %v2187_v40 = vadd.f32 %v6778_v20, %v2159_v62  ;;  %v4390_v62 = vor.u32 %v4818_v38, %v4387_v12 }
 0x4c3   :  { %v1845_v15 = vpop.f32.mrf.mxu0  ;;  %v1974_v19 = vpop.f32.mrf.mxu1 }
 0x4c4   :  { %v2075_v53 = vadd.f32 %v1845_v15, %v1684_v59  ;;  %v2076_v32 = vadd.f32 %v1974_v19, %v1685_v56  ;;  %2594 = vmatmul.bf16.vlgmr.msrb.gmra.mxu2 %v6341_v30  ;;  %2643 = vmatmul.bf16.vlgmr.msrb.gmra.mxu3 %v6341_v30  ;;  %v2211_v42 = vmax.f32 %v2187_v40, 0.0  ;;  %v6817_v63 = vpop.f32.mrf.mxu3  ;;  %v7786_v19 = vld [vmem:[#allocation60_spill] sm:$0xff] }
 0x4c5   :  { %2838 = vmatpush.bf16.msra.mxu3 %v4390_v62  ;;  %2790 = vmatpush.bf16.msra.mxu2 %v4378_v45 }
 0x4c6   :  { %v2131_v46 = vmax.f32 %v2071_v57, %v2075_v53  ;;  %v2132_v39 = vmax.f32 %v2072_v28, %v2076_v32  ;;  %v2235_v10 = vpack.c.bf16 %v2211_v42, %v2211_v42  ;;  %v7785_v28 = vld [vmem:[#allocation59_spill] sm:$0xff] }
 0x4c8   :  { %v2160_v34 = vmax.f32 %v2131_v46, %v2132_v39  ;;  %v2703_v30 = vunpack.c.l.b16 %v2235_v10  ;;  %v6826_v53 = vpop.f32.mrf.mxu2  ;;  %v7791_v10 = vld [vmem:[#allocation61_spill] sm:$0xff] }
 0x4ca   :  { %v2188_v47 = vadd.f32 %v6778_v20, %v2160_v34  ;;  %v7787_v34 = vld [vmem:[#allocation56_spill] sm:$0xff] }
 0x4cb   :  { %v1848_v36 = vpop.f32.mrf.mxu0  ;;  %v1977_v43 = vpop.f32.mrf.mxu1 }
 0x4cc   :  { %v2212_v5 = vmax.f32 %v2188_v47, 0.0  ;;  %v2077_v56 = vadd.f32 %v1848_v36, %v6196_v13  ;;  %v2078_v57 = vadd.f32 %v1977_v43, %v6198_v8  ;;  %v6828_v32 = vpop.f32.mrf.mxu3  ;;  %v7788_v47 = vld [vmem:[#allocation2_spill] sm:$0xff]  ;;  %v7789_v36 = vld [vmem:[#allocation57_spill] sm:$0xff] }
 0x4cd   :  { %3097 = vmatmul.bf16.gmra.mxu1 %v6677_v2  ;;  %v1688_v13 = vadd.f32 %v7788_v47, %v7787_v34  ;;  %v7790_v8 = vld [vmem:[#allocation58_spill] sm:$0xff] }
 0x4ce   :  { %v2236_v11 = vpack.c.bf16 %v2212_v5, %v2212_v5  ;;  %3048 = vmatmul.bf16.gmra.mxu0 %v6677_v2  ;;  %v1689_v43 = vadd.f32 %v7790_v8, %v7789_v36  ;;  %v7792_v5 = vld [vmem:[#allocation62_spill] sm:$0xff] }
 0x4d0   :  { %v2704_v37 = vunpack.c.l.b16 %v2236_v11  ;;  %v1692_v11 = vadd.f32 %v7792_v5, %v7791_v10 }
 0x4d2   :  { %v6802_v54 = vpack.c.b16 %v2704_v37, %v2703_v30  ;;  %v7793_v30 = vld [vmem:[#allocation3_spill] sm:$0xff] }
 0x4d3   :  { %v1850_v35 = vpop.f32.mrf.mxu0  ;;  %v1979_v31 = vpop.f32.mrf.mxu1  ;;  %v7794_v37 = vld [vmem:[#allocation63_spill] sm:$0xff] }
 0x4d4   :  { %2599 = vmatmul.bf16.gmra.mxu2 %v6361_v25  ;;  %2648 = vmatmul.bf16.gmra.mxu3 %v6361_v25  ;;  %v4379_v25 = vld [vmem:[%s7479_s3 + $0x148] sm:$0xf0]  ;;  %v1693_v44 = vadd.f32 %v7794_v37, %v7793_v30  ;;  %v2079_v48 = vadd.f32 %v1850_v35, %v1688_v13  ;;  %v2080_v38 = vadd.f32 %v1979_v31, %v1689_v43  ;;  %v4369_v31 = vld [vmem:[%s7479_s3 + $0x130] sm:$0xf]  ;;  %v4813_v30 = vld [vmem:[%s7479_s3 + $0x124] sm:$0xf0] }
 0x4d5   :  { %v4382_v59 = vor.u32 %v4816_v52, %v4379_v25  ;;  %v6843_v25 = vpop.f32.mrf.mxu2  ;;  %v4812_v37 = vld [vmem:[%s7479_s3 + $0x124] sm:$0xf] }
 0x4d7   :  { %2839 = vmatpush.bf16.msra.mxu3 %v4382_v59  ;;  %v6845_v59 = vpop.f32.mrf.mxu3 }
 0x4db   :  { %v1853_v23 = vpop.f32.mrf.mxu0  ;;  %v1982_v17 = vpop.f32.mrf.mxu1 }
 0x4dc   :  { %v2081_v15 = vadd.f32 %v1853_v23, %v7785_v28  ;;  %v2082_v40 = vadd.f32 %v1982_v17, %v7786_v19 }
 0x4dd   :  { %3102 = vmatmul.bf16.gmra.mxu1 %v6725_v33  ;;  %v6862_v47 = vpop.f32.mrf.mxu2 }
 0x4de   :  { %v2133_v46 = vmax.f32 %v2077_v56, %v2081_v15  ;;  %v2134_v39 = vmax.f32 %v2078_v57, %v2082_v40  ;;  %3053 = vmatmul.bf16.gmra.mxu0 %v6725_v33  ;;  %v4815_v56 = vld [vmem:[%s7479_s3 + $0x134] sm:$0xf0]  ;;  %v4814_v57 = vld [vmem:[%s7479_s3 + $0x134] sm:$0xf]  ;;  %v4371_v40 = vld [vmem:[%s7479_s3 + $0x138] sm:$0xf0] }
 0x4df   :  { %v4370_v19 = vor.u32 %v4815_v56, %v4369_v31  ;;  %v6864_v13 = vpop.f32.mrf.mxu3  ;;  %v7795_v56 = vld [vmem:[#allocation65_spill] sm:$0xff] }
 0x4e0   :  { %v2161_v42 = vmax.f32 %v2133_v46, %v2134_v39 }
 0x4e1   :  { %2791 = vmatpush.bf16.msra.mxu2 %v4370_v19  ;;  %v7796_v19 = vld [vmem:[#allocation64_spill] sm:$0xff] }
 0x4e2   :  { %v2189_v62 = vadd.f32 %v6778_v20, %v2161_v42  ;;  %v4374_v42 = vor.u32 %v4814_v57, %v4371_v40  ;;  %v1696_v57 = vadd.f32 %v7795_v56, %v6253_v3  ;;  %v7797_v40 = vld [vmem:[#allocation66_spill] sm:$0xff] }
 0x4e3   :  { %v1855_v0 = vpop.f32.mrf.mxu0  ;;  %v1984_v12 = vpop.f32.mrf.mxu1  ;;  %v4808_v56 = vld [vmem:[%s7479_s3 + $0x104] sm:$0xf] }
 0x4e4   :  { %v2083_v22 = vadd.f32 %v1855_v0, %v1692_v11  ;;  %v2084_v58 = vadd.f32 %v1984_v12, %v1693_v44  ;;  %2604 = vmatmul.bf16.gmra.mxu2 %v6383_v50  ;;  %2653 = vmatmul.bf16.gmra.mxu3 %v6383_v50  ;;  %v2213_v23 = vmax.f32 %v2189_v62, 0.0  ;;  %v4361_v11 = vld [vmem:[%s7479_s3 + $0x120] sm:$0xf] }
 0x4e5   :  { %2840 = vmatpush.bf16.msra.mxu3 %v4374_v42  ;;  %v4362_v44 = vor.u32 %v4813_v30, %v4361_v11  ;;  %v6882_v0 = vpop.f32.mrf.mxu2 }
 0x4e6   :  { %v2135_v52 = vmax.f32 %v2079_v48, %v2083_v22  ;;  %v2136_v45 = vmax.f32 %v2080_v38, %v2084_v58  ;;  %v2237_v46 = vpack.c.bf16 %v2213_v23, %v2213_v23  ;;  %v4363_v48 = vld [vmem:[%s7479_s3 + $0x128] sm:$0xf0] }
 0x4e7   :  { %v4366_v38 = vor.u32 %v4812_v37, %v4363_v48  ;;  %2792 = vmatpush.bf16.msra.mxu2 %v4362_v44  ;;  %v6884_v12 = vpop.f32.mrf.mxu3 }
 0x4e8   :  { %v2162_v17 = vmax.f32 %v2135_v52, %v2136_v45  ;;  %v2936_v36 = vunpack.c.l.b16 %v2237_v46  ;;  %v1697_v46 = vadd.f32 %v7797_v40, %v7796_v19  ;;  %v4347_v19 = vld [vmem:[%s7479_s3 + $0x108] sm:$0xf0] }
 0x4e9   :  { %2841 = vmatpush.bf16.msra.mxu3 %v4366_v38  ;;  %v4350_v40 = vor.u32 %v4808_v56, %v4347_v19 }
 0x4ea   :  { %v2190_v35 = vadd.f32 %v6778_v20, %v2162_v17 }
 0x4eb   :  { %v1858_v28 = vpop.f32.mrf.mxu0  ;;  %v1987_v15 = vpop.f32.mrf.mxu1 }
 0x4ec   :  { %v2214_v39 = vmax.f32 %v2190_v35, 0.0  ;;  %v2085_v58 = vadd.f32 %v1858_v28, %v6248_v16  ;;  %v2086_v52 = vadd.f32 %v1987_v15, %v6250_v14 }
 0x4ed   :  { %3107 = vmatmul.bf16.gmra.mxu1 %v6802_v54  ;;  %v6896_v16 = vpop.f32.mrf.mxu2 }
 0x4ee   :  { %v2238_v34 = vpack.c.bf16 %v2214_v39, %v2214_v39  ;;  %3058 = vmatmul.bf16.gmra.mxu0 %v6802_v54 }
 0x4ef   :  { %v6898_v14 = vpop.f32.mrf.mxu3 }
 0x4f0   :  { %v2937_v8 = vunpack.c.l.b16 %v2238_v34 }
 0x4f2   :  { %v6866_v43 = vpack.c.b16 %v2937_v8, %v2936_v36  ;;  %v4353_v8 = vld [vmem:[%s7479_s3 + $0x110] sm:$0xf] }
 0x4f3   :  { %v1860_v10 = vpop.f32.mrf.mxu0  ;;  %v1989_v5 = vpop.f32.mrf.mxu1 }
 0x4f4   :  { %2609 = vmatmul.bf16.gmra.mxu2 %v6405_v55  ;;  %2658 = vmatmul.bf16.gmra.mxu3 %v6405_v55  ;;  %v2087_v28 = vadd.f32 %v1860_v10, %v1696_v57  ;;  %v2088_v15 = vadd.f32 %v1989_v5, %v1697_v46 }
 0x4f5   :  { %v6920_v48 = vpop.f32.mrf.mxu2 }
 0x4f6   :  { %7798 = vst [vmem:[#allocation67_spill] sm:$0xff] %v6920_v48 }
 0x4f7   :  { %v6922_v38 = vpop.f32.mrf.mxu3 }
 0x4f8   :  { %7799 = vst [vmem:[#allocation68_spill] sm:$0xff] %v6922_v38 }
 0x4fb   :  { %v1863_v62 = vpop.f32.mrf.mxu0  ;;  %v1992_v22 = vpop.f32.mrf.mxu1 }
 0x4fc   :  { %v2089_v45 = vadd.f32 %v1863_v62, %v6268_v49  ;;  %v2090_v23 = vadd.f32 %v1992_v22, %v6270_v26  ;;  %v1700_v49 = vadd.f32 %v6721_v6, %v6273_v1  ;;  %v1701_v26 = vadd.f32 %v6723_v4, %v6276_v7  ;;  %v4811_v1 = vld [vmem:[%s7479_s3 + $0x114] sm:$0xf0]  ;;  %v4810_v7 = vld [vmem:[%s7479_s3 + $0x114] sm:$0xf]  ;;  %v4355_v4 = vld [vmem:[%s7479_s3 + $0x118] sm:$0xf0] }
 0x4fd   :  { %3112 = vmatmul.bf16.gmra.mxu1 %v6866_v43  ;;  %v4354_v6 = vor.u32 %v4811_v1, %v4353_v8  ;;  %v4358_v11 = vor.u32 %v4810_v7, %v4355_v4  ;;  %v4553_v7 = vld [vmem:[%s7479_s3 + $0x260] sm:$0xf]  ;;  %v4852_v4 = vld [vmem:[%s7479_s3 + $0x264] sm:$0xf] }
 0x4fe   :  { %v2137_v17 = vmax.f32 %v2085_v58, %v2089_v45  ;;  %v2138_v35 = vmax.f32 %v2086_v52, %v2090_v23  ;;  %3063 = vmatmul.bf16.gmra.mxu0 %v6866_v43 }
 0x4ff   :  { %2793 = vmatpush.bf16.msra.mxu2 %v4354_v6  ;;  %2842 = vmatpush.bf16.msra.mxu3 %v4358_v11  ;;  %v4853_v6 = vld [vmem:[%s7479_s3 + $0x264] sm:$0xf0] }
 0x500   :  { %v2163_v31 = vmax.f32 %v2137_v17, %v2138_v35  ;;  %v6926_v17 = vpop.f32.mrf.mxu2  ;;  %v6928_v35 = vpop.f32.mrf.mxu3 }
 0x502   :  { %v2191_v34 = vadd.f32 %v6778_v20, %v2163_v31  ;;  %v4809_v31 = vld [vmem:[%s7479_s3 + $0x104] sm:$0xf0] }
 0x503   :  { %v1865_v39 = vpop.f32.mrf.mxu0  ;;  %v1994_v42 = vpop.f32.mrf.mxu1  ;;  %2843 = vmatpush.bf16.msra.mxu3 %v4350_v40  ;;  %v4537_v40 = vld [vmem:[%s7479_s3 + $0x240] sm:$0xf] }
 0x504   :  { %v2091_v3 = vadd.f32 %v1865_v39, %v1700_v49  ;;  %v2092_v36 = vadd.f32 %v1994_v42, %v1701_v26  ;;  %2614 = vmatmul.bf16.gmra.mxu2 %v6427_v9  ;;  %2663 = vmatmul.bf16.gmra.mxu3 %v6427_v9  ;;  %v2215_v37 = vmax.f32 %v2191_v34, 0.0  ;;  %v4561_v26 = vld [vmem:[%s7479_s3 + $0x270] sm:$0xf] }
 0x506   :  { %v2139_v10 = vmax.f32 %v2087_v28, %v2091_v3  ;;  %v2140_v5 = vmax.f32 %v2088_v15, %v2092_v36  ;;  %v2239_v22 = vpack.c.bf16 %v2215_v37, %v2215_v37  ;;  %v4855_v28 = vld [vmem:[%s7479_s3 + $0x274] sm:$0xf0]  ;;  %v4854_v15 = vld [vmem:[%s7479_s3 + $0x274] sm:$0xf]  ;;  %v4563_v3 = vld [vmem:[%s7479_s3 + $0x278] sm:$0xf0] }
 0x507   :  { %v4562_v34 = vor.u32 %v4855_v28, %v4561_v26  ;;  %v4566_v36 = vor.u32 %v4854_v15, %v4563_v3  ;;  %v4849_v26 = vld [vmem:[%s7479_s3 + $0x244] sm:$0xf0]  ;;  %v4848_v28 = vld [vmem:[%s7479_s3 + $0x244] sm:$0xf] }
 0x508   :  { %v2164_v30 = vmax.f32 %v2139_v10, %v2140_v5  ;;  %v3169_v52 = vunpack.c.l.b16 %v2239_v22  ;;  %v6944_v46 = vpop.f32.mrf.mxu2  ;;  %v6946_v49 = vpop.f32.mrf.mxu3  ;;  %v4554_v10 = vor.u32 %v4853_v6, %v4553_v7  ;;  %v4555_v5 = vld [vmem:[%s7479_s3 + $0x268] sm:$0xf0]  ;;  %v4545_v22 = vld [vmem:[%s7479_s3 + $0x250] sm:$0xf]  ;;  %v4538_v15 = vor.u32 %v4849_v26, %v4537_v40  ;;  %v4521_v40 = vld [vmem:[%s7479_s3 + $0x220] sm:$0xf] }
 0x509   :  { %3302 = vmatpush.bf16.msrb.mxu3 %v4566_v36  ;;  %v4558_v11 = vor.u32 %v4852_v4, %v4555_v5  ;;  %v4529_v4 = vld [vmem:[%s7479_s3 + $0x230] sm:$0xf]  ;;  %v4846_v5 = vld [vmem:[%s7479_s3 + $0x234] sm:$0xf]  ;;  %v4845_v26 = vld [vmem:[%s7479_s3 + $0x224] sm:$0xf0] }
 0x50a   :  { %v2192_v44 = vadd.f32 %v6778_v20, %v2164_v30  ;;  %v4345_v20 = vld [vmem:[%s7479_s3 + $0x100] sm:$0xf] }
 0x50b   :  { %v4346_v57 = vor.u32 %v4809_v31, %v4345_v20  ;;  %v4547_v20 = vld [vmem:[%s7479_s3 + $0x258] sm:$0xf0] }
 0x50c   :  { %v2216_v62 = vmax.f32 %v2192_v44, 0.0 }
 0x50d   :  { %2794 = vmatpush.bf16.msra.mxu2 %v4346_v57  ;;  %3303 = vmatpush.bf16.msrb.mxu3 %v4558_v11 }
 0x50e   :  { %v2240_v58 = vpack.c.bf16 %v2216_v62, %v2216_v62 }
 0x510   :  { %v3170_v45 = vunpack.c.l.b16 %v2240_v58  ;;  %v4851_v58 = vld [vmem:[%s7479_s3 + $0x254] sm:$0xf0] }
 0x511   :  { %3253 = vmatpush.bf16.msrb.mxu2 %v4562_v34  ;;  %v4539_v34 = vld [vmem:[%s7479_s3 + $0x248] sm:$0xf0] }
 0x512   :  { %v6924_v23 = vpack.c.b16 %v3170_v45, %v3169_v52  ;;  %v4850_v52 = vld [vmem:[%s7479_s3 + $0x254] sm:$0xf]  ;;  %v4546_v45 = vor.u32 %v4851_v58, %v4545_v22  ;;  %v4542_v3 = vor.u32 %v4848_v28, %v4539_v34  ;;  %v4531_v22 = vld [vmem:[%s7479_s3 + $0x238] sm:$0xf0]  ;;  %v4844_v28 = vld [vmem:[%s7479_s3 + $0x224] sm:$0xf] }
 0x513   :  { %v4550_v31 = vor.u32 %v4850_v52, %v4547_v20  ;;  %v4534_v58 = vor.u32 %v4846_v5, %v4531_v22  ;;  %v4523_v34 = vld [vmem:[%s7479_s3 + $0x228] sm:$0xf0]  ;;  %v4513_v22 = vld [vmem:[%s7479_s3 + $0x210] sm:$0xf] }
 0x514   :  { %7800 = vst [vmem:[#allocation69_spill] sm:$0xff] %v6924_v23  ;;  %2619 = vmatmul.bf16.gmra.mxu2 %v6494_v51  ;;  %2668 = vmatmul.bf16.gmra.mxu3 %v6494_v51 }
 0x515   :  { %3254 = vmatpush.bf16.msrb.mxu2 %v4554_v10  ;;  %3304 = vmatpush.bf16.msrb.mxu3 %v4550_v31  ;;  %v4847_v10 = vld [vmem:[%s7479_s3 + $0x234] sm:$0xf0] }
 0x516   :  { %v4530_v11 = vor.u32 %v4847_v10, %v4529_v4 }
 0x517   :  { %v6959_v39 = vpop.f32.mrf.mxu2  ;;  %v6961_v42 = vpop.f32.mrf.mxu3 }
 0x519   :  { %3255 = vmatpush.bf16.msrb.mxu2 %v4546_v45  ;;  %3305 = vmatpush.bf16.msrb.mxu3 %v4542_v3  ;;  %v4526_v3 = vor.u32 %v4844_v28, %v4523_v34  ;;  %v4515_v28 = vld [vmem:[%s7479_s3 + $0x218] sm:$0xf0] }
 0x51d   :  { %3256 = vmatpush.bf16.msrb.mxu2 %v4538_v15  ;;  %3306 = vmatpush.bf16.msrb.mxu3 %v4534_v58  ;;  %v4522_v15 = vor.u32 %v4845_v26, %v4521_v40  ;;  %v4843_v58 = vld [vmem:[%s7479_s3 + $0x214] sm:$0xf0]  ;;  %v4842_v40 = vld [vmem:[%s7479_s3 + $0x214] sm:$0xf] }
 0x51e   :  { %v4514_v26 = vor.u32 %v4843_v58, %v4513_v22  ;;  %v4505_v22 = vld [vmem:[%s7479_s3 + $0x200] sm:$0xf]  ;;  %v4841_v58 = vld [vmem:[%s7479_s3 + $0x204] sm:$0xf0] }
 0x51f   :  { %v6966_v8 = vpop.f32.mrf.mxu2  ;;  %v6968_v1 = vpop.f32.mrf.mxu3 }
 0x520   :  { %7801 = vst [vmem:[#allocation70_spill] sm:$0xff] %v6966_v8 }
 0x521   :  { %7802 = vst [vmem:[#allocation71_spill] sm:$0xff] %v6968_v1  ;;  %3257 = vmatpush.bf16.msrb.mxu2 %v4530_v11  ;;  %3307 = vmatpush.bf16.msrb.mxu3 %v4526_v3 }
 0x524   :  { %2624 = vmatmul.bf16.gmra.mxu2 %v6631_v60  ;;  %2673 = vmatmul.bf16.gmra.mxu3 %v6631_v60 }
 0x525   :  { %3258 = vmatpush.bf16.msrb.mxu2 %v4522_v15  ;;  %v4518_v15 = vor.u32 %v4842_v40, %v4515_v28  ;;  %v4840_v40 = vld [vmem:[%s7479_s3 + $0x204] sm:$0xf]  ;;  %v4507_v28 = vld [vmem:[%s7479_s3 + $0x208] sm:$0xf0] }
 0x527   :  { %3308 = vmatpush.bf16.msrb.mxu3 %v4518_v15  ;;  %v4510_v15 = vor.u32 %v4840_v40, %v4507_v28 }
 0x529   :  { %3259 = vmatpush.bf16.msrb.mxu2 %v4514_v26  ;;  %v4506_v26 = vor.u32 %v4841_v58, %v4505_v22 }
 0x52b   :  { %3309 = vmatpush.bf16.msrb.mxu3 %v4510_v15 }
 0x52d   :  { %3260 = vmatpush.bf16.msrb.mxu2 %v4506_v26 }
 0x534   :  { %2629 = vmatmul.bf16.gmra.mxu2 %v6677_v2  ;;  %2678 = vmatmul.bf16.gmra.mxu3 %v6677_v2 }
 0x537   :  { %v6984_v30 = vpop.f32.mrf.mxu2  ;;  %v6986_v37 = vpop.f32.mrf.mxu3 }
 0x538   :  { %7803 = vst [vmem:[#allocation72_spill] sm:$0xff] %v6984_v30 }
 0x539   :  { %7804 = vst [vmem:[#allocation73_spill] sm:$0xff] %v6986_v37 }
 0x53f   :  { %v6988_v44 = vpop.f32.mrf.mxu2  ;;  %v6990_v62 = vpop.f32.mrf.mxu3 }
 0x540   :  { %7805 = vst [vmem:[#allocation74_spill] sm:$0xff] %v6988_v44 }
 0x541   :  { %7806 = vst [vmem:[#allocation12_spill] sm:$0xff] %v6990_v62 }
 0x544   :  { %2795 = vmatmul.bf16.vlgmr.msra.gmra.mxu2 %v6383_v50  ;;  %2844 = vmatmul.bf16.vlgmr.msra.gmra.mxu3 %v6383_v50 }
 0x547   :  { %v7006_v56 = vpop.f32.mrf.mxu2  ;;  %v7008_v50 = vpop.f32.mrf.mxu3 }
 0x548   :  { %v2596_v23 = vadd.f32 %v7006_v56, %v6753_v29 }
 0x54f   :  { %v7010_v57 = vpop.f32.mrf.mxu2  ;;  %v7012_v19 = vpop.f32.mrf.mxu3 }
 0x554   :  { %2800 = vmatmul.bf16.gmra.mxu2 %v6405_v55  ;;  %2849 = vmatmul.bf16.gmra.mxu3 %v6405_v55 }
 0x557   :  { %v7028_v36 = vpop.f32.mrf.mxu2  ;;  %v7030_v55 = vpop.f32.mrf.mxu3 }
 0x55f   :  { %v7032_v7 = vpop.f32.mrf.mxu2  ;;  %v7034_v6 = vpop.f32.mrf.mxu3 }
 0x560   :  { %v2652_v56 = vadd.f32 %v7034_v6, %v6817_v63 }
 0x564   :  { %2805 = vmatmul.bf16.gmra.mxu2 %v6427_v9  ;;  %2854 = vmatmul.bf16.gmra.mxu3 %v6427_v9 }
 0x567   :  { %v7050_v52 = vpop.f32.mrf.mxu2  ;;  %v7052_v45 = vpop.f32.mrf.mxu3 }
 0x56f   :  { %v7054_v20 = vpop.f32.mrf.mxu2  ;;  %v7056_v31 = vpop.f32.mrf.mxu3 }
 0x570   :  { %v2657_v6 = vadd.f32 %v7056_v31, %v6845_v59 }
 0x574   :  { %2810 = vmatmul.bf16.gmra.mxu2 %v6494_v51  ;;  %2859 = vmatmul.bf16.gmra.mxu3 %v6494_v51 }
 0x577   :  { %v7072_v4 = vpop.f32.mrf.mxu2  ;;  %v7074_v10 = vpop.f32.mrf.mxu3 }
 0x57f   :  { %v7076_v5 = vpop.f32.mrf.mxu2  ;;  %v7078_v11 = vpop.f32.mrf.mxu3 }
 0x580   :  { %v2613_v31 = vadd.f32 %v7076_v5, %v6882_v0 }
 0x584   :  { %2815 = vmatmul.bf16.gmra.mxu2 %v6631_v60  ;;  %2864 = vmatmul.bf16.gmra.mxu3 %v6631_v60 }
 0x587   :  { %v7094_v34 = vpop.f32.mrf.mxu2  ;;  %v7096_v3 = vpop.f32.mrf.mxu3 }
 0x58f   :  { %v7098_v38 = vpop.f32.mrf.mxu2  ;;  %v7100_v48 = vpop.f32.mrf.mxu3 }
 0x590   :  { %7807 = vst [vmem:[#allocation75_spill] sm:$0xff] %v7098_v38 }
 0x591   :  { %7808 = vst [vmem:[#allocation76_spill] sm:$0xff] %v7100_v48 }
 0x594   :  { %2820 = vmatmul.bf16.gmra.mxu2 %v6677_v2  ;;  %2869 = vmatmul.bf16.gmra.mxu3 %v6677_v2 }
 0x597   :  { %v7116_v48 = vpop.f32.mrf.mxu2  ;;  %v7118_v38 = vpop.f32.mrf.mxu3 }
 0x59f   :  { %v7120_v62 = vpop.f32.mrf.mxu2  ;;  %v7122_v44 = vpop.f32.mrf.mxu3 }
 0x5a4   :  { %2825 = vmatmul.bf16.gmra.mxu2 %v6725_v33  ;;  %2874 = vmatmul.bf16.gmra.mxu3 %v6725_v33 }
 0x5a7   :  { %v7126_v22 = vpop.f32.mrf.mxu2  ;;  %v7128_v58 = vpop.f32.mrf.mxu3 }
 0x5a8   :  { %7809 = vst [vmem:[#allocation6_spill] sm:$0xff] %v7128_v58 }
 0x5af   :  { %v7130_v37 = vpop.f32.mrf.mxu2  ;;  %v7132_v40 = vpop.f32.mrf.mxu3 }
 0x5b0   :  { %7810 = vst [vmem:[#allocation7_spill] sm:$0xff] %v7130_v37 }
 0x5b1   :  { %7811 = vst [vmem:[#allocation17_spill] sm:$0xff] %v7132_v40  ;;  %v2645_v40 = vadd.f32 %v7008_v50, %v6755_v18  ;;  %v2601_v18 = vadd.f32 %v7028_v36, %v6783_v21 }
 0x5b4   :  { %2830 = vmatmul.bf16.gmra.mxu2 %v6802_v54  ;;  %2879 = vmatmul.bf16.gmra.mxu3 %v6802_v54 }
 0x5b7   :  { %v7136_v26 = vpop.f32.mrf.mxu2  ;;  %v7138_v28 = vpop.f32.mrf.mxu3 }
 0x5b8   :  { %7812 = vst [vmem:[#allocation4_spill] sm:$0xff] %v7136_v26 }
 0x5b9   :  { %7813 = vst [vmem:[#allocation5_spill] sm:$0xff] %v7138_v28 }
 0x5bf   :  { %v7140_v15 = vpop.f32.mrf.mxu2  ;;  %v7142_v30 = vpop.f32.mrf.mxu3 }
 0x5c0   :  { %7814 = vst [vmem:[#allocation8_spill] sm:$0xff] %v7140_v15  ;;  %v2598_v15 = vadd.f32 %v7010_v57, %v6771_v41 }
 0x5c1   :  { %7815 = vst [vmem:[#allocation9_spill] sm:$0xff] %v7142_v30  ;;  %v2647_v30 = vadd.f32 %v7012_v19, %v6773_v24  ;;  %v2655_v19 = vadd.f32 %v7052_v45, %v6828_v32  ;;  %v2611_v32 = vadd.f32 %v7072_v4, %v6862_v47  ;;  %v2665_v4 = vadd.f32 %v7096_v3, %v6898_v14 }
 0x5c4   :  { %3261 = vmatmul.bf16.vlgmr.msrb.gmra.mxu2 %v6427_v9  ;;  %3310 = vmatmul.bf16.vlgmr.msrb.gmra.mxu3 %v6427_v9 }
 0x5c7   :  { %v2796_v1 = vpop.f32.mrf.mxu2  ;;  %v2845_v37 = vpop.f32.mrf.mxu3 }
 0x5c8   :  { %v7150_v8 = vadd.f32 %v2796_v1, %v2596_v23  ;;  %v7152_v26 = vadd.f32 %v2845_v37, %v2645_v40  ;;  %v2650_v23 = vadd.f32 %v7030_v55, %v6785_v61  ;;  %v2606_v61 = vadd.f32 %v7050_v52, %v6826_v53 }
 0x5c9   :  { %v2660_v52 = vadd.f32 %v7074_v10, %v6864_v13  ;;  %v2616_v13 = vadd.f32 %v7094_v34, %v6896_v16  ;;  %v2670_v16 = vadd.f32 %v7118_v38, %v6928_v35  ;;  %v7250_v38 = vpop.f32.mrf.mxu0  ;;  %v2626_v35 = vadd.f32 %v7126_v22, %v6959_v39 }
 0x5cf   :  { %v2798_v28 = vpop.f32.mrf.mxu2  ;;  %v2847_v9 = vpop.f32.mrf.mxu3 }
 0x5d0   :  { %v7158_v58 = vadd.f32 %v2798_v28, %v2598_v15  ;;  %v7160_v29 = vadd.f32 %v2847_v9, %v2647_v30  ;;  %v2603_v30 = vadd.f32 %v7032_v7, %v6815_v27  ;;  %v2608_v7 = vadd.f32 %v7054_v20, %v6843_v25 }
 0x5d1   :  { %v2662_v15 = vadd.f32 %v7078_v11, %v6884_v12 }
 0x5d4   :  { %3266 = vmatmul.bf16.gmra.mxu2 %v6494_v51  ;;  %3315 = vmatmul.bf16.gmra.mxu3 %v6494_v51 }
 0x5d7   :  { %v2801_v41 = vpop.f32.mrf.mxu2  ;;  %v2850_v1 = vpop.f32.mrf.mxu3 }
 0x5d8   :  { %v7168_v37 = vadd.f32 %v2801_v41, %v2601_v18  ;;  %v7170_v24 = vadd.f32 %v2850_v1, %v2650_v23  ;;  %v2623_v1 = vadd.f32 %v7120_v62, %v6944_v46  ;;  %v7816_v46 = vld [vmem:[#allocation6_spill] sm:$0xff] }
 0x5df   :  { %v2803_v50 = vpop.f32.mrf.mxu2  ;;  %v2852_v51 = vpop.f32.mrf.mxu3 }
 0x5e0   :  { %v7176_v57 = vadd.f32 %v2803_v50, %v2603_v30  ;;  %v7178_v21 = vadd.f32 %v2852_v51, %v2652_v56  ;;  %v2672_v30 = vadd.f32 %v7122_v44, %v6946_v49  ;;  %v2675_v49 = vadd.f32 %v7816_v46, %v6961_v42  ;;  %v7269_v42 = vpop.f32.mrf.mxu0  ;;  %v7826_v46 = vld [vmem:[#allocation74_spill] sm:$0xff] }
 0x5e4   :  { %3271 = vmatmul.bf16.gmra.mxu2 %v6631_v60  ;;  %3320 = vmatmul.bf16.gmra.mxu3 %v6631_v60 }
 0x5e7   :  { %v2806_v27 = vpop.f32.mrf.mxu2  ;;  %v2855_v36 = vpop.f32.mrf.mxu3 }
 0x5e8   :  { %v7186_v55 = vadd.f32 %v2806_v27, %v2606_v61  ;;  %v7188_v63 = vadd.f32 %v2855_v36, %v2655_v19  ;;  %v7817_v19 = vld [vmem:[#allocation70_spill] sm:$0xff]  ;;  %v7818_v27 = vld [vmem:[#allocation7_spill] sm:$0xff] }
 0x5e9   :  { %v2628_v36 = vadd.f32 %v7818_v27, %v7817_v19 }
 0x5ef   :  { %v2808_v40 = vpop.f32.mrf.mxu2  ;;  %v2857_v60 = vpop.f32.mrf.mxu3 }
 0x5f0   :  { %v7194_v28 = vadd.f32 %v2808_v40, %v2608_v7  ;;  %v7196_v53 = vadd.f32 %v2857_v60, %v2657_v6  ;;  %v7819_v7 = vld [vmem:[#allocation71_spill] sm:$0xff]  ;;  %v7820_v6 = vld [vmem:[#allocation17_spill] sm:$0xff] }
 0x5f1   :  { %v2677_v39 = vadd.f32 %v7820_v6, %v7819_v7 }
 0x5f4   :  { %3276 = vmatmul.bf16.gmra.mxu2 %v6677_v2  ;;  %3325 = vmatmul.bf16.gmra.mxu3 %v6677_v2 }
 0x5f7   :  { %v2811_v25 = vpop.f32.mrf.mxu2  ;;  %v2860_v45 = vpop.f32.mrf.mxu3 }
 0x5f8   :  { %v7204_v20 = vadd.f32 %v2811_v25, %v2611_v32  ;;  %v7206_v59 = vadd.f32 %v2860_v45, %v2660_v52  ;;  %v4887_v25 = vld [vmem:[%s7482_s5 + $0xf8] sm:$0xff] }
 0x5f9   :  { %v4863_v45 = vld [vmem:[%s7482_s5 + $0x38] sm:$0xff]  ;;  %3762 = vmatpush.bf16.msra.mxu3 %v4887_v25  ;;  %v4878_v25 = vld [vmem:[%s7482_s5 + $0xb0] sm:$0xff] }
 0x5fa   :  { %3590 = vmatpush.bf16.msra.mxu1 %v4863_v45  ;;  %v4858_v45 = vld [vmem:[%s7482_s5 + $0x10] sm:$0xff] }
 0x5ff   :  { %v2813_v9 = vpop.f32.mrf.mxu2  ;;  %v2862_v2 = vpop.f32.mrf.mxu3 }
 0x600   :  { %v7212_v18 = vadd.f32 %v2813_v9, %v2613_v31  ;;  %v7214_v47 = vadd.f32 %v2862_v2, %v2662_v15  ;;  %v4871_v31 = vld [vmem:[%s7482_s5 + $0x78] sm:$0xff]  ;;  %v4862_v15 = vld [vmem:[%s7482_s5 + $0x30] sm:$0xff] }
 0x601   :  { %3522 = vmatpush.bf16.msra.mxu0 %v4871_v31  ;;  %v7821_v9 = vld [vmem:[#allocation69_spill] sm:$0xff]  ;;  %v7822_v2 = vld [vmem:[#allocation72_spill] sm:$0xff]  ;;  %3591 = vmatpush.bf16.msra.mxu1 %v4862_v15 }
 0x604   :  { %3281 = vmatmul.bf16.gmra.mxu2 %v6725_v33  ;;  %3330 = vmatmul.bf16.gmra.mxu3 %v6725_v33  ;;  %v2621_v33 = vadd.f32 %v7116_v48, %v6926_v17  ;;  %v7252_v17 = vpop.f32.mrf.mxu1 }
 0x607   :  { %v2816_v0 = vpop.f32.mrf.mxu2  ;;  %v2865_v10 = vpop.f32.mrf.mxu3 }
 0x608   :  { %v7222_v5 = vadd.f32 %v2816_v0, %v2616_v13  ;;  %v7224_v12 = vadd.f32 %v2865_v10, %v2665_v4  ;;  %v7823_v13 = vld [vmem:[#allocation4_spill] sm:$0xff]  ;;  %v7824_v0 = vld [vmem:[#allocation73_spill] sm:$0xff] }
 0x609   :  { %v2631_v4 = vadd.f32 %v7823_v13, %v7822_v2  ;;  %v7825_v10 = vld [vmem:[#allocation5_spill] sm:$0xff]  ;;  %v4856_v2 = vld [vmem:[%s7482_s5] sm:$0xff] }
 0x60c   :  { %v7271_v60 = vpop.f32.mrf.mxu1 }
 0x60f   :  { %v7226_v11 = vpop.f32.mrf.mxu2  ;;  %v7228_v23 = vpop.f32.mrf.mxu3 }
 0x614   :  { %3286 = vmatmul.bf16.gmra.mxu2 %v6802_v54  ;;  %3335 = vmatmul.bf16.gmra.mxu3 %v6802_v54 }
 0x617   :  { %v2821_v14 = vpop.f32.mrf.mxu2  ;;  %v2870_v34 = vpop.f32.mrf.mxu3 }
 0x618   :  { %v7236_v3 = vadd.f32 %v2821_v14, %v2621_v33  ;;  %v7238_v41 = vadd.f32 %v2870_v34, %v2670_v16  ;;  %v2680_v33 = vadd.f32 %v7825_v10, %v7824_v0  ;;  %v4886_v0 = vld [vmem:[%s7482_s5 + $0xf0] sm:$0xff] }
 0x619   :  { %v4870_v10 = vld [vmem:[%s7482_s5 + $0x70] sm:$0xff]  ;;  %3763 = vmatpush.bf16.msra.mxu3 %v4886_v0 }
 0x61a   :  { %3523 = vmatpush.bf16.msra.mxu0 %v4870_v10 }
 0x61f   :  { %v2823_v56 = vpop.f32.mrf.mxu2  ;;  %v2872_v54 = vpop.f32.mrf.mxu3 }
 0x620   :  { %v7244_v50 = vadd.f32 %v2823_v56, %v2623_v1  ;;  %v7246_v48 = vadd.f32 %v2872_v54, %v2672_v30  ;;  %v4861_v30 = vld [vmem:[%s7482_s5 + $0x28] sm:$0xff]  ;;  %v3034_v56 = vpop.f32.mrf.mxu0  ;;  %v3083_v54 = vpop.f32.mrf.mxu1 }
 0x621   :  { %3592 = vmatpush.bf16.msra.mxu1 %v4861_v30  ;;  %v4885_v30 = vld [vmem:[%s7482_s5 + $0xe8] sm:$0xff] }
 0x622   :  { %3764 = vmatpush.bf16.msra.mxu3 %v4885_v30 }
 0x624   :  { %3291 = vmatmul.bf16.gmra.mxu2 %v6866_v43  ;;  %3340 = vmatmul.bf16.gmra.mxu3 %v6866_v43  ;;  %v4879_v43 = vld [vmem:[%s7482_s5 + $0xb8] sm:$0xff] }
 0x625   :  { %3675 = vmatpush.bf16.msra.mxu2 %v4879_v43  ;;  %v7829_v43 = vld [vmem:[#allocation9_spill] sm:$0xff] }
 0x627   :  { %v2826_v44 = vpop.f32.mrf.mxu2  ;;  %v2875_v62 = vpop.f32.mrf.mxu3 }
 0x628   :  { %v7258_v51 = vadd.f32 %v2826_v44, %v2626_v35  ;;  %v7260_v61 = vadd.f32 %v2875_v62, %v2675_v49  ;;  %v4860_v35 = vld [vmem:[%s7482_s5 + $0x20] sm:$0xff]  ;;  %v7827_v49 = vld [vmem:[#allocation8_spill] sm:$0xff] }
 0x629   :  { %v2633_v44 = vadd.f32 %v7827_v49, %v7826_v46  ;;  %v7828_v62 = vld [vmem:[#allocation12_spill] sm:$0xff]  ;;  %3593 = vmatpush.bf16.msra.mxu1 %v4860_v35  ;;  %3676 = vmatpush.bf16.msra.mxu2 %v4878_v25  ;;  %v4869_v35 = vld [vmem:[%s7482_s5 + $0x68] sm:$0xff]  ;;  %v3118_v46 = vadd.f32 %v7250_v38, %v7150_v8  ;;  %v3119_v49 = vadd.f32 %v7252_v17, %v7152_v26  ;;  %v7360_v26 = vld [vmem:[%s7481_s4] ss:$0 sm:$0xff] }
 0x62a   :  { %v2682_v19 = vadd.f32 %v7829_v43, %v7828_v62  ;;  %3524 = vmatpush.bf16.msra.mxu0 %v4869_v35  ;;  %v3123_v62 = vadd.f32 %v3083_v54, %v7170_v24  ;;  %v3120_v24 = vadd.f32 %v7269_v42, %v7158_v58  ;;  %v3121_v38 = vadd.f32 %v7271_v60, %v7160_v29  ;;  %v4867_v58 = vld [vmem:[%s7482_s5 + $0x58] sm:$0xff] }
 0x62f   :  { %v2828_v22 = vpop.f32.mrf.mxu2  ;;  %v2877_v40 = vpop.f32.mrf.mxu3 }
 0x630   :  { %v7273_v32 = vadd.f32 %v2828_v22, %v2628_v36  ;;  %v7275_v52 = vadd.f32 %v2877_v40, %v2677_v39  ;;  %v4859_v39 = vld [vmem:[%s7482_s5 + $0x18] sm:$0xff]  ;;  %v3036_v22 = vpop.f32.mrf.mxu0  ;;  %v3085_v40 = vpop.f32.mrf.mxu1 }
 0x631   :  { %3594 = vmatpush.bf16.msra.mxu1 %v4859_v39  ;;  %v3124_v17 = vadd.f32 %v3036_v22, %v7176_v57  ;;  %v4876_v22 = vld [vmem:[%s7482_s5 + $0xa0] sm:$0xff] }
 0x634   :  { %3296 = vmatmul.bf16.gmra.mxu2 %v7821_v9  ;;  %3345 = vmatmul.bf16.gmra.mxu3 %v7821_v9  ;;  %v4857_v9 = vld [vmem:[%s7482_s5 + $0x8] sm:$0xff] }
 0x635   :  { %3595 = vmatpush.bf16.msra.mxu1 %v4858_v45 }
 0x637   :  { %v2831_v16 = vpop.f32.mrf.mxu2  ;;  %v2880_v14 = vpop.f32.mrf.mxu3 }
 0x638   :  { %v7295_v34 = vadd.f32 %v2831_v16, %v2631_v4  ;;  %v7297_v1 = vadd.f32 %v2880_v14, %v2680_v33  ;;  %v7328_v13 = vpop.f32.mrf.mxu0  ;;  %v7330_v4 = vpop.f32.mrf.mxu1  ;;  %v4877_v33 = vld [vmem:[%s7482_s5 + $0xa8] sm:$0xff] }
 0x639   :  { %3596 = vmatpush.bf16.msra.mxu1 %v4857_v9  ;;  %3677 = vmatpush.bf16.msra.mxu2 %v4877_v33 }
 0x63d   :  { %3597 = vmatpush.bf16.msra.mxu1 %v4856_v2  ;;  %3678 = vmatpush.bf16.msra.mxu2 %v4876_v22 }
 0x63f   :  { %v2833_v27 = vpop.f32.mrf.mxu2  ;;  %v2882_v36 = vpop.f32.mrf.mxu3 }
 0x640   :  { %v7309_v7 = vadd.f32 %v2833_v27, %v2633_v44  ;;  %v7311_v6 = vadd.f32 %v2882_v36, %v2682_v19  ;;  %v3122_v44 = vadd.f32 %v3034_v56, %v7168_v37  ;;  %v7353_v27 = vpop.f32.mrf.mxu0  ;;  %v7355_v36 = vpop.f32.mrf.mxu1  ;;  %v4868_v37 = vld [vmem:[%s7482_s5 + $0x60] sm:$0xff]  ;;  %v3125_v56 = vadd.f32 %v3085_v40, %v7178_v21  ;;  %v4866_v40 = vld [vmem:[%s7482_s5 + $0x50] sm:$0xff] }
 0x641   :  { %3525 = vmatpush.bf16.msra.mxu0 %v4868_v37  ;;  %v4875_v37 = vld [vmem:[%s7482_s5 + $0x98] sm:$0xff] }
 0x642   :  { %3679 = vmatpush.bf16.msra.mxu2 %v4875_v37 }
 0x645   :  { %3526 = vmatpush.bf16.msra.mxu0 %v4867_v58 }
 0x647   :  { %v3262_v31 = vpop.f32.mrf.mxu2  ;;  %v3311_v15 = vpop.f32.mrf.mxu3 }
 0x648   :  { %v3351_v39 = vadd.f32 %v3262_v31, %v3118_v46  ;;  %v3352_v25 = vadd.f32 %v3311_v15, %v3119_v49  ;;  %v3044_v42 = vpop.f32.mrf.mxu0  ;;  %v3093_v46 = vpop.f32.mrf.mxu1 }
 0x649   :  { %3527 = vmatpush.bf16.msra.mxu0 %v4866_v40 }
 0x64f   :  { %v3264_v16 = vpop.f32.mrf.mxu2  ;;  %v3313_v14 = vpop.f32.mrf.mxu3 }
 0x650   :  { %v3353_v54 = vadd.f32 %v3264_v16, %v3120_v24  ;;  %v3354_v10 = vadd.f32 %v3313_v14, %v3121_v38 }
 0x657   :  { %v3267_v43 = vpop.f32.mrf.mxu2  ;;  %v3316_v19 = vpop.f32.mrf.mxu3 }
 0x658   :  { %v3355_v45 = vadd.f32 %v3267_v43, %v3122_v44  ;;  %v3356_v9 = vadd.f32 %v3316_v19, %v3123_v62  ;;  %v4865_v43 = vld [vmem:[%s7482_s5 + $0x48] sm:$0xff] }
 0x659   :  { %3528 = vmatpush.bf16.msra.mxu0 %v4865_v43 }
 0x65a   :  { %v3383_v2 = vmax.f32 %v3351_v39, %v3355_v45  ;;  %v3384_v0 = vmax.f32 %v3352_v25, %v3356_v9  ;;  %v3046_v39 = vpop.f32.mrf.mxu0  ;;  %v3095_v25 = vpop.f32.mrf.mxu1 }
 0x65c   :  { %v3399_v8 = vmax.f32 %v3383_v2, %v3384_v0  ;;  %v4864_v2 = vld [vmem:[%s7482_s5 + $0x40] sm:$0xff] }
 0x65d   :  { %3529 = vmatpush.bf16.msra.mxu0 %v4864_v2 }
 0x65e   :  { %v3411_v33 = vadd.f32 %v7360_v26, %v3399_v8  ;;  %v4884_v8 = vld [vmem:[%s7482_s5 + $0xe0] sm:$0xff] }
 0x65f   :  { %v3269_v31 = vpop.f32.mrf.mxu2  ;;  %v3318_v15 = vpop.f32.mrf.mxu3  ;;  %3765 = vmatpush.bf16.msra.mxu3 %v4884_v8 }
 0x660   :  { %v3357_v30 = vadd.f32 %v3269_v31, %v3124_v17  ;;  %v3358_v35 = vadd.f32 %v3318_v15, %v3125_v56  ;;  %v3419_v57 = vmax.f32 %v3411_v33, 0.0  ;;  %v4883_v17 = vld [vmem:[%s7482_s5 + $0xd8] sm:$0xff]  ;;  %v3126_v31 = vadd.f32 %v7328_v13, %v7186_v55 }
 0x661   :  { %v3127_v15 = vadd.f32 %v7330_v4, %v7188_v63  ;;  %v3131_v33 = vadd.f32 %v3093_v46, %v7206_v59  ;;  %v3129_v55 = vadd.f32 %v7355_v36, %v7196_v53  ;;  %v3132_v63 = vadd.f32 %v3046_v39, %v7212_v18  ;;  %v4874_v53 = vld [vmem:[%s7482_s5 + $0x90] sm:$0xff] }
 0x662   :  { %v3385_v29 = vmax.f32 %v3353_v54, %v3357_v30  ;;  %v3386_v60 = vmax.f32 %v3354_v10, %v3358_v35  ;;  %v3427_v44 = vpack.c.bf16 %v3419_v57, %v3419_v57  ;;  %v3049_v56 = vpop.f32.mrf.mxu0  ;;  %v3098_v54 = vpop.f32.mrf.mxu1  ;;  %v3130_v10 = vadd.f32 %v3044_v42, %v7204_v20  ;;  %3680 = vmatpush.bf16.msra.mxu2 %v4874_v53 }
 0x663   :  { %3766 = vmatpush.bf16.msra.mxu3 %v4883_v17  ;;  %v3133_v20 = vadd.f32 %v3095_v25, %v7214_v47  ;;  %v4882_v17 = vld [vmem:[%s7482_s5 + $0xd0] sm:$0xff] }
 0x664   :  { %v3400_v21 = vmax.f32 %v3385_v29, %v3386_v60  ;;  %v3538_v45 = vunpack.c.l.b16 %v3427_v44 }
 0x666   :  { %v3412_v16 = vadd.f32 %v7360_v26, %v3400_v21 }
 0x667   :  { %v3272_v14 = vpop.f32.mrf.mxu2  ;;  %v3321_v49 = vpop.f32.mrf.mxu3  ;;  %3767 = vmatpush.bf16.msra.mxu3 %v4882_v17 }
 0x668   :  { %v3420_v62 = vmax.f32 %v3412_v16, 0.0  ;;  %v3359_v58 = vadd.f32 %v3272_v14, %v3126_v31  ;;  %v3360_v29 = vadd.f32 %v3321_v49, %v3127_v15  ;;  %v3128_v16 = vadd.f32 %v7353_v27, %v7194_v28 }
 0x66a   :  { %v3428_v19 = vpack.c.bf16 %v3420_v62, %v3420_v62  ;;  %v3051_v42 = vpop.f32.mrf.mxu0  ;;  %v3100_v46 = vpop.f32.mrf.mxu1 }
 0x66c   :  { %v3539_v9 = vunpack.c.l.b16 %v3428_v19 }
 0x66e   :  { %v3540_v0 = vpack.c.b16 %v3539_v9, %v3538_v45  ;;  %v4873_v45 = vld [vmem:[%s7482_s5 + $0x88] sm:$0xff] }
 0x66f   :  { %v3274_v24 = vpop.f32.mrf.mxu2  ;;  %v3323_v38 = vpop.f32.mrf.mxu3  ;;  %3681 = vmatpush.bf16.msra.mxu2 %v4873_v45 }
 0x670   :  { %3598 = vmatmul.bf16.vlgmr.msra.gmra.mxu1 %v3540_v0  ;;  %v3361_v59 = vadd.f32 %v3274_v24, %v3128_v16  ;;  %v3362_v14 = vadd.f32 %v3323_v38, %v3129_v55  ;;  %v4872_v24 = vld [vmem:[%s7482_s5 + $0x80] sm:$0xff]  ;;  %v7833_v16 = vld [vmem:[#allocation76_spill] sm:$0xff] }
 0x672   :  { %v3054_v9 = vpop.f32.mrf.mxu0  ;;  %v3103_v2 = vpop.f32.mrf.mxu1 }
 0x673   :  { %3682 = vmatpush.bf16.msra.mxu2 %v4872_v24 }
 0x677   :  { %v3277_v30 = vpop.f32.mrf.mxu2  ;;  %v3326_v35 = vpop.f32.mrf.mxu3 }
 0x678   :  { %v3363_v60 = vadd.f32 %v3277_v30, %v3130_v10  ;;  %v3364_v57 = vadd.f32 %v3326_v35, %v3131_v33  ;;  %v4881_v10 = vld [vmem:[%s7482_s5 + $0xc8] sm:$0xff]  ;;  %v3134_v35 = vadd.f32 %v3049_v56, %v7222_v5 }
 0x679   :  { %3768 = vmatpush.bf16.msra.mxu3 %v4881_v10 }
 0x67a   :  { %v3387_v21 = vmax.f32 %v3359_v58, %v3363_v60  ;;  %v3388_v22 = vmax.f32 %v3360_v29, %v3364_v57  ;;  %v3056_v33 = vpop.f32.mrf.mxu0  ;;  %v3105_v30 = vpop.f32.mrf.mxu1  ;;  %v3135_v58 = vadd.f32 %v3098_v54, %v7224_v12  ;;  %v3138_v29 = vadd.f32 %v3054_v9, %v7236_v3  ;;  %v7830_v57 = vld [vmem:[#allocation67_spill] sm:$0xff] }
 0x67b   :  { %v3139_v60 = vadd.f32 %v3103_v2, %v7238_v41 }
 0x67c   :  { %v3401_v40 = vmax.f32 %v3387_v21, %v3388_v22  ;;  %v7831_v21 = vld [vmem:[#allocation75_spill] sm:$0xff] }
 0x67d   :  { %v2618_v22 = vadd.f32 %v7831_v21, %v7830_v57 }
 0x67e   :  { %v3413_v49 = vadd.f32 %v7360_v26, %v3401_v40  ;;  %v7832_v40 = vld [vmem:[#allocation68_spill] sm:$0xff] }
 0x67f   :  { %v3279_v13 = vpop.f32.mrf.mxu2  ;;  %v3328_v4 = vpop.f32.mrf.mxu3  ;;  %v2667_v55 = vadd.f32 %v7833_v16, %v7832_v40  ;;  %v2903_v5 = vadd.f32 %v7226_v11, %v2618_v22 }
 0x680   :  { %v3365_v44 = vadd.f32 %v3279_v13, %v3132_v63  ;;  %v3366_v62 = vadd.f32 %v3328_v4, %v3133_v20  ;;  %v3421_v28 = vmax.f32 %v3413_v49, 0.0 }
 0x681   :  { %v2904_v12 = vadd.f32 %v7228_v23, %v2667_v55  ;;  %v3136_v41 = vadd.f32 %v3051_v42, %v2903_v5 }
 0x682   :  { %v3389_v43 = vmax.f32 %v3361_v59, %v3365_v44  ;;  %v3390_v19 = vmax.f32 %v3362_v14, %v3366_v62  ;;  %v3429_v39 = vpack.c.bf16 %v3421_v28, %v3421_v28  ;;  %v3059_v49 = vpop.f32.mrf.mxu0  ;;  %v3108_v44 = vpop.f32.mrf.mxu1 }
 0x683   :  { %v3137_v62 = vadd.f32 %v3100_v46, %v2904_v12 }
 0x684   :  { %v3402_v27 = vmax.f32 %v3389_v43, %v3390_v19  ;;  %v3470_v8 = vunpack.c.l.b16 %v3429_v39  ;;  %v3140_v43 = vadd.f32 %v3056_v33, %v7244_v50  ;;  %v3141_v19 = vadd.f32 %v3105_v30, %v7246_v48 }
 0x685   :  { %v3142_v30 = vadd.f32 %v3059_v49, %v7258_v51 }
 0x686   :  { %v3414_v18 = vadd.f32 %v7360_v26, %v3402_v27 }
 0x687   :  { %v3282_v47 = vpop.f32.mrf.mxu2  ;;  %v3331_v36 = vpop.f32.mrf.mxu3 }
 0x688   :  { %v3422_v25 = vmax.f32 %v3414_v18, 0.0  ;;  %v3367_v59 = vadd.f32 %v3282_v47, %v3134_v35  ;;  %v3368_v13 = vadd.f32 %v3331_v36, %v3135_v58  ;;  %v3143_v35 = vadd.f32 %v3108_v44, %v7260_v61 }
 0x68a   :  { %v3430_v0 = vpack.c.bf16 %v3422_v25, %v3422_v25  ;;  %v3110_v48 = vpop.f32.mrf.mxu1 }
 0x68b   :  { %v3145_v51 = vadd.f32 %v3110_v48, %v7275_v52 }
 0x68c   :  { %v3471_v37 = vunpack.c.l.b16 %v3430_v0  ;;  %v3061_v0 = vpop.f32.mrf.mxu0 }
 0x68e   :  { %v3472_v38 = vpack.c.b16 %v3471_v37, %v3470_v8 }
 0x68f   :  { %v3284_v31 = vpop.f32.mrf.mxu2  ;;  %v3333_v15 = vpop.f32.mrf.mxu3 }
 0x690   :  { %3530 = vmatmul.bf16.vlgmr.msra.gmra.mxu0 %v3472_v38  ;;  %v3369_v28 = vadd.f32 %v3284_v31, %v3136_v41  ;;  %v3370_v18 = vadd.f32 %v3333_v15, %v3137_v62  ;;  %v4880_v38 = vld [vmem:[%s7482_s5 + $0xc0] sm:$0xff] }
 0x691   :  { %3769 = vmatpush.bf16.msra.mxu3 %v4880_v38 }
 0x692   :  { %v3113_v33 = vpop.f32.mrf.mxu1 }
 0x694   :  { %v3064_v10 = vpop.f32.mrf.mxu0 }
 0x695   :  { %v3146_v58 = vadd.f32 %v3064_v10, %v7295_v34 }
 0x697   :  { %v3287_v63 = vpop.f32.mrf.mxu2  ;;  %v3336_v20 = vpop.f32.mrf.mxu3 }
 0x698   :  { %v3371_v4 = vadd.f32 %v3287_v63, %v3138_v29  ;;  %v3372_v14 = vadd.f32 %v3336_v20, %v3139_v60  ;;  %v3147_v29 = vadd.f32 %v3113_v33, %v7297_v1 }
 0x69a   :  { %v3391_v56 = vmax.f32 %v3367_v59, %v3371_v4  ;;  %v3392_v3 = vmax.f32 %v3368_v13, %v3372_v14  ;;  %v3115_v13 = vpop.f32.mrf.mxu1  ;;  %v3144_v4 = vadd.f32 %v3061_v0, %v7273_v32 }
 0x69b   :  { %v3149_v34 = vadd.f32 %v3115_v13, %v7311_v6 }
 0x69c   :  { %v3403_v54 = vmax.f32 %v3391_v56, %v3392_v3  ;;  %v3066_v59 = vpop.f32.mrf.mxu0 }
 0x69d   :  { %v3148_v61 = vadd.f32 %v3066_v59, %v7309_v7 }
 0x69e   :  { %v3415_v47 = vadd.f32 %v7360_v26, %v3403_v54 }
 0x69f   :  { %v3289_v27 = vpop.f32.mrf.mxu2  ;;  %v3338_v53 = vpop.f32.mrf.mxu3 }
 0x6a0   :  { %v3373_v11 = vadd.f32 %v3289_v27, %v3140_v43  ;;  %v3374_v36 = vadd.f32 %v3338_v53, %v3141_v19  ;;  %v3423_v25 = vmax.f32 %v3415_v47, 0.0  ;;  %v3793_v27 = vld [vmem:[%s7485_s7 + $0x18] sm:$0x1] }
 0x6a1   :  { %v3811_v53 = vunpack.c.l.b16 %v3793_v27 }
 0x6a2   :  { %v3393_v23 = vmax.f32 %v3369_v28, %v3373_v11  ;;  %v3394_v39 = vmax.f32 %v3370_v18, %v3374_v36  ;;  %v3431_v2 = vpack.c.bf16 %v3423_v25, %v3423_v25  ;;  %v4889_v11 = vld [vmem:[%s7485_s7 + $0x8] sm:$0xff]  ;;  %v4888_v36 = vld [vmem:[%s7485_s7] sm:$0xff] }
 0x6a3   :  { %v3815_v18 = vpack.c.b16 %v3811_v53, %v3811_v53 }
 0x6a4   :  { %v3404_v45 = vmax.f32 %v3393_v23, %v3394_v39  ;;  %v3623_v37 = vunpack.c.l.b16 %v3431_v2 }
 0x6a5   :  { %v3825_v47 = vsel %vm3823_vm2, %v3815_v18, 0 }
 0x6a6   :  { %v3416_v42 = vadd.f32 %v7360_v26, %v3404_v45  ;;  %3831 = vmatpush.bf16.msrb.mxu0 %v3825_v47 }
 0x6a7   :  { %v3292_v9 = vpop.f32.mrf.mxu2  ;;  %v3341_v46 = vpop.f32.mrf.mxu3 }
 0x6a8   :  { %v3424_v50 = vmax.f32 %v3416_v42, 0.0  ;;  %v3375_v21 = vadd.f32 %v3292_v9, %v3142_v30  ;;  %v3376_v22 = vadd.f32 %v3341_v46, %v3143_v35  ;;  %v4894_v30 = vld [vmem:[%s7484_s8] ss:$0 sm:$0xff] }
 0x6aa   :  { %v3432_v8 = vpack.c.bf16 %v3424_v50, %v3424_v50 }
 0x6ac   :  { %v3624_v24 = vunpack.c.l.b16 %v3432_v8  ;;  %v4893_v8 = vld [vmem:[%s7483_s6] ss:$0 sm:$0xff] }
 0x6ae   :  { %v3625_v17 = vpack.c.b16 %v3624_v24, %v3623_v37 }
 0x6af   :  { %v3294_v31 = vpop.f32.mrf.mxu2  ;;  %v3343_v15 = vpop.f32.mrf.mxu3 }
 0x6b0   :  { %3683 = vmatmul.bf16.vlgmr.msra.gmra.mxu2 %v3625_v17  ;;  %v3377_v1 = vadd.f32 %v3294_v31, %v3144_v4  ;;  %v3378_v12 = vadd.f32 %v3343_v15, %v3145_v51 }
 0x6b7   :  { %v3297_v60 = vpop.f32.mrf.mxu2  ;;  %v3346_v57 = vpop.f32.mrf.mxu3 }
 0x6b8   :  { %v3379_v40 = vadd.f32 %v3297_v60, %v3146_v58  ;;  %v3380_v16 = vadd.f32 %v3346_v57, %v3147_v29 }
 0x6ba   :  { %v3395_v55 = vmax.f32 %v3375_v21, %v3379_v40  ;;  %v3396_v63 = vmax.f32 %v3376_v22, %v3380_v16 }
 0x6bc   :  { %v3405_v20 = vmax.f32 %v3395_v55, %v3396_v63 }
 0x6be   :  { %v3417_v56 = vadd.f32 %v7360_v26, %v3405_v20 }
 0x6bf   :  { %v3299_v14 = vpop.f32.mrf.mxu2  ;;  %v3348_v5 = vpop.f32.mrf.mxu3 }
 0x6c0   :  { %v3381_v3 = vadd.f32 %v3299_v14, %v3148_v61  ;;  %v3382_v54 = vadd.f32 %v3348_v5, %v3149_v34  ;;  %v3425_v44 = vmax.f32 %v3417_v56, 0.0 }
 0x6c2   :  { %v3397_v41 = vmax.f32 %v3377_v1, %v3381_v3  ;;  %v3398_v49 = vmax.f32 %v3378_v12, %v3382_v54  ;;  %v3433_v43 = vpack.c.bf16 %v3425_v44, %v3425_v44 }
 0x6c4   :  { %v3406_v62 = vmax.f32 %v3397_v41, %v3398_v49  ;;  %v3710_v7 = vunpack.c.l.b16 %v3433_v43 }
 0x6c6   :  { %v3418_v32 = vadd.f32 %v7360_v26, %v3406_v62  ;;  %v4890_v26 = vld [vmem:[%s7485_s7 + $0x10] sm:$0xff] }
 0x6c7   :  { %3832 = vmatpush.bf16.msrb.mxu0 %v4890_v26 }
 0x6c8   :  { %v3426_v52 = vmax.f32 %v3418_v32, 0.0 }
 0x6ca   :  { %v3434_v19 = vpack.c.bf16 %v3426_v52, %v3426_v52 }
 0x6cb   :  { %3833 = vmatpush.bf16.msrb.mxu0 %v4889_v11 }
 0x6cc   :  { %v3711_v28 = vunpack.c.l.b16 %v3434_v19 }
 0x6ce   :  { %v3712_v6 = vpack.c.b16 %v3711_v28, %v3710_v7 }
 0x6cf   :  { %3834 = vmatpush.bf16.msrb.mxu0 %v4888_v36 }
 0x6d0   :  { %3770 = vmatmul.bf16.vlgmr.msra.gmra.mxu3 %v3712_v6 }
 0x6ed   :  { %v3599_v39 = vpop.f32.mrf.mxu1 }
 0x6f5   :  { %v3601_v2 = vpop.f32.mrf.mxu1 }
 0x70d   :  { %v3531_v23 = vpop.f32.mrf.mxu0 }
 0x70e   :  { %v3600_v42 = vadd.f32 %v3599_v39, %v3531_v23 }
 0x715   :  { %v3533_v9 = vpop.f32.mrf.mxu0 }
 0x716   :  { %v3602_v0 = vadd.f32 %v3601_v2, %v3533_v9 }
 0x733   :  { %v3684_v25 = vpop.f32.mrf.mxu2 }
 0x734   :  { %v3689_v46 = vadd.f32 %v3684_v25, %v3600_v42 }
 0x73b   :  { %v3686_v50 = vpop.f32.mrf.mxu2 }
 0x73c   :  { %v3690_v37 = vadd.f32 %v3686_v50, %v3602_v0 }
 0x753   :  { %v3771_v45 = vpop.f32.mrf.mxu3 }
 0x754   :  { %v3776_v48 = vadd.f32 %v3771_v45, %v3689_v46 }
 0x756   :  { %v3782_v38 = vadd.f32 %v4893_v8, %v3776_v48 }
 0x758   :  { %v3784_v15 = vmax.f32 %v3782_v38, 0.0 }
 0x75b   :  { %v3773_v24 = vpop.f32.mrf.mxu3 }
 0x75c   :  { %v3777_v17 = vadd.f32 %v3773_v24, %v3690_v37 }
 0x75e   :  { %v3783_v31 = vadd.f32 %v4893_v8, %v3777_v17 }
 0x760   :  { %v3785_v10 = vmax.f32 %v3783_v31, 0.0 }
 0x762   :  { %v3786_v33 = vpack.c.bf16 %v3785_v10, %v3784_v15 }
 0x764   :  { %4755 = vmatmul.msk.bf16.vlgmr.msrb.gmra.mxu0 %vm3819_vm3, %v3786_v33 }
 0x7e1   :  { %v3836_v35 = vpop.f32.mrf.mxu0 }
 0x7e2   :  { %v3837_v58 = vadd.f32 %v4894_v30, %v3836_v35 }
 0x7e4   :  { %3841 = vst [vmem:[%s7486_s9] sm:$0xff] %v3837_v58 }
 0x7e9   :  { %v3838_v29 = vpop.f32.mrf.mxu0 }
 0x7ea   :  { %v3839_v60 = vadd.f32 %v4894_v30, %v3838_v29 }
 0x7ec   :  { %3842 = vst [vmem:[%s7486_s9 + $0x8] sm:$0xff] %v3839_v60 }

</bundles_post_ra>
